<compile_context>
chip_gen: v6e
topology: v6e:2x2x1
jax: 0.10.0
libtpu: 0.0.40
codegen_flags: <defaults>
</compile_context>

<pallas_src>
import jax
import jax.numpy as jnp
from jax import lax
from jax.experimental import pallas as pl
from jax.experimental.pallas import tpu as pltpu

# ---------------- small synthetic configuration ----------------
B = 2
N_FFT = 32
HOP = 16
F_BINS = N_FFT // 2 + 1                     # 17 frequency bins
WAVE_LEN = 128
T_FRAMES = (WAVE_LEN - N_FFT) // HOP + 1    # 7 time frames
N_CH = 4                                    # n_channels (16 in the original module)
ENC_DIM = 32                                # encoder_dim (512 in the original module)
NUM_LAYERS = 2
OUT_DIM = F_BINS                            # mask: one value per frequency bin
F_MID = F_BINS - 2                          # freq bins after first (3,1) conv
F_AFTER = F_BINS - 4                        # freq bins after second (3,1) conv
LSTM_IN = 2 * N_CH * F_AFTER                # analogue of input_size = 16 * 506
BN_EPS = 1e-5


def _round_up(x, m):
    return ((x + m - 1) // m) * m


LSTM_IN_P = _round_up(LSTM_IN, 128)         # lane-dense encoder output width / layer-0 K
GATE_P = _round_up(4 * ENC_DIM, 128)        # lane-dense gate width (== 4H here)
F_PAD = _round_up(OUT_DIM, 128)             # lane-dense mask / final output width
ENC_TR = 8                                  # encoder row tile (sublane multiple)

# MXU operand dtype (accumulation stays f32).  bf16 per the perf review: weights are
# pre-cast/pre-padded outside jit; flip to jnp.float32 for exact f32 parity checks.
MXU_DTYPE = jnp.bfloat16

_VMEM = pl.BlockSpec(memory_space=pltpu.MemorySpace.VMEM)
_SMEM = pl.BlockSpec(memory_space=pltpu.MemorySpace.SMEM)


# ============================ Pallas kernels ============================

def encoder_kernel(w1_ref, c1_ref, w2_ref, c2_ref, x_ref, y_ref):
    """Conv2d(1->C,(3,1))+BN+ReLU, Conv2d(C->C,(3,1))+BN+ReLU for farend AND mixture.

    x_ref:  (2, tr, F)       (source, rows=(time,batch), freq-on-lanes) magnitude tile
    w1_ref: SMEM (C*3,)      folded conv1*BN weights, index 3*c + k
    c1_ref: SMEM (C,)        folded conv1 bias + BN shift
    w2_ref: SMEM (C*C*3,)    folded conv2*BN weights, index (c*C + d)*3 + k
    c2_ref: SMEM (C,)
    y_ref:  (tr, LSTM_IN_P)  features ordered (source, channel, freq), zero-padded lane-dense
    """
    _, tr, F = x_ref.shape
    F1 = F - 2
    F2 = F - 4
    C = c1_ref.shape[0]
    outs = []
    for s in range(2):
        x = x_ref[s]                                           # (tr, F)
        h = []
        for c in range(C):                                     # conv1 + BN + ReLU
            hc = (w1_ref[3 * c + 0] * x[:, 0:F1]
                  + w1_ref[3 * c + 1] * x[:, 1:F1 + 1]
                  + w1_ref[3 * c + 2] * x[:, 2:F1 + 2]
                  + c1_ref[c])
            h.append(jnp.maximum(hc, 0.0))
        # TODO(synk): at production channel counts (C=16) lower this channel contraction
        # onto the MXU via the (3*C_in, C_out) im2col weight instead of scalar VPU MACs.
        for c in range(C):                                     # conv2 + BN + ReLU
            acc = None
            for d in range(C):
                hd = h[d]
                for k in range(3):
                    term = w2_ref[(c * C + d) * 3 + k] * hd[:, k:k + F2]
                    acc = term if acc is None else acc + term
            outs.append(jnp.maximum(acc + c2_ref[c], 0.0))
    feat = jnp.concatenate(outs, axis=-1)                      # (tr, 2*C*F_AFTER)
    pad = y_ref.shape[1] - feat.shape[1]
    if pad:                                                    # keep store lane-dense / NaN-safe
        feat = jnp.concatenate([feat, jnp.zeros((tr, pad), feat.dtype)], axis=-1)
    y_ref[...] = feat


def matmul_bias_kernel(x_ref, w_ref, b_ref, o_ref, acc_ref):
    """Grid-tiled (M, K) @ (K, N) + bias; bias seeds the f32 accumulator at k == 0."""
    k = pl.program_id(2)

    @pl.when(k == 0)
    def _():
        acc_ref[...] = jnp.broadcast_to(b_ref[...], acc_ref.shape).astype(jnp.float32)

    acc_ref[...] += jnp.dot(x_ref[...].astype(w_ref.dtype), w_ref[...],
                            preferred_element_type=jnp.float32)

    @pl.when(k == pl.num_programs(2) - 1)
    def _():
        o_ref[...] = acc_ref[...].astype(o_ref.dtype)


def lstm_recurrence_kernel(gx_ref, whh_ref, y_ref):
    """LSTM recurrence with the input projection already hoisted out.

    gx_ref: (T, B, 4H[+pad])  precomputed x_t @ W_ih^T + (b_ih + b_hh)
    whh_ref: (H, 4H[+pad])    W_hh^T, bf16
    y_ref:  (T, B, H)
    PyTorch gate order: i, f, g, o.  Zero initial state.
    """
    T, Bx, G4 = gx_ref.shape
    H = whh_ref.shape[0]
    h = jnp.zeros((Bx, H), jnp.float32)
    c = jnp.zeros((Bx, H), jnp.float32)
    if H < 128:
        # Full-width nonlinearity + lane-mask select (avoids sub-128-lane EUP ops).
        lane = lax.broadcasted_iota(jnp.int32, (Bx, G4), 1)
        g_block = (lane >= 2 * H) & (lane < 3 * H)

    # T is small & static -> full unroll; h is stored per step (bounded vreg pressure).
    # For long sequences this would be chunked into sublane-aligned slabs.
    for t in range(T):
        gates = gx_ref[t] + jnp.dot(h.astype(whh_ref.dtype), whh_ref[...],
                                    preferred_element_type=jnp.float32)
        if H >= 128:
            i_g = jax.nn.sigmoid(gates[:, 0:H])
            f_g = jax.nn.sigmoid(gates[:, H:2 * H])
            g_g = jnp.tanh(gates[:, 2 * H:3 * H])
            o_g = jax.nn.sigmoid(gates[:, 3 * H:4 * H])
        else:
            act = jnp.where(g_block, jnp.tanh(gates), jax.nn.sigmoid(gates))
            i_g = act[:, 0:H]
            f_g = act[:, H:2 * H]
            g_g = act[:, 2 * H:3 * H]
            o_g = act[:, 3 * H:4 * H]
        c = f_g * c + i_g * g_g
        h = o_g * jnp.tanh(c)
        y_ref[t, :, :] = h


def final_mask_kernel(y_ref, wf_ref, bf_ref, spec_ref, est_ref):
    """mask = Linear(lstm_out); spec_estimate = spec_mixture * mask (real & imag at once).

    y_ref: (TB, H); wf_ref: (H, F_PAD) bf16; bf_ref: (1, F_PAD);
    spec_ref/est_ref: (2, TB, F_PAD) (re, im), lane-dense (padded bins are zero).
    """
    mask = jnp.dot(y_ref[...].astype(wf_ref.dtype), wf_ref[...],
                   preferred_element_type=jnp.float32) + bf_ref[...]
    est_ref[...] = spec_ref[...] * mask[None, :, :]


# ============================ Pallas wrappers ============================

def run_encoder(x_src, ep):
    """x_src: (2, Rp, F) f32 magnitudes -> (Rp, LSTM_IN_P) f32, lane-dense features."""
    _, Rp, F = x_src.shape
    return pl.pallas_call(
        encoder_kernel,
        out_shape=jax.ShapeDtypeStruct((Rp, LSTM_IN_P), jnp.float32),
        grid=(Rp // ENC_TR,),
        in_specs=[_SMEM, _SMEM, _SMEM, _SMEM,
                  pl.BlockSpec((2, ENC_TR, F), lambda i: (0, i, 0))],
        out_specs=pl.BlockSpec((ENC_TR, LSTM_IN_P), lambda i: (i, 0)),
        compiler_params=pltpu.CompilerParams(dimension_semantics=("parallel",)),
    )(ep["w1"], ep["c1"], ep["w2"], ep["c2"], x_src)


def _pick_tile(dim, preferred, unit):
    """Largest multiple of `unit` dividing `dim` and <= preferred (else the full dim)."""
    if dim <= preferred or dim % unit:
        return dim
    t = (preferred // unit) * unit
    while dim % t:
        t -= unit
    return t


def matmul_bias(x, w, b2d, *, tm=256, tn=512, tk=512):
    """x(M,K) f32 @ w(K,N) bf16 + b(1,N) f32 -> (M,N) f32.

    Weights/bias arrive pre-padded & pre-cast (prepare_params); only the activation's
    M dim may need padding here.
    """
    M, K = x.shape
    Kw, N = w.shape
    assert K == Kw, (K, Kw)
    tm = min(tm, _round_up(M, 8))
    tn = _pick_tile(N, tn, 128)
    tk = _pick_tile(K, tk, 128)
    Mp = _round_up(M, tm)
    if Mp != M:
        x = jnp.pad(x, ((0, Mp - M), (0, 0)))
    grid = (Mp // tm, N // tn, K // tk)
    # Right-sized VMEM budget: double-buffered in/out blocks + f32 accumulator (+4x margin).
    vmem_est = (2 * (tm * tk * x.dtype.itemsize + tk * tn * w.dtype.itemsize
                     + tn * 4 + tm * tn * 4) + tm * tn * 4)
    out = pl.pallas_call(
        matmul_bias_kernel,
        out_shape=jax.ShapeDtypeStruct((Mp, N), jnp.float32),
        grid_spec=pltpu.PrefetchScalarGridSpec(
            num_scalar_prefetch=0,
            grid=grid,
            in_specs=[pl.BlockSpec((tm, tk), lambda i, j, k: (i, k)),
                      pl.BlockSpec((tk, tn), lambda i, j, k: (k, j)),
                      pl.BlockSpec((1, tn), lambda i, j, k: (0, j))],
            out_specs=pl.BlockSpec((tm, tn), lambda i, j, k: (i, j)),
            scratch_shapes=[pltpu.VMEM((tm, tn), jnp.float32)]),
        compiler_params=pltpu.CompilerParams(
            dimension_semantics=("parallel", "parallel", "arbitrary"),
            vmem_limit_bytes=int(min(96 << 20, max(4 << 20, 4 * vmem_est)))),
    )(x, w, b2d)
    return out[:M]


def run_lstm_recurrence(gates_x, whh):
    T, Bx, _ = gates_x.shape
    H = whh.shape[0]
    return pl.pallas_call(
        lstm_recurrence_kernel,
        out_shape=jax.ShapeDtypeStruct((T, Bx, H), jnp.float32),
        in_specs=[_VMEM, _VMEM],
        out_specs=_VMEM,
    )(gates_x, whh)


def run_final_mask(y2d, wfT, bf, spec_stacked):
    _, TBr, FP = spec_stacked.shape
    return pl.pallas_call(
        final_mask_kernel,
        out_shape=jax.ShapeDtypeStruct((2, TBr, FP), jnp.float32),
        in_specs=[_VMEM] * 4,
        out_specs=_VMEM,
    )(y2d, wfT, bf, spec_stacked)


# ============================ STFT glue (plain JAX) ============================

def _hann(n):
    k = jnp.arange(n, dtype=jnp.float32)
    return 0.5 * (1.0 - jnp.cos(2.0 * jnp.pi * k / n))


def wave_to_spec(wave):
    win = _hann(N_FFT)
    idx = jnp.arange(T_FRAMES)[:, None] * HOP + jnp.arange(N_FFT)[None, :]
    frames = wave[:, idx] * win[None, None, :]               # (B, T, n_fft)
    spec = jnp.fft.rfft(frames, axis=-1)                     # (B, T, F)
    return jnp.transpose(spec, (0, 2, 1))                    # (B, F, T) complex64


def spec_to_wave(spec, length):
    win = _hann(N_FFT)
    frames = jnp.fft.irfft(jnp.transpose(spec, (0, 2, 1)), n=N_FFT, axis=-1)
    frames = frames * win[None, None, :]
    out_len = (T_FRAMES - 1) * HOP + N_FFT
    wave = jnp.zeros((spec.shape[0], out_len), jnp.float32)
    norm = jnp.zeros((out_len,), jnp.float32)
    for t in range(T_FRAMES):
        wave = wave.at[:, t * HOP:t * HOP + N_FFT].add(frames[:, t, :])
        norm = norm.at[t * HOP:t * HOP + N_FFT].add(win * win)
    wave = wave / jnp.maximum(norm, 1e-8)[None, :]
    if out_len >= length:
        return wave[:, :length]
    return jnp.pad(wave, ((0, 0), (0, length - out_len)))


# ============================ parameters ============================

def _fold_bn(gamma, beta, mean, var):
    s = gamma / jnp.sqrt(var + BN_EPS)
    t = beta - mean * s
    return s, t


def init_params(key):
    """PyTorch-layout parameters of the original module (the reference forward applies
    farend_encoder to BOTH inputs, so only one encoder's weights are used)."""
    ks = jax.random.split(key, 32)
    p = {}

    def bn_params(k):
        k1, k2, k3, k4 = jax.random.split(k, 4)
        gamma = 1.0 + 0.1 * jax.random.normal(k1, (N_CH,), jnp.float32)
        beta = 0.1 * jax.random.normal(k2, (N_CH,), jnp.float32)
        mean = 0.1 * jax.random.normal(k3, (N_CH,), jnp.float32)
        var = 0.9 + 0.1 * jnp.abs(jax.random.normal(k4, (N_CH,), jnp.float32))
        return gamma, beta, mean, var

    p["w1"] = 0.3 * jax.random.normal(ks[0], (N_CH, 1, 3), jnp.float32)
    p["b1"] = 0.1 * jax.random.normal(ks[1], (N_CH,), jnp.float32)
    p["bn1"] = bn_params(ks[2])
    p["w2"] = 0.3 * jax.random.normal(ks[3], (N_CH, N_CH, 3), jnp.float32)
    p["b2"] = 0.1 * jax.random.normal(ks[4], (N_CH,), jnp.float32)
    p["bn2"] = bn_params(ks[5])

    scale = 1.0 / jnp.sqrt(jnp.float32(ENC_DIM))
    lstm = []
    for l in range(NUM_LAYERS):
        din = LSTM_IN if l == 0 else ENC_DIM
        kk = jax.random.split(ks[6 + l], 4)
        lstm.append({
            "w_ih": scale * jax.random.normal(kk[0], (4 * ENC_DIM, din), jnp.float32),
            "w_hh": scale * jax.random.normal(kk[1], (4 * ENC_DIM, ENC_DIM), jnp.float32),
            "b_ih": scale * jax.random.normal(kk[2], (4 * ENC_DIM,), jnp.float32),
            "b_hh": scale * jax.random.normal(kk[3], (4 * ENC_DIM,), jnp.float32),
        })
    p["lstm"] = lstm

    p["w_f"] = scale * jax.random.normal(ks[20], (OUT_DIM, ENC_DIM), jnp.float32)
    p["b_f"] = scale * jax.random.normal(ks[21], (OUT_DIM,), jnp.float32)
    return p


def prepare_params(raw):
    """Pack PyTorch-layout parameters into kernel-ready form ONCE, outside jit:
    BN folding, W_ih row permutation, zero-padding to lane-dense shapes, bf16 cast."""
    s1, t1 = _fold_bn(*raw["bn1"])
    s2, t2 = _fold_bn(*raw["bn2"])
    w1, b1, w2, b2 = raw["w1"], raw["b1"], raw["w2"], raw["b2"]

    enc = {
        "w1": (w1[:, 0, :] * s1[:, None]).reshape(-1).astype(jnp.float32),      # [3*c + k]
        "c1": (b1 * s1 + t1).astype(jnp.float32),
        "w2": (w2 * s2[:, None, None]).reshape(-1).astype(jnp.float32),         # [(c*C+d)*3+k]
        "c2": (b2 * s2 + t2).astype(jnp.float32),
    }

    # Fold PyTorch's cat(dim=-2)/view/transpose feature order into a W_ih row permutation:
    # our feature i = s*C*F_AFTER + c*F_AFTER + f  <->  torch feature c*2*F_AFTER + s*F_AFTER + f.
    i = jnp.arange(LSTM_IN)
    s_idx = i // (N_CH * F_AFTER)
    rem = i % (N_CH * F_AFTER)
    c_idx = rem // F_AFTER
    f_idx = rem % F_AFTER
    perm = c_idx * (2 * F_AFTER) + s_idx * F_AFTER + f_idx

    lstm = []
    for l, lp in enumerate(raw["lstm"]):
        wihT = lp["w_ih"].T                                   # (Din, 4H) torch row order
        if l == 0:
            wihT = jnp.take(wihT, perm, axis=0)               # reorder rows to our layout
            wihT = jnp.pad(wihT, ((0, LSTM_IN_P - LSTM_IN), (0, GATE_P - 4 * ENC_DIM)))
        else:
            wihT = jnp.pad(wihT, ((0, 0), (0, GATE_P - 4 * ENC_DIM)))
        whh = jnp.pad(lp["w_hh"].T, ((0, 0), (0, GATE_P - 4 * ENC_DIM)))
        b = jnp.pad(lp["b_ih"] + lp["b_hh"], (0, GATE_P - 4 * ENC_DIM)).reshape(1, GATE_P)
        lstm.append({"wihT": wihT.astype(MXU_DTYPE),
                     "whh": whh.astype(MXU_DTYPE),
                     "b": b.astype(jnp.float32)})

    wfT = jnp.pad(raw["w_f"].T, ((0, 0), (0, F_PAD - OUT_DIM))).astype(MXU_DTYPE)
    bf = jnp.pad(raw["b_f"], (0, F_PAD - OUT_DIM)).reshape(1, F_PAD).astype(jnp.float32)

    return {"enc": enc, "lstm": lstm, "final": {"wfT": wfT, "bf": bf}}


# ============================ full forward ============================

def conformer_forward(farend, mixture, kp):
    spec_far = wave_to_spec(farend)                          # (B, F, T) complex
    spec_mix = wave_to_spec(mixture)
    mag_far = jnp.abs(spec_far)
    mag_mix = jnp.abs(spec_mix)

    TB = T_FRAMES * B
    # rows ordered (time, batch); both sources stacked on a leading axis for one encoder call
    far_rows = jnp.transpose(mag_far, (2, 0, 1)).reshape(TB, F_BINS)
    mix_rows = jnp.transpose(mag_mix, (2, 0, 1)).reshape(TB, F_BINS)
    x_src = jnp.stack([far_rows, mix_rows], axis=0).astype(jnp.float32)   # (2, TB, F)
    Rp = _round_up(TB, ENC_TR)
    if Rp != TB:
        x_src = jnp.pad(x_src, ((0, 0), (0, Rp - TB), (0, 0)))

    # encoder output is already (rows, LSTM_IN_P) lane-dense, sources side-by-side ->
    # feeds the layer-0 input projection with no re-layout / concatenation.
    x2d = run_encoder(x_src, kp["enc"])                      # (Rp, LSTM_IN_P)

    for l in range(NUM_LAYERS):
        lp = kp["lstm"][l]
        gx = matmul_bias(x2d, lp["wihT"], lp["b"])           # (rows, GATE_P)
        gx = gx[:TB].reshape(T_FRAMES, B, GATE_P)
        y = run_lstm_recurrence(gx, lp["whh"])               # (T, B, H) f32
        x2d = y.reshape(TB, ENC_DIM)

    spec_tbf = jnp.transpose(spec_mix, (2, 0, 1)).reshape(TB, F_BINS)     # rows (t, b)
    spec_stacked = jnp.stack([jnp.real(spec_tbf), jnp.imag(spec_tbf)],
                             axis=0).astype(jnp.float32)                  # (2, TB, F)
    spec_stacked = jnp.pad(spec_stacked, ((0, 0), (0, 0), (0, F_PAD - F_BINS)))
    est = run_final_mask(x2d, kp["final"]["wfT"], kp["final"]["bf"], spec_stacked)
    est = est[:, :, :F_BINS]                                              # (2, TB, F)
    est_c = est[0] + 1j * est[1]
    spec_est = jnp.transpose(est_c.reshape(T_FRAMES, B, F_BINS), (1, 2, 0))   # (B, F, T)
    return spec_to_wave(spec_est, mixture.shape[-1])


# ============================ main ============================

if __name__ == "__main__":
    key = jax.random.PRNGKey(0)
    k_par, k_far, k_mix = jax.random.split(key, 3)
    params = prepare_params(init_params(k_par))
    farend = jax.random.normal(k_far, (B, WAVE_LEN), jnp.float32)
    mixture = jax.random.normal(k_mix, (B, WAVE_LEN), jnp.float32)

    fwd = jax.jit(conformer_forward)
    wave_est = fwd(farend, mixture, params)
    wave_est = jax.block_until_ready(wave_est)

    assert wave_est.shape == (B, WAVE_LEN)
    assert bool(jnp.all(jnp.isfinite(wave_est)))
    print("KERNEL_OK")
</pallas_src>

<mosaic_0001>
module attributes {stable_mosaic.version = 11 : i64} {
  func.func @lstm_recurrence_kernel(%arg0: memref<7x2x128xf32, #tpu.memory_space<vmem>>, %arg1: memref<32x128xbf16, #tpu.memory_space<vmem>>, %arg2: memref<7x2x32xf32, #tpu.memory_space<vmem>>) attributes {dimension_semantics = [], scalar_prefetch = 0 : i64, scratch_operands = 0 : i64, tpu.core_type = #tpu.core_type<tc>} {
    %cst = arith.constant 0.000000e+00 : f32
    %0 = vector.broadcast %cst : f32 to vector<2x32xf32>
    %cst_0 = arith.constant 0.000000e+00 : f32
    %1 = vector.broadcast %cst_0 : f32 to vector<2x32xf32>
    %2 = tpu.iota {dimensions = array<i32: 1>} : vector<2x128xi32>
    %c64_i32 = arith.constant 64 : i32
    %3 = vector.broadcast %c64_i32 : i32 to vector<2x128xi32>
    %4 = arith.cmpi sge, %2, %3 : vector<2x128xi32>
    %c96_i32 = arith.constant 96 : i32
    %5 = vector.broadcast %c96_i32 : i32 to vector<2x128xi32>
    %6 = arith.cmpi slt, %2, %5 : vector<2x128xi32>
    %7 = arith.andi %4, %6 : vector<2x128xi1>
    %c0 = arith.constant 0 : index
    %c0_1 = arith.constant 0 : index
    %c0_2 = arith.constant 0 : index
    %8 = vector.load %arg0[%c0, %c0_1, %c0_2] : memref<7x2x128xf32, #tpu.memory_space<vmem>>, vector<1x2x128xf32>
    %9 = vector.shape_cast %8 : vector<1x2x128xf32> to vector<2x128xf32>
    %10 = arith.truncf %0 : vector<2x32xf32> to vector<2x32xbf16>
    %c0_3 = arith.constant 0 : index
    %c0_4 = arith.constant 0 : index
    %11 = vector.load %arg1[%c0_3, %c0_4] : memref<32x128xbf16, #tpu.memory_space<vmem>>, vector<32x128xbf16>
    %cst_5 = arith.constant dense<0.000000e+00> : vector<2x128xf32>
    %12 = tpu.matmul %10, %11, %cst_5 {dimension_numbers = #tpu.dot_dimension_numbers<[1], [0], [0], [1], [0, 0, 1, 1], [], []>} : vector<2x32xbf16>, vector<32x128xbf16>, vector<2x128xf32> -> vector<2x128xf32>
    %13 = arith.addf %9, %12 : vector<2x128xf32>
    %14 = math.tanh %13 : vector<2x128xf32>
    %15 = arith.negf %13 : vector<2x128xf32>
    %16 = math.exp %15 : vector<2x128xf32>
    %cst_6 = arith.constant 1.000000e+00 : f32
    %17 = vector.broadcast %cst_6 : f32 to vector<2x128xf32>
    %18 = arith.addf %17, %16 : vector<2x128xf32>
    %19 = arith.divf %17, %18 : vector<2x128xf32>
    %20 = arith.select %7, %14, %19 : vector<2x128xi1>, vector<2x128xf32>
    %21 = vector.extract_strided_slice %20 {offsets = [0, 0], sizes = [2, 32], strides = [1, 1]} : vector<2x128xf32> to vector<2x32xf32>
    %22 = vector.extract_strided_slice %20 {offsets = [0, 32], sizes = [2, 32], strides = [1, 1]} : vector<2x128xf32> to vector<2x32xf32>
    %23 = vector.extract_strided_slice %20 {offsets = [0, 64], sizes = [2, 32], strides = [1, 1]} : vector<2x128xf32> to vector<2x32xf32>
    %24 = vector.extract_strided_slice %20 {offsets = [0, 96], sizes = [2, 32], strides = [1, 1]} : vector<2x128xf32> to vector<2x32xf32>
    %25 = arith.mulf %22, %1 : vector<2x32xf32>
    %26 = arith.mulf %21, %23 : vector<2x32xf32>
    %27 = arith.addf %25, %26 : vector<2x32xf32>
    %28 = math.tanh %27 : vector<2x32xf32>
    %29 = arith.mulf %24, %28 : vector<2x32xf32>
    %c0_7 = arith.constant 0 : index
    %c0_8 = arith.constant 0 : index
    %c0_9 = arith.constant 0 : index
    %30 = vector.load %arg2[%c0_7, %c0_8, %c0_9] : memref<7x2x32xf32, #tpu.memory_space<vmem>>, vector<1x2x32xf32>
    %31 = vector.shape_cast %30 : vector<1x2x32xf32> to vector<2x32xf32>
    %32 = vector.shape_cast %29 : vector<2x32xf32> to vector<1x2x32xf32>
    tpu.vector_store %arg2[%c0_7, %c0_8, %c0_9], %32 {strides = array<i32>} : memref<7x2x32xf32, #tpu.memory_space<vmem>>, vector<1x2x32xf32>,
    %c1 = arith.constant 1 : index
    %c0_10 = arith.constant 0 : index
    %c0_11 = arith.constant 0 : index
    %33 = vector.load %arg0[%c1, %c0_10, %c0_11] : memref<7x2x128xf32, #tpu.memory_space<vmem>>, vector<1x2x128xf32>
    %34 = vector.shape_cast %33 : vector<1x2x128xf32> to vector<2x128xf32>
    %35 = arith.truncf %29 : vector<2x32xf32> to vector<2x32xbf16>
    %c0_12 = arith.constant 0 : index
    %c0_13 = arith.constant 0 : index
    %36 = vector.load %arg1[%c0_12, %c0_13] : memref<32x128xbf16, #tpu.memory_space<vmem>>, vector<32x128xbf16>
    %cst_14 = arith.constant dense<0.000000e+00> : vector<2x128xf32>
    %37 = tpu.matmul %35, %36, %cst_14 {dimension_numbers = #tpu.dot_dimension_numbers<[1], [0], [0], [1], [0, 0, 1, 1], [], []>} : vector<2x32xbf16>, vector<32x128xbf16>, vector<2x128xf32> -> vector<2x128xf32>
    %38 = arith.addf %34, %37 : vector<2x128xf32>
    %39 = math.tanh %38 : vector<2x128xf32>
    %40 = arith.negf %38 : vector<2x128xf32>
    %41 = math.exp %40 : vector<2x128xf32>
    %cst_15 = arith.constant 1.000000e+00 : f32
    %42 = vector.broadcast %cst_15 : f32 to vector<2x128xf32>
    %43 = arith.addf %42, %41 : vector<2x128xf32>
    %44 = arith.divf %42, %43 : vector<2x128xf32>
    %45 = arith.select %7, %39, %44 : vector<2x128xi1>, vector<2x128xf32>
    %46 = vector.extract_strided_slice %45 {offsets = [0, 0], sizes = [2, 32], strides = [1, 1]} : vector<2x128xf32> to vector<2x32xf32>
    %47 = vector.extract_strided_slice %45 {offsets = [0, 32], sizes = [2, 32], strides = [1, 1]} : vector<2x128xf32> to vector<2x32xf32>
    %48 = vector.extract_strided_slice %45 {offsets = [0, 64], sizes = [2, 32], strides = [1, 1]} : vector<2x128xf32> to vector<2x32xf32>
    %49 = vector.extract_strided_slice %45 {offsets = [0, 96], sizes = [2, 32], strides = [1, 1]} : vector<2x128xf32> to vector<2x32xf32>
    %50 = arith.mulf %47, %27 : vector<2x32xf32>
    %51 = arith.mulf %46, %48 : vector<2x32xf32>
    %52 = arith.addf %50, %51 : vector<2x32xf32>
    %53 = math.tanh %52 : vector<2x32xf32>
    %54 = arith.mulf %49, %53 : vector<2x32xf32>
    %c1_16 = arith.constant 1 : index
    %c0_17 = arith.constant 0 : index
    %c0_18 = arith.constant 0 : index
    %55 = vector.load %arg2[%c1_16, %c0_17, %c0_18] : memref<7x2x32xf32, #tpu.memory_space<vmem>>, vector<1x2x32xf32>
    %56 = vector.shape_cast %55 : vector<1x2x32xf32> to vector<2x32xf32>
    %57 = vector.shape_cast %54 : vector<2x32xf32> to vector<1x2x32xf32>
    tpu.vector_store %arg2[%c1_16, %c0_17, %c0_18], %57 {strides = array<i32>} : memref<7x2x32xf32, #tpu.memory_space<vmem>>, vector<1x2x32xf32>,
    %c2 = arith.constant 2 : index
    %c0_19 = arith.constant 0 : index
    %c0_20 = arith.constant 0 : index
    %58 = vector.load %arg0[%c2, %c0_19, %c0_20] : memref<7x2x128xf32, #tpu.memory_space<vmem>>, vector<1x2x128xf32>
    %59 = vector.shape_cast %58 : vector<1x2x128xf32> to vector<2x128xf32>
    %60 = arith.truncf %54 : vector<2x32xf32> to vector<2x32xbf16>
    %c0_21 = arith.constant 0 : index
    %c0_22 = arith.constant 0 : index
    %61 = vector.load %arg1[%c0_21, %c0_22] : memref<32x128xbf16, #tpu.memory_space<vmem>>, vector<32x128xbf16>
    %cst_23 = arith.constant dense<0.000000e+00> : vector<2x128xf32>
    %62 = tpu.matmul %60, %61, %cst_23 {dimension_numbers = #tpu.dot_dimension_numbers<[1], [0], [0], [1], [0, 0, 1, 1], [], []>} : vector<2x32xbf16>, vector<32x128xbf16>, vector<2x128xf32> -> vector<2x128xf32>
    %63 = arith.addf %59, %62 : vector<2x128xf32>
    %64 = math.tanh %63 : vector<2x128xf32>
    %65 = arith.negf %63 : vector<2x128xf32>
    %66 = math.exp %65 : vector<2x128xf32>
    %cst_24 = arith.constant 1.000000e+00 : f32
    %67 = vector.broadcast %cst_24 : f32 to vector<2x128xf32>
    %68 = arith.addf %67, %66 : vector<2x128xf32>
    %69 = arith.divf %67, %68 : vector<2x128xf32>
    %70 = arith.select %7, %64, %69 : vector<2x128xi1>, vector<2x128xf32>
    %71 = vector.extract_strided_slice %70 {offsets = [0, 0], sizes = [2, 32], strides = [1, 1]} : vector<2x128xf32> to vector<2x32xf32>
    %72 = vector.extract_strided_slice %70 {offsets = [0, 32], sizes = [2, 32], strides = [1, 1]} : vector<2x128xf32> to vector<2x32xf32>
    %73 = vector.extract_strided_slice %70 {offsets = [0, 64], sizes = [2, 32], strides = [1, 1]} : vector<2x128xf32> to vector<2x32xf32>
    %74 = vector.extract_strided_slice %70 {offsets = [0, 96], sizes = [2, 32], strides = [1, 1]} : vector<2x128xf32> to vector<2x32xf32>
    %75 = arith.mulf %72, %52 : vector<2x32xf32>
    %76 = arith.mulf %71, %73 : vector<2x32xf32>
    %77 = arith.addf %75, %76 : vector<2x32xf32>
    %78 = math.tanh %77 : vector<2x32xf32>
    %79 = arith.mulf %74, %78 : vector<2x32xf32>
    %c2_25 = arith.constant 2 : index
    %c0_26 = arith.constant 0 : index
    %c0_27 = arith.constant 0 : index
    %80 = vector.load %arg2[%c2_25, %c0_26, %c0_27] : memref<7x2x32xf32, #tpu.memory_space<vmem>>, vector<1x2x32xf32>
    %81 = vector.shape_cast %80 : vector<1x2x32xf32> to vector<2x32xf32>
    %82 = vector.shape_cast %79 : vector<2x32xf32> to vector<1x2x32xf32>
    tpu.vector_store %arg2[%c2_25, %c0_26, %c0_27], %82 {strides = array<i32>} : memref<7x2x32xf32, #tpu.memory_space<vmem>>, vector<1x2x32xf32>,
    %c3 = arith.constant 3 : index
    %c0_28 = arith.constant 0 : index
    %c0_29 = arith.constant 0 : index
    %83 = vector.load %arg0[%c3, %c0_28, %c0_29] : memref<7x2x128xf32, #tpu.memory_space<vmem>>, vector<1x2x128xf32>
    %84 = vector.shape_cast %83 : vector<1x2x128xf32> to vector<2x128xf32>
    %85 = arith.truncf %79 : vector<2x32xf32> to vector<2x32xbf16>
    %c0_30 = arith.constant 0 : index
    %c0_31 = arith.constant 0 : index
    %86 = vector.load %arg1[%c0_30, %c0_31] : memref<32x128xbf16, #tpu.memory_space<vmem>>, vector<32x128xbf16>
    %cst_32 = arith.constant dense<0.000000e+00> : vector<2x128xf32>
    %87 = tpu.matmul %85, %86, %cst_32 {dimension_numbers = #tpu.dot_dimension_numbers<[1], [0], [0], [1], [0, 0, 1, 1], [], []>} : vector<2x32xbf16>, vector<32x128xbf16>, vector<2x128xf32> -> vector<2x128xf32>
    %88 = arith.addf %84, %87 : vector<2x128xf32>
    %89 = math.tanh %88 : vector<2x128xf32>
    %90 = arith.negf %88 : vector<2x128xf32>
    %91 = math.exp %90 : vector<2x128xf32>
    %cst_33 = arith.constant 1.000000e+00 : f32
    %92 = vector.broadcast %cst_33 : f32 to vector<2x128xf32>
    %93 = arith.addf %92, %91 : vector<2x128xf32>
    %94 = arith.divf %92, %93 : vector<2x128xf32>
    %95 = arith.select %7, %89, %94 : vector<2x128xi1>, vector<2x128xf32>
    %96 = vector.extract_strided_slice %95 {offsets = [0, 0], sizes = [2, 32], strides = [1, 1]} : vector<2x128xf32> to vector<2x32xf32>
    %97 = vector.extract_strided_slice %95 {offsets = [0, 32], sizes = [2, 32], strides = [1, 1]} : vector<2x128xf32> to vector<2x32xf32>
    %98 = vector.extract_strided_slice %95 {offsets = [0, 64], sizes = [2, 32], strides = [1, 1]} : vector<2x128xf32> to vector<2x32xf32>
    %99 = vector.extract_strided_slice %95 {offsets = [0, 96], sizes = [2, 32], strides = [1, 1]} : vector<2x128xf32> to vector<2x32xf32>
    %100 = arith.mulf %97, %77 : vector<2x32xf32>
    %101 = arith.mulf %96, %98 : vector<2x32xf32>
    %102 = arith.addf %100, %101 : vector<2x32xf32>
    %103 = math.tanh %102 : vector<2x32xf32>
    %104 = arith.mulf %99, %103 : vector<2x32xf32>
    %c3_34 = arith.constant 3 : index
    %c0_35 = arith.constant 0 : index
    %c0_36 = arith.constant 0 : index
    %105 = vector.load %arg2[%c3_34, %c0_35, %c0_36] : memref<7x2x32xf32, #tpu.memory_space<vmem>>, vector<1x2x32xf32>
    %106 = vector.shape_cast %105 : vector<1x2x32xf32> to vector<2x32xf32>
    %107 = vector.shape_cast %104 : vector<2x32xf32> to vector<1x2x32xf32>
    tpu.vector_store %arg2[%c3_34, %c0_35, %c0_36], %107 {strides = array<i32>} : memref<7x2x32xf32, #tpu.memory_space<vmem>>, vector<1x2x32xf32>,
    %c4 = arith.constant 4 : index
    %c0_37 = arith.constant 0 : index
    %c0_38 = arith.constant 0 : index
    %108 = vector.load %arg0[%c4, %c0_37, %c0_38] : memref<7x2x128xf32, #tpu.memory_space<vmem>>, vector<1x2x128xf32>
    %109 = vector.shape_cast %108 : vector<1x2x128xf32> to vector<2x128xf32>
    %110 = arith.truncf %104 : vector<2x32xf32> to vector<2x32xbf16>
    %c0_39 = arith.constant 0 : index
    %c0_40 = arith.constant 0 : index
    %111 = vector.load %arg1[%c0_39, %c0_40] : memref<32x128xbf16, #tpu.memory_space<vmem>>, vector<32x128xbf16>
    %cst_41 = arith.constant dense<0.000000e+00> : vector<2x128xf32>
    %112 = tpu.matmul %110, %111, %cst_41 {dimension_numbers = #tpu.dot_dimension_numbers<[1], [0], [0], [1], [0, 0, 1, 1], [], []>} : vector<2x32xbf16>, vector<32x128xbf16>, vector<2x128xf32> -> vector<2x128xf32>
    %113 = arith.addf %109, %112 : vector<2x128xf32>
    %114 = math.tanh %113 : vector<2x128xf32>
    %115 = arith.negf %113 : vector<2x128xf32>
    %116 = math.exp %115 : vector<2x128xf32>
    %cst_42 = arith.constant 1.000000e+00 : f32
    %117 = vector.broadcast %cst_42 : f32 to vector<2x128xf32>
    %118 = arith.addf %117, %116 : vector<2x128xf32>
    %119 = arith.divf %117, %118 : vector<2x128xf32>
    %120 = arith.select %7, %114, %119 : vector<2x128xi1>, vector<2x128xf32>
    %121 = vector.extract_strided_slice %120 {offsets = [0, 0], sizes = [2, 32], strides = [1, 1]} : vector<2x128xf32> to vector<2x32xf32>
    %122 = vector.extract_strided_slice %120 {offsets = [0, 32], sizes = [2, 32], strides = [1, 1]} : vector<2x128xf32> to vector<2x32xf32>
    %123 = vector.extract_strided_slice %120 {offsets = [0, 64], sizes = [2, 32], strides = [1, 1]} : vector<2x128xf32> to vector<2x32xf32>
    %124 = vector.extract_strided_slice %120 {offsets = [0, 96], sizes = [2, 32], strides = [1, 1]} : vector<2x128xf32> to vector<2x32xf32>
    %125 = arith.mulf %122, %102 : vector<2x32xf32>
    %126 = arith.mulf %121, %123 : vector<2x32xf32>
    %127 = arith.addf %125, %126 : vector<2x32xf32>
    %128 = math.tanh %127 : vector<2x32xf32>
    %129 = arith.mulf %124, %128 : vector<2x32xf32>
    %c4_43 = arith.constant 4 : index
    %c0_44 = arith.constant 0 : index
    %c0_45 = arith.constant 0 : index
    %130 = vector.load %arg2[%c4_43, %c0_44, %c0_45] : memref<7x2x32xf32, #tpu.memory_space<vmem>>, vector<1x2x32xf32>
    %131 = vector.shape_cast %130 : vector<1x2x32xf32> to vector<2x32xf32>
    %132 = vector.shape_cast %129 : vector<2x32xf32> to vector<1x2x32xf32>
    tpu.vector_store %arg2[%c4_43, %c0_44, %c0_45], %132 {strides = array<i32>} : memref<7x2x32xf32, #tpu.memory_space<vmem>>, vector<1x2x32xf32>,
    %c5 = arith.constant 5 : index
    %c0_46 = arith.constant 0 : index
    %c0_47 = arith.constant 0 : index
    %133 = vector.load %arg0[%c5, %c0_46, %c0_47] : memref<7x2x128xf32, #tpu.memory_space<vmem>>, vector<1x2x128xf32>
    %134 = vector.shape_cast %133 : vector<1x2x128xf32> to vector<2x128xf32>
    %135 = arith.truncf %129 : vector<2x32xf32> to vector<2x32xbf16>
    %c0_48 = arith.constant 0 : index
    %c0_49 = arith.constant 0 : index
    %136 = vector.load %arg1[%c0_48, %c0_49] : memref<32x128xbf16, #tpu.memory_space<vmem>>, vector<32x128xbf16>
    %cst_50 = arith.constant dense<0.000000e+00> : vector<2x128xf32>
    %137 = tpu.matmul %135, %136, %cst_50 {dimension_numbers = #tpu.dot_dimension_numbers<[1], [0], [0], [1], [0, 0, 1, 1], [], []>} : vector<2x32xbf16>, vector<32x128xbf16>, vector<2x128xf32> -> vector<2x128xf32>
    %138 = arith.addf %134, %137 : vector<2x128xf32>
    %139 = math.tanh %138 : vector<2x128xf32>
    %140 = arith.negf %138 : vector<2x128xf32>
    %141 = math.exp %140 : vector<2x128xf32>
    %cst_51 = arith.constant 1.000000e+00 : f32
    %142 = vector.broadcast %cst_51 : f32 to vector<2x128xf32>
    %143 = arith.addf %142, %141 : vector<2x128xf32>
    %144 = arith.divf %142, %143 : vector<2x128xf32>
    %145 = arith.select %7, %139, %144 : vector<2x128xi1>, vector<2x128xf32>
    %146 = vector.extract_strided_slice %145 {offsets = [0, 0], sizes = [2, 32], strides = [1, 1]} : vector<2x128xf32> to vector<2x32xf32>
    %147 = vector.extract_strided_slice %145 {offsets = [0, 32], sizes = [2, 32], strides = [1, 1]} : vector<2x128xf32> to vector<2x32xf32>
    %148 = vector.extract_strided_slice %145 {offsets = [0, 64], sizes = [2, 32], strides = [1, 1]} : vector<2x128xf32> to vector<2x32xf32>
    %149 = vector.extract_strided_slice %145 {offsets = [0, 96], sizes = [2, 32], strides = [1, 1]} : vector<2x128xf32> to vector<2x32xf32>
    %150 = arith.mulf %147, %127 : vector<2x32xf32>
    %151 = arith.mulf %146, %148 : vector<2x32xf32>
    %152 = arith.addf %150, %151 : vector<2x32xf32>
    %153 = math.tanh %152 : vector<2x32xf32>
    %154 = arith.mulf %149, %153 : vector<2x32xf32>
    %c5_52 = arith.constant 5 : index
    %c0_53 = arith.constant 0 : index
    %c0_54 = arith.constant 0 : index
    %155 = vector.load %arg2[%c5_52, %c0_53, %c0_54] : memref<7x2x32xf32, #tpu.memory_space<vmem>>, vector<1x2x32xf32>
    %156 = vector.shape_cast %155 : vector<1x2x32xf32> to vector<2x32xf32>
    %157 = vector.shape_cast %154 : vector<2x32xf32> to vector<1x2x32xf32>
    tpu.vector_store %arg2[%c5_52, %c0_53, %c0_54], %157 {strides = array<i32>} : memref<7x2x32xf32, #tpu.memory_space<vmem>>, vector<1x2x32xf32>,
    %c6 = arith.constant 6 : index
    %c0_55 = arith.constant 0 : index
    %c0_56 = arith.constant 0 : index
    %158 = vector.load %arg0[%c6, %c0_55, %c0_56] : memref<7x2x128xf32, #tpu.memory_space<vmem>>, vector<1x2x128xf32>
    %159 = vector.shape_cast %158 : vector<1x2x128xf32> to vector<2x128xf32>
    %160 = arith.truncf %154 : vector<2x32xf32> to vector<2x32xbf16>
    %c0_57 = arith.constant 0 : index
    %c0_58 = arith.constant 0 : index
    %161 = vector.load %arg1[%c0_57, %c0_58] : memref<32x128xbf16, #tpu.memory_space<vmem>>, vector<32x128xbf16>
    %cst_59 = arith.constant dense<0.000000e+00> : vector<2x128xf32>
    %162 = tpu.matmul %160, %161, %cst_59 {dimension_numbers = #tpu.dot_dimension_numbers<[1], [0], [0], [1], [0, 0, 1, 1], [], []>} : vector<2x32xbf16>, vector<32x128xbf16>, vector<2x128xf32> -> vector<2x128xf32>
    %163 = arith.addf %159, %162 : vector<2x128xf32>
    %164 = math.tanh %163 : vector<2x128xf32>
    %165 = arith.negf %163 : vector<2x128xf32>
    %166 = math.exp %165 : vector<2x128xf32>
    %cst_60 = arith.constant 1.000000e+00 : f32
    %167 = vector.broadcast %cst_60 : f32 to vector<2x128xf32>
    %168 = arith.addf %167, %166 : vector<2x128xf32>
    %169 = arith.divf %167, %168 : vector<2x128xf32>
    %170 = arith.select %7, %164, %169 : vector<2x128xi1>, vector<2x128xf32>
    %171 = vector.extract_strided_slice %170 {offsets = [0, 0], sizes = [2, 32], strides = [1, 1]} : vector<2x128xf32> to vector<2x32xf32>
    %172 = vector.extract_strided_slice %170 {offsets = [0, 32], sizes = [2, 32], strides = [1, 1]} : vector<2x128xf32> to vector<2x32xf32>
    %173 = vector.extract_strided_slice %170 {offsets = [0, 64], sizes = [2, 32], strides = [1, 1]} : vector<2x128xf32> to vector<2x32xf32>
    %174 = vector.extract_strided_slice %170 {offsets = [0, 96], sizes = [2, 32], strides = [1, 1]} : vector<2x128xf32> to vector<2x32xf32>
    %175 = arith.mulf %172, %152 : vector<2x32xf32>
    %176 = arith.mulf %171, %173 : vector<2x32xf32>
    %177 = arith.addf %175, %176 : vector<2x32xf32>
    %178 = math.tanh %177 : vector<2x32xf32>
    %179 = arith.mulf %174, %178 : vector<2x32xf32>
    %c6_61 = arith.constant 6 : index
    %c0_62 = arith.constant 0 : index
    %c0_63 = arith.constant 0 : index
    %180 = vector.load %arg2[%c6_61, %c0_62, %c0_63] : memref<7x2x32xf32, #tpu.memory_space<vmem>>, vector<1x2x32xf32>
    %181 = vector.shape_cast %180 : vector<1x2x32xf32> to vector<2x32xf32>
    %182 = vector.shape_cast %179 : vector<2x32xf32> to vector<1x2x32xf32>
    tpu.vector_store %arg2[%c6_61, %c0_62, %c0_63], %182 {strides = array<i32>} : memref<7x2x32xf32, #tpu.memory_space<vmem>>, vector<1x2x32xf32>,
    return
  }
}

module attributes {stable_mosaic.version = 11 : i64} {
  func.func @matmul_bias_kernel(%arg0: i32, %arg1: i32, %arg2: i32, %arg3: memref<16x128xf32, #tpu.memory_space<vmem>>, %arg4: memref<128x128xbf16, #tpu.memory_space<vmem>>, %arg5: memref<1x128xf32, #tpu.memory_space<vmem>>, %arg6: memref<16x128xf32, #tpu.memory_space<vmem>>, %arg7: memref<16x128xf32, #tpu.memory_space<vmem>>) attributes {dimension_semantics = [#tpu.dimension_semantics<parallel>, #tpu.dimension_semantics<parallel>, #tpu.dimension_semantics<arbitrary>], iteration_bounds = array<i64: 1, 1, 1>, scalar_prefetch = 0 : i64, scratch_operands = 1 : i64, tpu.core_type = #tpu.core_type<tc>, window_params = [{transform_indices = @transform_0, window_bounds = array<i64: 16, 128>}, {transform_indices = @transform_1, window_bounds = array<i64: 128, 128>}, {transform_indices = @transform_2, window_bounds = array<i64: 1, 128>}, {transform_indices = @transform_3, window_bounds = array<i64: 16, 128>}]} {
    %c0_i32 = arith.constant 0 : i32
    %0 = arith.cmpi eq, %arg2, %c0_i32 : i32
    %1 = arith.extui %0 : i1 to i32
    %c0_i32_0 = arith.constant 0 : i32
    %2 = arith.cmpi ne, %1, %c0_i32_0 : i32
    scf.if %2 {
      %c0_10 = arith.constant 0 : index
      %c0_11 = arith.constant 0 : index
      %13 = vector.load %arg5[%c0_10, %c0_11] : memref<1x128xf32, #tpu.memory_space<vmem>>, vector<1x128xf32>
      %14 = vector.shape_cast %13 : vector<1x128xf32> to vector<1x128xf32>
      %15 = vector.broadcast %14 : vector<1x128xf32> to vector<16x128xf32>
      %c0_12 = arith.constant 0 : index
      %c0_13 = arith.constant 0 : index
      %16 = vector.load %arg7[%c0_12, %c0_13] : memref<16x128xf32, #tpu.memory_space<vmem>>, vector<16x128xf32>
      tpu.vector_store %arg7[%c0_12, %c0_13], %15 {strides = array<i32>} : memref<16x128xf32, #tpu.memory_space<vmem>>, vector<16x128xf32>,
    } else {
    }
    %c0 = arith.constant 0 : index
    %c0_1 = arith.constant 0 : index
    %3 = vector.load %arg7[%c0, %c0_1] : memref<16x128xf32, #tpu.memory_space<vmem>>, vector<16x128xf32>
    %c0_2 = arith.constant 0 : index
    %c0_3 = arith.constant 0 : index
    %4 = vector.load %arg3[%c0_2, %c0_3] : memref<16x128xf32, #tpu.memory_space<vmem>>, vector<16x128xf32>
    %5 = arith.truncf %4 : vector<16x128xf32> to vector<16x128xbf16>
    %c0_4 = arith.constant 0 : index
    %c0_5 = arith.constant 0 : index
    %6 = vector.load %arg4[%c0_4, %c0_5] : memref<128x128xbf16, #tpu.memory_space<vmem>>, vector<128x128xbf16>
    %cst = arith.constant dense<0.000000e+00> : vector<16x128xf32>
    %7 = tpu.matmul %5, %6, %cst {dimension_numbers = #tpu.dot_dimension_numbers<[1], [0], [0], [1], [0, 0, 1, 1], [], []>} : vector<16x128xbf16>, vector<128x128xbf16>, vector<16x128xf32> -> vector<16x128xf32>
    %8 = arith.addf %3, %7 : vector<16x128xf32>
    %c0_6 = arith.constant 0 : index
    %c0_7 = arith.constant 0 : index
    %9 = vector.load %arg7[%c0_6, %c0_7] : memref<16x128xf32, #tpu.memory_space<vmem>>, vector<16x128xf32>
    tpu.vector_store %arg7[%c0_6, %c0_7], %8 {strides = array<i32>} : memref<16x128xf32, #tpu.memory_space<vmem>>, vector<16x128xf32>,
    %c0_i32_8 = arith.constant 0 : i32
    %10 = arith.cmpi eq, %arg2, %c0_i32_8 : i32
    %11 = arith.extui %10 : i1 to i32
    %c0_i32_9 = arith.constant 0 : i32
    %12 = arith.cmpi ne, %11, %c0_i32_9 : i32
    scf.if %12 {
      %c0_10 = arith.constant 0 : index
      %c0_11 = arith.constant 0 : index
      %13 = vector.load %arg7[%c0_10, %c0_11] : memref<16x128xf32, #tpu.memory_space<vmem>>, vector<16x128xf32>
      %c0_12 = arith.constant 0 : index
      %c0_13 = arith.constant 0 : index
      %14 = vector.load %arg6[%c0_12, %c0_13] : memref<16x128xf32, #tpu.memory_space<vmem>>, vector<16x128xf32>
      tpu.vector_store %arg6[%c0_12, %c0_13], %13 {strides = array<i32>} : memref<16x128xf32, #tpu.memory_space<vmem>>, vector<16x128xf32>,
    } else {
    }
    return
  }
  func.func @transform_0(%arg0: i32, %arg1: i32, %arg2: i32) -> (i32, i32) {
    %c0_i32 = arith.constant 0 : i32
    return %arg0, %arg2 : i32, i32
  }
  func.func @transform_1(%arg0: i32, %arg1: i32, %arg2: i32) -> (i32, i32) {
    %c0_i32 = arith.constant 0 : i32
    return %arg2, %arg1 : i32, i32
  }
  func.func @transform_2(%arg0: i32, %arg1: i32, %arg2: i32) -> (i32, i32) {
    %c0_i32 = arith.constant 0 : i32
    %c0_i32_0 = arith.constant 0 : i32
    return %c0_i32, %arg1 : i32, i32
  }
  func.func @transform_3(%arg0: i32, %arg1: i32, %arg2: i32) -> (i32, i32) {
    %c0_i32 = arith.constant 0 : i32
    return %arg0, %arg1 : i32, i32
  }
}

module attributes {stable_mosaic.version = 11 : i64} {
  func.func @encoder_kernel(%arg0: i32, %arg1: memref<12xf32, #tpu.memory_space<smem>>, %arg2: memref<4xf32, #tpu.memory_space<smem>>, %arg3: memref<48xf32, #tpu.memory_space<smem>>, %arg4: memref<4xf32, #tpu.memory_space<smem>>, %arg5: memref<2x8x17xf32, #tpu.memory_space<vmem>>, %arg6: memref<8x128xf32, #tpu.memory_space<vmem>>) attributes {dimension_semantics = [#tpu.dimension_semantics<parallel>], iteration_bounds = array<i64: 2>, scalar_prefetch = 0 : i64, scratch_operands = 0 : i64, tpu.core_type = #tpu.core_type<tc>, window_params = [{transform_indices = @transform_0, window_bounds = array<i64: 12>}, {transform_indices = @transform_1, window_bounds = array<i64: 4>}, {transform_indices = @transform_2, window_bounds = array<i64: 48>}, {transform_indices = @transform_3, window_bounds = array<i64: 4>}, {transform_indices = @transform_4, window_bounds = array<i64: 2, 8, 17>}, {transform_indices = @transform_5, window_bounds = array<i64: 8, 128>}]} {
    %c0 = arith.constant 0 : index
    %c0_0 = arith.constant 0 : index
    %c0_1 = arith.constant 0 : index
    %0 = vector.load %arg5[%c0, %c0_0, %c0_1] : memref<2x8x17xf32, #tpu.memory_space<vmem>>, vector<1x8x17xf32>
    %1 = vector.shape_cast %0 : vector<1x8x17xf32> to vector<8x17xf32>
    %c0_2 = arith.constant 0 : index
    %2 = memref.load %arg1[%c0_2] : memref<12xf32, #tpu.memory_space<smem>>
    %3 = vector.extract_strided_slice %1 {offsets = [0, 0], sizes = [8, 15], strides = [1, 1]} : vector<8x17xf32> to vector<8x15xf32>
    %4 = vector.broadcast %2 : f32 to vector<8x15xf32>
    %5 = arith.mulf %4, %3 : vector<8x15xf32>
    %c1 = arith.constant 1 : index
    %6 = memref.load %arg1[%c1] : memref<12xf32, #tpu.memory_space<smem>>
    %7 = vector.extract_strided_slice %1 {offsets = [0, 1], sizes = [8, 15], strides = [1, 1]} : vector<8x17xf32> to vector<8x15xf32>
    %8 = vector.broadcast %6 : f32 to vector<8x15xf32>
    %9 = arith.mulf %8, %7 : vector<8x15xf32>
    %10 = arith.addf %5, %9 : vector<8x15xf32>
    %c2 = arith.constant 2 : index
    %11 = memref.load %arg1[%c2] : memref<12xf32, #tpu.memory_space<smem>>
    %12 = vector.extract_strided_slice %1 {offsets = [0, 2], sizes = [8, 15], strides = [1, 1]} : vector<8x17xf32> to vector<8x15xf32>
    %13 = vector.broadcast %11 : f32 to vector<8x15xf32>
    %14 = arith.mulf %13, %12 : vector<8x15xf32>
    %15 = arith.addf %10, %14 : vector<8x15xf32>
    %c0_3 = arith.constant 0 : index
    %16 = memref.load %arg2[%c0_3] : memref<4xf32, #tpu.memory_space<smem>>
    %17 = vector.broadcast %16 : f32 to vector<8x15xf32>
    %18 = arith.addf %15, %17 : vector<8x15xf32>
    %cst = arith.constant 0.000000e+00 : f32
    %19 = vector.broadcast %cst : f32 to vector<8x15xf32>
    %20 = arith.maximumf %18, %19 : vector<8x15xf32>
    %c3 = arith.constant 3 : index
    %21 = memref.load %arg1[%c3] : memref<12xf32, #tpu.memory_space<smem>>
    %22 = vector.extract_strided_slice %1 {offsets = [0, 0], sizes = [8, 15], strides = [1, 1]} : vector<8x17xf32> to vector<8x15xf32>
    %23 = vector.broadcast %21 : f32 to vector<8x15xf32>
    %24 = arith.mulf %23, %22 : vector<8x15xf32>
    %c4 = arith.constant 4 : index
    %25 = memref.load %arg1[%c4] : memref<12xf32, #tpu.memory_space<smem>>
    %26 = vector.extract_strided_slice %1 {offsets = [0, 1], sizes = [8, 15], strides = [1, 1]} : vector<8x17xf32> to vector<8x15xf32>
    %27 = vector.broadcast %25 : f32 to vector<8x15xf32>
    %28 = arith.mulf %27, %26 : vector<8x15xf32>
    %29 = arith.addf %24, %28 : vector<8x15xf32>
    %c5 = arith.constant 5 : index
    %30 = memref.load %arg1[%c5] : memref<12xf32, #tpu.memory_space<smem>>
    %31 = vector.extract_strided_slice %1 {offsets = [0, 2], sizes = [8, 15], strides = [1, 1]} : vector<8x17xf32> to vector<8x15xf32>
    %32 = vector.broadcast %30 : f32 to vector<8x15xf32>
    %33 = arith.mulf %32, %31 : vector<8x15xf32>
    %34 = arith.addf %29, %33 : vector<8x15xf32>
    %c1_4 = arith.constant 1 : index
    %35 = memref.load %arg2[%c1_4] : memref<4xf32, #tpu.memory_space<smem>>
    %36 = vector.broadcast %35 : f32 to vector<8x15xf32>
    %37 = arith.addf %34, %36 : vector<8x15xf32>
    %cst_5 = arith.constant 0.000000e+00 : f32
    %38 = vector.broadcast %cst_5 : f32 to vector<8x15xf32>
    %39 = arith.maximumf %37, %38 : vector<8x15xf32>
    %c6 = arith.constant 6 : index
    %40 = memref.load %arg1[%c6] : memref<12xf32, #tpu.memory_space<smem>>
    %41 = vector.extract_strided_slice %1 {offsets = [0, 0], sizes = [8, 15], strides = [1, 1]} : vector<8x17xf32> to vector<8x15xf32>
    %42 = vector.broadcast %40 : f32 to vector<8x15xf32>
    %43 = arith.mulf %42, %41 : vector<8x15xf32>
    %c7 = arith.constant 7 : index
    %44 = memref.load %arg1[%c7] : memref<12xf32, #tpu.memory_space<smem>>
    %45 = vector.extract_strided_slice %1 {offsets = [0, 1], sizes = [8, 15], strides = [1, 1]} : vector<8x17xf32> to vector<8x15xf32>
    %46 = vector.broadcast %44 : f32 to vector<8x15xf32>
    %47 = arith.mulf %46, %45 : vector<8x15xf32>
    %48 = arith.addf %43, %47 : vector<8x15xf32>
    %c8 = arith.constant 8 : index
    %49 = memref.load %arg1[%c8] : memref<12xf32, #tpu.memory_space<smem>>
    %50 = vector.extract_strided_slice %1 {offsets = [0, 2], sizes = [8, 15], strides = [1, 1]} : vector<8x17xf32> to vector<8x15xf32>
    %51 = vector.broadcast %49 : f32 to vector<8x15xf32>
    %52 = arith.mulf %51, %50 : vector<8x15xf32>
    %53 = arith.addf %48, %52 : vector<8x15xf32>
    %c2_6 = arith.constant 2 : index
    %54 = memref.load %arg2[%c2_6] : memref<4xf32, #tpu.memory_space<smem>>
    %55 = vector.broadcast %54 : f32 to vector<8x15xf32>
    %56 = arith.addf %53, %55 : vector<8x15xf32>
    %cst_7 = arith.constant 0.000000e+00 : f32
    %57 = vector.broadcast %cst_7 : f32 to vector<8x15xf32>
    %58 = arith.maximumf %56, %57 : vector<8x15xf32>
    %c9 = arith.constant 9 : index
    %59 = memref.load %arg1[%c9] : memref<12xf32, #tpu.memory_space<smem>>
    %60 = vector.extract_strided_slice %1 {offsets = [0, 0], sizes = [8, 15], strides = [1, 1]} : vector<8x17xf32> to vector<8x15xf32>
    %61 = vector.broadcast %59 : f32 to vector<8x15xf32>
    %62 = arith.mulf %61, %60 : vector<8x15xf32>
    %c10 = arith.constant 10 : index
    %63 = memref.load %arg1[%c10] : memref<12xf32, #tpu.memory_space<smem>>
    %64 = vector.extract_strided_slice %1 {offsets = [0, 1], sizes = [8, 15], strides = [1, 1]} : vector<8x17xf32> to vector<8x15xf32>
    %65 = vector.broadcast %63 : f32 to vector<8x15xf32>
    %66 = arith.mulf %65, %64 : vector<8x15xf32>
    %67 = arith.addf %62, %66 : vector<8x15xf32>
    %c11 = arith.constant 11 : index
    %68 = memref.load %arg1[%c11] : memref<12xf32, #tpu.memory_space<smem>>
    %69 = vector.extract_strided_slice %1 {offsets = [0, 2], sizes = [8, 15], strides = [1, 1]} : vector<8x17xf32> to vector<8x15xf32>
    %70 = vector.broadcast %68 : f32 to vector<8x15xf32>
    %71 = arith.mulf %70, %69 : vector<8x15xf32>
    %72 = arith.addf %67, %71 : vector<8x15xf32>
    %c3_8 = arith.constant 3 : index
    %73 = memref.load %arg2[%c3_8] : memref<4xf32, #tpu.memory_space<smem>>
    %74 = vector.broadcast %73 : f32 to vector<8x15xf32>
    %75 = arith.addf %72, %74 : vector<8x15xf32>
    %cst_9 = arith.constant 0.000000e+00 : f32
    %76 = vector.broadcast %cst_9 : f32 to vector<8x15xf32>
    %77 = arith.maximumf %75, %76 : vector<8x15xf32>
    %c0_10 = arith.constant 0 : index
    %78 = memref.load %arg3[%c0_10] : memref<48xf32, #tpu.memory_space<smem>>
    %79 = vector.extract_strided_slice %20 {offsets = [0, 0], sizes = [8, 13], strides = [1, 1]} : vector<8x15xf32> to vector<8x13xf32>
    %80 = vector.broadcast %78 : f32 to vector<8x13xf32>
    %81 = arith.mulf %80, %79 : vector<8x13xf32>
    %c1_11 = arith.constant 1 : index
    %82 = memref.load %arg3[%c1_11] : memref<48xf32, #tpu.memory_space<smem>>
    %83 = vector.extract_strided_slice %20 {offsets = [0, 1], sizes = [8, 13], strides = [1, 1]} : vector<8x15xf32> to vector<8x13xf32>
    %84 = vector.broadcast %82 : f32 to vector<8x13xf32>
    %85 = arith.mulf %84, %83 : vector<8x13xf32>
    %86 = arith.addf %81, %85 : vector<8x13xf32>
    %c2_12 = arith.constant 2 : index
    %87 = memref.load %arg3[%c2_12] : memref<48xf32, #tpu.memory_space<smem>>
    %88 = vector.extract_strided_slice %20 {offsets = [0, 2], sizes = [8, 13], strides = [1, 1]} : vector<8x15xf32> to vector<8x13xf32>
    %89 = vector.broadcast %87 : f32 to vector<8x13xf32>
    %90 = arith.mulf %89, %88 : vector<8x13xf32>
    %91 = arith.addf %86, %90 : vector<8x13xf32>
    %c3_13 = arith.constant 3 : index
    %92 = memref.load %arg3[%c3_13] : memref<48xf32, #tpu.memory_space<smem>>
    %93 = vector.extract_strided_slice %39 {offsets = [0, 0], sizes = [8, 13], strides = [1, 1]} : vector<8x15xf32> to vector<8x13xf32>
    %94 = vector.broadcast %92 : f32 to vector<8x13xf32>
    %95 = arith.mulf %94, %93 : vector<8x13xf32>
    %96 = arith.addf %91, %95 : vector<8x13xf32>
    %c4_14 = arith.constant 4 : index
    %97 = memref.load %arg3[%c4_14] : memref<48xf32, #tpu.memory_space<smem>>
    %98 = vector.extract_strided_slice %39 {offsets = [0, 1], sizes = [8, 13], strides = [1, 1]} : vector<8x15xf32> to vector<8x13xf32>
    %99 = vector.broadcast %97 : f32 to vector<8x13xf32>
    %100 = arith.mulf %99, %98 : vector<8x13xf32>
    %101 = arith.addf %96, %100 : vector<8x13xf32>
    %c5_15 = arith.constant 5 : index
    %102 = memref.load %arg3[%c5_15] : memref<48xf32, #tpu.memory_space<smem>>
    %103 = vector.extract_strided_slice %39 {offsets = [0, 2], sizes = [8, 13], strides = [1, 1]} : vector<8x15xf32> to vector<8x13xf32>
    %104 = vector.broadcast %102 : f32 to vector<8x13xf32>
    %105 = arith.mulf %104, %103 : vector<8x13xf32>
    %106 = arith.addf %101, %105 : vector<8x13xf32>
    %c6_16 = arith.constant 6 : index
    %107 = memref.load %arg3[%c6_16] : memref<48xf32, #tpu.memory_space<smem>>
    %108 = vector.extract_strided_slice %58 {offsets = [0, 0], sizes = [8, 13], strides = [1, 1]} : vector<8x15xf32> to vector<8x13xf32>
    %109 = vector.broadcast %107 : f32 to vector<8x13xf32>
    %110 = arith.mulf %109, %108 : vector<8x13xf32>
    %111 = arith.addf %106, %110 : vector<8x13xf32>
    %c7_17 = arith.constant 7 : index
    %112 = memref.load %arg3[%c7_17] : memref<48xf32, #tpu.memory_space<smem>>
    %113 = vector.extract_strided_slice %58 {offsets = [0, 1], sizes = [8, 13], strides = [1, 1]} : vector<8x15xf32> to vector<8x13xf32>
    %114 = vector.broadcast %112 : f32 to vector<8x13xf32>
    %115 = arith.mulf %114, %113 : vector<8x13xf32>
    %116 = arith.addf %111, %115 : vector<8x13xf32>
    %c8_18 = arith.constant 8 : index
    %117 = memref.load %arg3[%c8_18] : memref<48xf32, #tpu.memory_space<smem>>
    %118 = vector.extract_strided_slice %58 {offsets = [0, 2], sizes = [8, 13], strides = [1, 1]} : vector<8x15xf32> to vector<8x13xf32>
    %119 = vector.broadcast %117 : f32 to vector<8x13xf32>
    %120 = arith.mulf %119, %118 : vector<8x13xf32>
    %121 = arith.addf %116, %120 : vector<8x13xf32>
    %c9_19 = arith.constant 9 : index
    %122 = memref.load %arg3[%c9_19] : memref<48xf32, #tpu.memory_space<smem>>
    %123 = vector.extract_strided_slice %77 {offsets = [0, 0], sizes = [8, 13], strides = [1, 1]} : vector<8x15xf32> to vector<8x13xf32>
    %124 = vector.broadcast %122 : f32 to vector<8x13xf32>
    %125 = arith.mulf %124, %123 : vector<8x13xf32>
    %126 = arith.addf %121, %125 : vector<8x13xf32>
    %c10_20 = arith.constant 10 : index
    %127 = memref.load %arg3[%c10_20] : memref<48xf32, #tpu.memory_space<smem>>
    %128 = vector.extract_strided_slice %77 {offsets = [0, 1], sizes = [8, 13], strides = [1, 1]} : vector<8x15xf32> to vector<8x13xf32>
    %129 = vector.broadcast %127 : f32 to vector<8x13xf32>
    %130 = arith.mulf %129, %128 : vector<8x13xf32>
    %131 = arith.addf %126, %130 : vector<8x13xf32>
    %c11_21 = arith.constant 11 : index
    %132 = memref.load %arg3[%c11_21] : memref<48xf32, #tpu.memory_space<smem>>
    %133 = vector.extract_strided_slice %77 {offsets = [0, 2], sizes = [8, 13], strides = [1, 1]} : vector<8x15xf32> to vector<8x13xf32>
    %134 = vector.broadcast %132 : f32 to vector<8x13xf32>
    %135 = arith.mulf %134, %133 : vector<8x13xf32>
    %136 = arith.addf %131, %135 : vector<8x13xf32>
    %c0_22 = arith.constant 0 : index
    %137 = memref.load %arg4[%c0_22] : memref<4xf32, #tpu.memory_space<smem>>
    %138 = vector.broadcast %137 : f32 to vector<8x13xf32>
    %139 = arith.addf %136, %138 : vector<8x13xf32>
    %cst_23 = arith.constant 0.000000e+00 : f32
    %140 = vector.broadcast %cst_23 : f32 to vector<8x13xf32>
    %141 = arith.maximumf %139, %140 : vector<8x13xf32>
    %c12 = arith.constant 12 : index
    %142 = memref.load %arg3[%c12] : memref<48xf32, #tpu.memory_space<smem>>
    %143 = vector.extract_strided_slice %20 {offsets = [0, 0], sizes = [8, 13], strides = [1, 1]} : vector<8x15xf32> to vector<8x13xf32>
    %144 = vector.broadcast %142 : f32 to vector<8x13xf32>
    %145 = arith.mulf %144, %143 : vector<8x13xf32>
    %c13 = arith.constant 13 : index
    %146 = memref.load %arg3[%c13] : memref<48xf32, #tpu.memory_space<smem>>
    %147 = vector.extract_strided_slice %20 {offsets = [0, 1], sizes = [8, 13], strides = [1, 1]} : vector<8x15xf32> to vector<8x13xf32>
    %148 = vector.broadcast %146 : f32 to vector<8x13xf32>
    %149 = arith.mulf %148, %147 : vector<8x13xf32>
    %150 = arith.addf %145, %149 : vector<8x13xf32>
    %c14 = arith.constant 14 : index
    %151 = memref.load %arg3[%c14] : memref<48xf32, #tpu.memory_space<smem>>
    %152 = vector.extract_strided_slice %20 {offsets = [0, 2], sizes = [8, 13], strides = [1, 1]} : vector<8x15xf32> to vector<8x13xf32>
    %153 = vector.broadcast %151 : f32 to vector<8x13xf32>
    %154 = arith.mulf %153, %152 : vector<8x13xf32>
    %155 = arith.addf %150, %154 : vector<8x13xf32>
    %c15 = arith.constant 15 : index
    %156 = memref.load %arg3[%c15] : memref<48xf32, #tpu.memory_space<smem>>
    %157 = vector.extract_strided_slice %39 {offsets = [0, 0], sizes = [8, 13], strides = [1, 1]} : vector<8x15xf32> to vector<8x13xf32>
    %158 = vector.broadcast %156 : f32 to vector<8x13xf32>
    %159 = arith.mulf %158, %157 : vector<8x13xf32>
    %160 = arith.addf %155, %159 : vector<8x13xf32>
    %c16 = arith.constant 16 : index
    %161 = memref.load %arg3[%c16] : memref<48xf32, #tpu.memory_space<smem>>
    %162 = vector.extract_strided_slice %39 {offsets = [0, 1], sizes = [8, 13], strides = [1, 1]} : vector<8x15xf32> to vector<8x13xf32>
    %163 = vector.broadcast %161 : f32 to vector<8x13xf32>
    %164 = arith.mulf %163, %162 : vector<8x13xf32>
    %165 = arith.addf %160, %164 : vector<8x13xf32>
    %c17 = arith.constant 17 : index
    %166 = memref.load %arg3[%c17] : memref<48xf32, #tpu.memory_space<smem>>
    %167 = vector.extract_strided_slice %39 {offsets = [0, 2], sizes = [8, 13], strides = [1, 1]} : vector<8x15xf32> to vector<8x13xf32>
    %168 = vector.broadcast %166 : f32 to vector<8x13xf32>
    %169 = arith.mulf %168, %167 : vector<8x13xf32>
    %170 = arith.addf %165, %169 : vector<8x13xf32>
    %c18 = arith.constant 18 : index
    %171 = memref.load %arg3[%c18] : memref<48xf32, #tpu.memory_space<smem>>
    %172 = vector.extract_strided_slice %58 {offsets = [0, 0], sizes = [8, 13], strides = [1, 1]} : vector<8x15xf32> to vector<8x13xf32>
    %173 = vector.broadcast %171 : f32 to vector<8x13xf32>
    %174 = arith.mulf %173, %172 : vector<8x13xf32>
    %175 = arith.addf %170, %174 : vector<8x13xf32>
    %c19 = arith.constant 19 : index
    %176 = memref.load %arg3[%c19] : memref<48xf32, #tpu.memory_space<smem>>
    %177 = vector.extract_strided_slice %58 {offsets = [0, 1], sizes = [8, 13], strides = [1, 1]} : vector<8x15xf32> to vector<8x13xf32>
    %178 = vector.broadcast %176 : f32 to vector<8x13xf32>
    %179 = arith.mulf %178, %177 : vector<8x13xf32>
    %180 = arith.addf %175, %179 : vector<8x13xf32>
    %c20 = arith.constant 20 : index
    %181 = memref.load %arg3[%c20] : memref<48xf32, #tpu.memory_space<smem>>
    %182 = vector.extract_strided_slice %58 {offsets = [0, 2], sizes = [8, 13], strides = [1, 1]} : vector<8x15xf32> to vector<8x13xf32>
    %183 = vector.broadcast %181 : f32 to vector<8x13xf32>
    %184 = arith.mulf %183, %182 : vector<8x13xf32>
    %185 = arith.addf %180, %184 : vector<8x13xf32>
    %c21 = arith.constant 21 : index
    %186 = memref.load %arg3[%c21] : memref<48xf32, #tpu.memory_space<smem>>
    %187 = vector.extract_strided_slice %77 {offsets = [0, 0], sizes = [8, 13], strides = [1, 1]} : vector<8x15xf32> to vector<8x13xf32>
    %188 = vector.broadcast %186 : f32 to vector<8x13xf32>
    %189 = arith.mulf %188, %187 : vector<8x13xf32>
    %190 = arith.addf %185, %189 : vector<8x13xf32>
    %c22 = arith.constant 22 : index
    %191 = memref.load %arg3[%c22] : memref<48xf32, #tpu.memory_space<smem>>
    %192 = vector.extract_strided_slice %77 {offsets = [0, 1], sizes = [8, 13], strides = [1, 1]} : vector<8x15xf32> to vector<8x13xf32>
    %193 = vector.broadcast %191 : f32 to vector<8x13xf32>
    %194 = arith.mulf %193, %192 : vector<8x13xf32>
    %195 = arith.addf %190, %194 : vector<8x13xf32>
    %c23 = arith.constant 23 : index
    %196 = memref.load %arg3[%c23] : memref<48xf32, #tpu.memory_space<smem>>
    %197 = vector.extract_strided_slice %77 {offsets = [0, 2], sizes = [8, 13], strides = [1, 1]} : vector<8x15xf32> to vector<8x13xf32>
    %198 = vector.broadcast %196 : f32 to vector<8x13xf32>
    %199 = arith.mulf %198, %197 : vector<8x13xf32>
    %200 = arith.addf %195, %199 : vector<8x13xf32>
    %c1_24 = arith.constant 1 : index
    %201 = memref.load %arg4[%c1_24] : memref<4xf32, #tpu.memory_space<smem>>
    %202 = vector.broadcast %201 : f32 to vector<8x13xf32>
    %203 = arith.addf %200, %202 : vector<8x13xf32>
    %cst_25 = arith.constant 0.000000e+00 : f32
    %204 = vector.broadcast %cst_25 : f32 to vector<8x13xf32>
    %205 = arith.maximumf %203, %204 : vector<8x13xf32>
    %c24 = arith.constant 24 : index
    %206 = memref.load %arg3[%c24] : memref<48xf32, #tpu.memory_space<smem>>
    %207 = vector.extract_strided_slice %20 {offsets = [0, 0], sizes = [8, 13], strides = [1, 1]} : vector<8x15xf32> to vector<8x13xf32>
    %208 = vector.broadcast %206 : f32 to vector<8x13xf32>
    %209 = arith.mulf %208, %207 : vector<8x13xf32>
    %c25 = arith.constant 25 : index
    %210 = memref.load %arg3[%c25] : memref<48xf32, #tpu.memory_space<smem>>
    %211 = vector.extract_strided_slice %20 {offsets = [0, 1], sizes = [8, 13], strides = [1, 1]} : vector<8x15xf32> to vector<8x13xf32>
    %212 = vector.broadcast %210 : f32 to vector<8x13xf32>
    %213 = arith.mulf %212, %211 : vector<8x13xf32>
    %214 = arith.addf %209, %213 : vector<8x13xf32>
    %c26 = arith.constant 26 : index
    %215 = memref.load %arg3[%c26] : memref<48xf32, #tpu.memory_space<smem>>
    %216 = vector.extract_strided_slice %20 {offsets = [0, 2], sizes = [8, 13], strides = [1, 1]} : vector<8x15xf32> to vector<8x13xf32>
    %217 = vector.broadcast %215 : f32 to vector<8x13xf32>
    %218 = arith.mulf %217, %216 : vector<8x13xf32>
    %219 = arith.addf %214, %218 : vector<8x13xf32>
    %c27 = arith.constant 27 : index
    %220 = memref.load %arg3[%c27] : memref<48xf32, #tpu.memory_space<smem>>
    %221 = vector.extract_strided_slice %39 {offsets = [0, 0], sizes = [8, 13], strides = [1, 1]} : vector<8x15xf32> to vector<8x13xf32>
    %222 = vector.broadcast %220 : f32 to vector<8x13xf32>
    %223 = arith.mulf %222, %221 : vector<8x13xf32>
    %224 = arith.addf %219, %223 : vector<8x13xf32>
    %c28 = arith.constant 28 : index
    %225 = memref.load %arg3[%c28] : memref<48xf32, #tpu.memory_space<smem>>
    %226 = vector.extract_strided_slice %39 {offsets = [0, 1], sizes = [8, 13], strides = [1, 1]} : vector<8x15xf32> to vector<8x13xf32>
    %227 = vector.broadcast %225 : f32 to vector<8x13xf32>
    %228 = arith.mulf %227, %226 : vector<8x13xf32>
    %229 = arith.addf %224, %228 : vector<8x13xf32>
    %c29 = arith.constant 29 : index
    %230 = memref.load %arg3[%c29] : memref<48xf32, #tpu.memory_space<smem>>
    %231 = vector.extract_strided_slice %39 {offsets = [0, 2], sizes = [8, 13], strides = [1, 1]} : vector<8x15xf32> to vector<8x13xf32>
    %232 = vector.broadcast %230 : f32 to vector<8x13xf32>
    %233 = arith.mulf %232, %231 : vector<8x13xf32>
    %234 = arith.addf %229, %233 : vector<8x13xf32>
    %c30 = arith.constant 30 : index
    %235 = memref.load %arg3[%c30] : memref<48xf32, #tpu.memory_space<smem>>
    %236 = vector.extract_strided_slice %58 {offsets = [0, 0], sizes = [8, 13], strides = [1, 1]} : vector<8x15xf32> to vector<8x13xf32>
    %237 = vector.broadcast %235 : f32 to vector<8x13xf32>
    %238 = arith.mulf %237, %236 : vector<8x13xf32>
    %239 = arith.addf %234, %238 : vector<8x13xf32>
    %c31 = arith.constant 31 : index
    %240 = memref.load %arg3[%c31] : memref<48xf32, #tpu.memory_space<smem>>
    %241 = vector.extract_strided_slice %58 {offsets = [0, 1], sizes = [8, 13], strides = [1, 1]} : vector<8x15xf32> to vector<8x13xf32>
    %242 = vector.broadcast %240 : f32 to vector<8x13xf32>
    %243 = arith.mulf %242, %241 : vector<8x13xf32>
    %244 = arith.addf %239, %243 : vector<8x13xf32>
    %c32 = arith.constant 32 : index
    %245 = memref.load %arg3[%c32] : memref<48xf32, #tpu.memory_space<smem>>
    %246 = vector.extract_strided_slice %58 {offsets = [0, 2], sizes = [8, 13], strides = [1, 1]} : vector<8x15xf32> to vector<8x13xf32>
    %247 = vector.broadcast %245 : f32 to vector<8x13xf32>
    %248 = arith.mulf %247, %246 : vector<8x13xf32>
    %249 = arith.addf %244, %248 : vector<8x13xf32>
    %c33 = arith.constant 33 : index
    %250 = memref.load %arg3[%c33] : memref<48xf32, #tpu.memory_space<smem>>
    %251 = vector.extract_strided_slice %77 {offsets = [0, 0], sizes = [8, 13], strides = [1, 1]} : vector<8x15xf32> to vector<8x13xf32>
    %252 = vector.broadcast %250 : f32 to vector<8x13xf32>
    %253 = arith.mulf %252, %251 : vector<8x13xf32>
    %254 = arith.addf %249, %253 : vector<8x13xf32>
    %c34 = arith.constant 34 : index
    %255 = memref.load %arg3[%c34] : memref<48xf32, #tpu.memory_space<smem>>
    %256 = vector.extract_strided_slice %77 {offsets = [0, 1], sizes = [8, 13], strides = [1, 1]} : vector<8x15xf32> to vector<8x13xf32>
    %257 = vector.broadcast %255 : f32 to vector<8x13xf32>
    %258 = arith.mulf %257, %256 : vector<8x13xf32>
    %259 = arith.addf %254, %258 : vector<8x13xf32>
    %c35 = arith.constant 35 : index
    %260 = memref.load %arg3[%c35] : memref<48xf32, #tpu.memory_space<smem>>
    %261 = vector.extract_strided_slice %77 {offsets = [0, 2], sizes = [8, 13], strides = [1, 1]} : vector<8x15xf32> to vector<8x13xf32>
    %262 = vector.broadcast %260 : f32 to vector<8x13xf32>
    %263 = arith.mulf %262, %261 : vector<8x13xf32>
    %264 = arith.addf %259, %263 : vector<8x13xf32>
    %c2_26 = arith.constant 2 : index
    %265 = memref.load %arg4[%c2_26] : memref<4xf32, #tpu.memory_space<smem>>
    %266 = vector.broadcast %265 : f32 to vector<8x13xf32>
    %267 = arith.addf %264, %266 : vector<8x13xf32>
    %cst_27 = arith.constant 0.000000e+00 : f32
    %268 = vector.broadcast %cst_27 : f32 to vector<8x13xf32>
    %269 = arith.maximumf %267, %268 : vector<8x13xf32>
    %c36 = arith.constant 36 : index
    %270 = memref.load %arg3[%c36] : memref<48xf32, #tpu.memory_space<smem>>
    %271 = vector.extract_strided_slice %20 {offsets = [0, 0], sizes = [8, 13], strides = [1, 1]} : vector<8x15xf32> to vector<8x13xf32>
    %272 = vector.broadcast %270 : f32 to vector<8x13xf32>
    %273 = arith.mulf %272, %271 : vector<8x13xf32>
    %c37 = arith.constant 37 : index
    %274 = memref.load %arg3[%c37] : memref<48xf32, #tpu.memory_space<smem>>
    %275 = vector.extract_strided_slice %20 {offsets = [0, 1], sizes = [8, 13], strides = [1, 1]} : vector<8x15xf32> to vector<8x13xf32>
    %276 = vector.broadcast %274 : f32 to vector<8x13xf32>
    %277 = arith.mulf %276, %275 : vector<8x13xf32>
    %278 = arith.addf %273, %277 : vector<8x13xf32>
    %c38 = arith.constant 38 : index
    %279 = memref.load %arg3[%c38] : memref<48xf32, #tpu.memory_space<smem>>
    %280 = vector.extract_strided_slice %20 {offsets = [0, 2], sizes = [8, 13], strides = [1, 1]} : vector<8x15xf32> to vector<8x13xf32>
    %281 = vector.broadcast %279 : f32 to vector<8x13xf32>
    %282 = arith.mulf %281, %280 : vector<8x13xf32>
    %283 = arith.addf %278, %282 : vector<8x13xf32>
    %c39 = arith.constant 39 : index
    %284 = memref.load %arg3[%c39] : memref<48xf32, #tpu.memory_space<smem>>
    %285 = vector.extract_strided_slice %39 {offsets = [0, 0], sizes = [8, 13], strides = [1, 1]} : vector<8x15xf32> to vector<8x13xf32>
    %286 = vector.broadcast %284 : f32 to vector<8x13xf32>
    %287 = arith.mulf %286, %285 : vector<8x13xf32>
    %288 = arith.addf %283, %287 : vector<8x13xf32>
    %c40 = arith.constant 40 : index
    %289 = memref.load %arg3[%c40] : memref<48xf32, #tpu.memory_space<smem>>
    %290 = vector.extract_strided_slice %39 {offsets = [0, 1], sizes = [8, 13], strides = [1, 1]} : vector<8x15xf32> to vector<8x13xf32>
    %291 = vector.broadcast %289 : f32 to vector<8x13xf32>
    %292 = arith.mulf %291, %290 : vector<8x13xf32>
    %293 = arith.addf %288, %292 : vector<8x13xf32>
    %c41 = arith.constant 41 : index
    %294 = memref.load %arg3[%c41] : memref<48xf32, #tpu.memory_space<smem>>
    %295 = vector.extract_strided_slice %39 {offsets = [0, 2], sizes = [8, 13], strides = [1, 1]} : vector<8x15xf32> to vector<8x13xf32>
    %296 = vector.broadcast %294 : f32 to vector<8x13xf32>
    %297 = arith.mulf %296, %295 : vector<8x13xf32>
    %298 = arith.addf %293, %297 : vector<8x13xf32>
    %c42 = arith.constant 42 : index
    %299 = memref.load %arg3[%c42] : memref<48xf32, #tpu.memory_space<smem>>
    %300 = vector.extract_strided_slice %58 {offsets = [0, 0], sizes = [8, 13], strides = [1, 1]} : vector<8x15xf32> to vector<8x13xf32>
    %301 = vector.broadcast %299 : f32 to vector<8x13xf32>
    %302 = arith.mulf %301, %300 : vector<8x13xf32>
    %303 = arith.addf %298, %302 : vector<8x13xf32>
    %c43 = arith.constant 43 : index
    %304 = memref.load %arg3[%c43] : memref<48xf32, #tpu.memory_space<smem>>
    %305 = vector.extract_strided_slice %58 {offsets = [0, 1], sizes = [8, 13], strides = [1, 1]} : vector<8x15xf32> to vector<8x13xf32>
    %306 = vector.broadcast %304 : f32 to vector<8x13xf32>
    %307 = arith.mulf %306, %305 : vector<8x13xf32>
    %308 = arith.addf %303, %307 : vector<8x13xf32>
    %c44 = arith.constant 44 : index
    %309 = memref.load %arg3[%c44] : memref<48xf32, #tpu.memory_space<smem>>
    %310 = vector.extract_strided_slice %58 {offsets = [0, 2], sizes = [8, 13], strides = [1, 1]} : vector<8x15xf32> to vector<8x13xf32>
    %311 = vector.broadcast %309 : f32 to vector<8x13xf32>
    %312 = arith.mulf %311, %310 : vector<8x13xf32>
    %313 = arith.addf %308, %312 : vector<8x13xf32>
    %c45 = arith.constant 45 : index
    %314 = memref.load %arg3[%c45] : memref<48xf32, #tpu.memory_space<smem>>
    %315 = vector.extract_strided_slice %77 {offsets = [0, 0], sizes = [8, 13], strides = [1, 1]} : vector<8x15xf32> to vector<8x13xf32>
    %316 = vector.broadcast %314 : f32 to vector<8x13xf32>
    %317 = arith.mulf %316, %315 : vector<8x13xf32>
    %318 = arith.addf %313, %317 : vector<8x13xf32>
    %c46 = arith.constant 46 : index
    %319 = memref.load %arg3[%c46] : memref<48xf32, #tpu.memory_space<smem>>
    %320 = vector.extract_strided_slice %77 {offsets = [0, 1], sizes = [8, 13], strides = [1, 1]} : vector<8x15xf32> to vector<8x13xf32>
    %321 = vector.broadcast %319 : f32 to vector<8x13xf32>
    %322 = arith.mulf %321, %320 : vector<8x13xf32>
    %323 = arith.addf %318, %322 : vector<8x13xf32>
    %c47 = arith.constant 47 : index
    %324 = memref.load %arg3[%c47] : memref<48xf32, #tpu.memory_space<smem>>
    %325 = vector.extract_strided_slice %77 {offsets = [0, 2], sizes = [8, 13], strides = [1, 1]} : vector<8x15xf32> to vector<8x13xf32>
    %326 = vector.broadcast %324 : f32 to vector<8x13xf32>
    %327 = arith.mulf %326, %325 : vector<8x13xf32>
    %328 = arith.addf %323, %327 : vector<8x13xf32>
    %c3_28 = arith.constant 3 : index
    %329 = memref.load %arg4[%c3_28] : memref<4xf32, #tpu.memory_space<smem>>
    %330 = vector.broadcast %329 : f32 to vector<8x13xf32>
    %331 = arith.addf %328, %330 : vector<8x13xf32>
    %cst_29 = arith.constant 0.000000e+00 : f32
    %332 = vector.broadcast %cst_29 : f32 to vector<8x13xf32>
    %333 = arith.maximumf %331, %332 : vector<8x13xf32>
    %c1_30 = arith.constant 1 : index
    %c0_31 = arith.constant 0 : index
    %c0_32 = arith.constant 0 : index
    %334 = vector.load %arg5[%c1_30, %c0_31, %c0_32] : memref<2x8x17xf32, #tpu.memory_space<vmem>>, vector<1x8x17xf32>
    %335 = vector.shape_cast %334 : vector<1x8x17xf32> to vector<8x17xf32>
    %c0_33 = arith.constant 0 : index
    %336 = memref.load %arg1[%c0_33] : memref<12xf32, #tpu.memory_space<smem>>
    %337 = vector.extract_strided_slice %335 {offsets = [0, 0], sizes = [8, 15], strides = [1, 1]} : vector<8x17xf32> to vector<8x15xf32>
    %338 = vector.broadcast %336 : f32 to vector<8x15xf32>
    %339 = arith.mulf %338, %337 : vector<8x15xf32>
    %c1_34 = arith.constant 1 : index
    %340 = memref.load %arg1[%c1_34] : memref<12xf32, #tpu.memory_space<smem>>
    %341 = vector.extract_strided_slice %335 {offsets = [0, 1], sizes = [8, 15], strides = [1, 1]} : vector<8x17xf32> to vector<8x15xf32>
    %342 = vector.broadcast %340 : f32 to vector<8x15xf32>
    %343 = arith.mulf %342, %341 : vector<8x15xf32>
    %344 = arith.addf %339, %343 : vector<8x15xf32>
    %c2_35 = arith.constant 2 : index
    %345 = memref.load %arg1[%c2_35] : memref<12xf32, #tpu.memory_space<smem>>
    %346 = vector.extract_strided_slice %335 {offsets = [0, 2], sizes = [8, 15], strides = [1, 1]} : vector<8x17xf32> to vector<8x15xf32>
    %347 = vector.broadcast %345 : f32 to vector<8x15xf32>
    %348 = arith.mulf %347, %346 : vector<8x15xf32>
    %349 = arith.addf %344, %348 : vector<8x15xf32>
    %c0_36 = arith.constant 0 : index
    %350 = memref.load %arg2[%c0_36] : memref<4xf32, #tpu.memory_space<smem>>
    %351 = vector.broadcast %350 : f32 to vector<8x15xf32>
    %352 = arith.addf %349, %351 : vector<8x15xf32>
    %cst_37 = arith.constant 0.000000e+00 : f32
    %353 = vector.broadcast %cst_37 : f32 to vector<8x15xf32>
    %354 = arith.maximumf %352, %353 : vector<8x15xf32>
    %c3_38 = arith.constant 3 : index
    %355 = memref.load %arg1[%c3_38] : memref<12xf32, #tpu.memory_space<smem>>
    %356 = vector.extract_strided_slice %335 {offsets = [0, 0], sizes = [8, 15], strides = [1, 1]} : vector<8x17xf32> to vector<8x15xf32>
    %357 = vector.broadcast %355 : f32 to vector<8x15xf32>
    %358 = arith.mulf %357, %356 : vector<8x15xf32>
    %c4_39 = arith.constant 4 : index
    %359 = memref.load %arg1[%c4_39] : memref<12xf32, #tpu.memory_space<smem>>
    %360 = vector.extract_strided_slice %335 {offsets = [0, 1], sizes = [8, 15], strides = [1, 1]} : vector<8x17xf32> to vector<8x15xf32>
    %361 = vector.broadcast %359 : f32 to vector<8x15xf32>
    %362 = arith.mulf %361, %360 : vector<8x15xf32>
    %363 = arith.addf %358, %362 : vector<8x15xf32>
    %c5_40 = arith.constant 5 : index
    %364 = memref.load %arg1[%c5_40] : memref<12xf32, #tpu.memory_space<smem>>
    %365 = vector.extract_strided_slice %335 {offsets = [0, 2], sizes = [8, 15], strides = [1, 1]} : vector<8x17xf32> to vector<8x15xf32>
    %366 = vector.broadcast %364 : f32 to vector<8x15xf32>
    %367 = arith.mulf %366, %365 : vector<8x15xf32>
    %368 = arith.addf %363, %367 : vector<8x15xf32>
    %c1_41 = arith.constant 1 : index
    %369 = memref.load %arg2[%c1_41] : memref<4xf32, #tpu.memory_space<smem>>
    %370 = vector.broadcast %369 : f32 to vector<8x15xf32>
    %371 = arith.addf %368, %370 : vector<8x15xf32>
    %cst_42 = arith.constant 0.000000e+00 : f32
    %372 = vector.broadcast %cst_42 : f32 to vector<8x15xf32>
    %373 = arith.maximumf %371, %372 : vector<8x15xf32>
    %c6_43 = arith.constant 6 : index
    %374 = memref.load %arg1[%c6_43] : memref<12xf32, #tpu.memory_space<smem>>
    %375 = vector.extract_strided_slice %335 {offsets = [0, 0], sizes = [8, 15], strides = [1, 1]} : vector<8x17xf32> to vector<8x15xf32>
    %376 = vector.broadcast %374 : f32 to vector<8x15xf32>
    %377 = arith.mulf %376, %375 : vector<8x15xf32>
    %c7_44 = arith.constant 7 : index
    %378 = memref.load %arg1[%c7_44] : memref<12xf32, #tpu.memory_space<smem>>
    %379 = vector.extract_strided_slice %335 {offsets = [0, 1], sizes = [8, 15], strides = [1, 1]} : vector<8x17xf32> to vector<8x15xf32>
    %380 = vector.broadcast %378 : f32 to vector<8x15xf32>
    %381 = arith.mulf %380, %379 : vector<8x15xf32>
    %382 = arith.addf %377, %381 : vector<8x15xf32>
    %c8_45 = arith.constant 8 : index
    %383 = memref.load %arg1[%c8_45] : memref<12xf32, #tpu.memory_space<smem>>
    %384 = vector.extract_strided_slice %335 {offsets = [0, 2], sizes = [8, 15], strides = [1, 1]} : vector<8x17xf32> to vector<8x15xf32>
    %385 = vector.broadcast %383 : f32 to vector<8x15xf32>
    %386 = arith.mulf %385, %384 : vector<8x15xf32>
    %387 = arith.addf %382, %386 : vector<8x15xf32>
    %c2_46 = arith.constant 2 : index
    %388 = memref.load %arg2[%c2_46] : memref<4xf32, #tpu.memory_space<smem>>
    %389 = vector.broadcast %388 : f32 to vector<8x15xf32>
    %390 = arith.addf %387, %389 : vector<8x15xf32>
    %cst_47 = arith.constant 0.000000e+00 : f32
    %391 = vector.broadcast %cst_47 : f32 to vector<8x15xf32>
    %392 = arith.maximumf %390, %391 : vector<8x15xf32>
    %c9_48 = arith.constant 9 : index
    %393 = memref.load %arg1[%c9_48] : memref<12xf32, #tpu.memory_space<smem>>
    %394 = vector.extract_strided_slice %335 {offsets = [0, 0], sizes = [8, 15], strides = [1, 1]} : vector<8x17xf32> to vector<8x15xf32>
    %395 = vector.broadcast %393 : f32 to vector<8x15xf32>
    %396 = arith.mulf %395, %394 : vector<8x15xf32>
    %c10_49 = arith.constant 10 : index
    %397 = memref.load %arg1[%c10_49] : memref<12xf32, #tpu.memory_space<smem>>
    %398 = vector.extract_strided_slice %335 {offsets = [0, 1], sizes = [8, 15], strides = [1, 1]} : vector<8x17xf32> to vector<8x15xf32>
    %399 = vector.broadcast %397 : f32 to vector<8x15xf32>
    %400 = arith.mulf %399, %398 : vector<8x15xf32>
    %401 = arith.addf %396, %400 : vector<8x15xf32>
    %c11_50 = arith.constant 11 : index
    %402 = memref.load %arg1[%c11_50] : memref<12xf32, #tpu.memory_space<smem>>
    %403 = vector.extract_strided_slice %335 {offsets = [0, 2], sizes = [8, 15], strides = [1, 1]} : vector<8x17xf32> to vector<8x15xf32>
    %404 = vector.broadcast %402 : f32 to vector<8x15xf32>
    %405 = arith.mulf %404, %403 : vector<8x15xf32>
    %406 = arith.addf %401, %405 : vector<8x15xf32>
    %c3_51 = arith.constant 3 : index
    %407 = memref.load %arg2[%c3_51] : memref<4xf32, #tpu.memory_space<smem>>
    %408 = vector.broadcast %407 : f32 to vector<8x15xf32>
    %409 = arith.addf %406, %408 : vector<8x15xf32>
    %cst_52 = arith.constant 0.000000e+00 : f32
    %410 = vector.broadcast %cst_52 : f32 to vector<8x15xf32>
    %411 = arith.maximumf %409, %410 : vector<8x15xf32>
    %c0_53 = arith.constant 0 : index
    %412 = memref.load %arg3[%c0_53] : memref<48xf32, #tpu.memory_space<smem>>
    %413 = vector.extract_strided_slice %354 {offsets = [0, 0], sizes = [8, 13], strides = [1, 1]} : vector<8x15xf32> to vector<8x13xf32>
    %414 = vector.broadcast %412 : f32 to vector<8x13xf32>
    %415 = arith.mulf %414, %413 : vector<8x13xf32>
    %c1_54 = arith.constant 1 : index
    %416 = memref.load %arg3[%c1_54] : memref<48xf32, #tpu.memory_space<smem>>
    %417 = vector.extract_strided_slice %354 {offsets = [0, 1], sizes = [8, 13], strides = [1, 1]} : vector<8x15xf32> to vector<8x13xf32>
    %418 = vector.broadcast %416 : f32 to vector<8x13xf32>
    %419 = arith.mulf %418, %417 : vector<8x13xf32>
    %420 = arith.addf %415, %419 : vector<8x13xf32>
    %c2_55 = arith.constant 2 : index
    %421 = memref.load %arg3[%c2_55] : memref<48xf32, #tpu.memory_space<smem>>
    %422 = vector.extract_strided_slice %354 {offsets = [0, 2], sizes = [8, 13], strides = [1, 1]} : vector<8x15xf32> to vector<8x13xf32>
    %423 = vector.broadcast %421 : f32 to vector<8x13xf32>
    %424 = arith.mulf %423, %422 : vector<8x13xf32>
    %425 = arith.addf %420, %424 : vector<8x13xf32>
    %c3_56 = arith.constant 3 : index
    %426 = memref.load %arg3[%c3_56] : memref<48xf32, #tpu.memory_space<smem>>
    %427 = vector.extract_strided_slice %373 {offsets = [0, 0], sizes = [8, 13], strides = [1, 1]} : vector<8x15xf32> to vector<8x13xf32>
    %428 = vector.broadcast %426 : f32 to vector<8x13xf32>
    %429 = arith.mulf %428, %427 : vector<8x13xf32>
    %430 = arith.addf %425, %429 : vector<8x13xf32>
    %c4_57 = arith.constant 4 : index
    %431 = memref.load %arg3[%c4_57] : memref<48xf32, #tpu.memory_space<smem>>
    %432 = vector.extract_strided_slice %373 {offsets = [0, 1], sizes = [8, 13], strides = [1, 1]} : vector<8x15xf32> to vector<8x13xf32>
    %433 = vector.broadcast %431 : f32 to vector<8x13xf32>
    %434 = arith.mulf %433, %432 : vector<8x13xf32>
    %435 = arith.addf %430, %434 : vector<8x13xf32>
    %c5_58 = arith.constant 5 : index
    %436 = memref.load %arg3[%c5_58] : memref<48xf32, #tpu.memory_space<smem>>
    %437 = vector.extract_strided_slice %373 {offsets = [0, 2], sizes = [8, 13], strides = [1, 1]} : vector<8x15xf32> to vector<8x13xf32>
    %438 = vector.broadcast %436 : f32 to vector<8x13xf32>
    %439 = arith.mulf %438, %437 : vector<8x13xf32>
    %440 = arith.addf %435, %439 : vector<8x13xf32>
    %c6_59 = arith.constant 6 : index
    %441 = memref.load %arg3[%c6_59] : memref<48xf32, #tpu.memory_space<smem>>
    %442 = vector.extract_strided_slice %392 {offsets = [0, 0], sizes = [8, 13], strides = [1, 1]} : vector<8x15xf32> to vector<8x13xf32>
    %443 = vector.broadcast %441 : f32 to vector<8x13xf32>
    %444 = arith.mulf %443, %442 : vector<8x13xf32>
    %445 = arith.addf %440, %444 : vector<8x13xf32>
    %c7_60 = arith.constant 7 : index
    %446 = memref.load %arg3[%c7_60] : memref<48xf32, #tpu.memory_space<smem>>
    %447 = vector.extract_strided_slice %392 {offsets = [0, 1], sizes = [8, 13], strides = [1, 1]} : vector<8x15xf32> to vector<8x13xf32>
    %448 = vector.broadcast %446 : f32 to vector<8x13xf32>
    %449 = arith.mulf %448, %447 : vector<8x13xf32>
    %450 = arith.addf %445, %449 : vector<8x13xf32>
    %c8_61 = arith.constant 8 : index
    %451 = memref.load %arg3[%c8_61] : memref<48xf32, #tpu.memory_space<smem>>
    %452 = vector.extract_strided_slice %392 {offsets = [0, 2], sizes = [8, 13], strides = [1, 1]} : vector<8x15xf32> to vector<8x13xf32>
    %453 = vector.broadcast %451 : f32 to vector<8x13xf32>
    %454 = arith.mulf %453, %452 : vector<8x13xf32>
    %455 = arith.addf %450, %454 : vector<8x13xf32>
    %c9_62 = arith.constant 9 : index
    %456 = memref.load %arg3[%c9_62] : memref<48xf32, #tpu.memory_space<smem>>
    %457 = vector.extract_strided_slice %411 {offsets = [0, 0], sizes = [8, 13], strides = [1, 1]} : vector<8x15xf32> to vector<8x13xf32>
    %458 = vector.broadcast %456 : f32 to vector<8x13xf32>
    %459 = arith.mulf %458, %457 : vector<8x13xf32>
    %460 = arith.addf %455, %459 : vector<8x13xf32>
    %c10_63 = arith.constant 10 : index
    %461 = memref.load %arg3[%c10_63] : memref<48xf32, #tpu.memory_space<smem>>
    %462 = vector.extract_strided_slice %411 {offsets = [0, 1], sizes = [8, 13], strides = [1, 1]} : vector<8x15xf32> to vector<8x13xf32>
    %463 = vector.broadcast %461 : f32 to vector<8x13xf32>
    %464 = arith.mulf %463, %462 : vector<8x13xf32>
    %465 = arith.addf %460, %464 : vector<8x13xf32>
    %c11_64 = arith.constant 11 : index
    %466 = memref.load %arg3[%c11_64] : memref<48xf32, #tpu.memory_space<smem>>
    %467 = vector.extract_strided_slice %411 {offsets = [0, 2], sizes = [8, 13], strides = [1, 1]} : vector<8x15xf32> to vector<8x13xf32>
    %468 = vector.broadcast %466 : f32 to vector<8x13xf32>
    %469 = arith.mulf %468, %467 : vector<8x13xf32>
    %470 = arith.addf %465, %469 : vector<8x13xf32>
    %c0_65 = arith.constant 0 : index
    %471 = memref.load %arg4[%c0_65] : memref<4xf32, #tpu.memory_space<smem>>
    %472 = vector.broadcast %471 : f32 to vector<8x13xf32>
    %473 = arith.addf %470, %472 : vector<8x13xf32>
    %cst_66 = arith.constant 0.000000e+00 : f32
    %474 = vector.broadcast %cst_66 : f32 to vector<8x13xf32>
    %475 = arith.maximumf %473, %474 : vector<8x13xf32>
    %c12_67 = arith.constant 12 : index
    %476 = memref.load %arg3[%c12_67] : memref<48xf32, #tpu.memory_space<smem>>
    %477 = vector.extract_strided_slice %354 {offsets = [0, 0], sizes = [8, 13], strides = [1, 1]} : vector<8x15xf32> to vector<8x13xf32>
    %478 = vector.broadcast %476 : f32 to vector<8x13xf32>
    %479 = arith.mulf %478, %477 : vector<8x13xf32>
    %c13_68 = arith.constant 13 : index
    %480 = memref.load %arg3[%c13_68] : memref<48xf32, #tpu.memory_space<smem>>
    %481 = vector.extract_strided_slice %354 {offsets = [0, 1], sizes = [8, 13], strides = [1, 1]} : vector<8x15xf32> to vector<8x13xf32>
    %482 = vector.broadcast %480 : f32 to vector<8x13xf32>
    %483 = arith.mulf %482, %481 : vector<8x13xf32>
    %484 = arith.addf %479, %483 : vector<8x13xf32>
    %c14_69 = arith.constant 14 : index
    %485 = memref.load %arg3[%c14_69] : memref<48xf32, #tpu.memory_space<smem>>
    %486 = vector.extract_strided_slice %354 {offsets = [0, 2], sizes = [8, 13], strides = [1, 1]} : vector<8x15xf32> to vector<8x13xf32>
    %487 = vector.broadcast %485 : f32 to vector<8x13xf32>
    %488 = arith.mulf %487, %486 : vector<8x13xf32>
    %489 = arith.addf %484, %488 : vector<8x13xf32>
    %c15_70 = arith.constant 15 : index
    %490 = memref.load %arg3[%c15_70] : memref<48xf32, #tpu.memory_space<smem>>
    %491 = vector.extract_strided_slice %373 {offsets = [0, 0], sizes = [8, 13], strides = [1, 1]} : vector<8x15xf32> to vector<8x13xf32>
    %492 = vector.broadcast %490 : f32 to vector<8x13xf32>
    %493 = arith.mulf %492, %491 : vector<8x13xf32>
    %494 = arith.addf %489, %493 : vector<8x13xf32>
    %c16_71 = arith.constant 16 : index
    %495 = memref.load %arg3[%c16_71] : memref<48xf32, #tpu.memory_space<smem>>
    %496 = vector.extract_strided_slice %373 {offsets = [0, 1], sizes = [8, 13], strides = [1, 1]} : vector<8x15xf32> to vector<8x13xf32>
    %497 = vector.broadcast %495 : f32 to vector<8x13xf32>
    %498 = arith.mulf %497, %496 : vector<8x13xf32>
    %499 = arith.addf %494, %498 : vector<8x13xf32>
    %c17_72 = arith.constant 17 : index
    %500 = memref.load %arg3[%c17_72] : memref<48xf32, #tpu.memory_space<smem>>
    %501 = vector.extract_strided_slice %373 {offsets = [0, 2], sizes = [8, 13], strides = [1, 1]} : vector<8x15xf32> to vector<8x13xf32>
    %502 = vector.broadcast %500 : f32 to vector<8x13xf32>
    %503 = arith.mulf %502, %501 : vector<8x13xf32>
    %504 = arith.addf %499, %503 : vector<8x13xf32>
    %c18_73 = arith.constant 18 : index
    %505 = memref.load %arg3[%c18_73] : memref<48xf32, #tpu.memory_space<smem>>
    %506 = vector.extract_strided_slice %392 {offsets = [0, 0], sizes = [8, 13], strides = [1, 1]} : vector<8x15xf32> to vector<8x13xf32>
    %507 = vector.broadcast %505 : f32 to vector<8x13xf32>
    %508 = arith.mulf %507, %506 : vector<8x13xf32>
    %509 = arith.addf %504, %508 : vector<8x13xf32>
    %c19_74 = arith.constant 19 : index
    %510 = memref.load %arg3[%c19_74] : memref<48xf32, #tpu.memory_space<smem>>
    %511 = vector.extract_strided_slice %392 {offsets = [0, 1], sizes = [8, 13], strides = [1, 1]} : vector<8x15xf32> to vector<8x13xf32>
    %512 = vector.broadcast %510 : f32 to vector<8x13xf32>
    %513 = arith.mulf %512, %511 : vector<8x13xf32>
    %514 = arith.addf %509, %513 : vector<8x13xf32>
    %c20_75 = arith.constant 20 : index
    %515 = memref.load %arg3[%c20_75] : memref<48xf32, #tpu.memory_space<smem>>
    %516 = vector.extract_strided_slice %392 {offsets = [0, 2], sizes = [8, 13], strides = [1, 1]} : vector<8x15xf32> to vector<8x13xf32>
    %517 = vector.broadcast %515 : f32 to vector<8x13xf32>
    %518 = arith.mulf %517, %516 : vector<8x13xf32>
    %519 = arith.addf %514, %518 : vector<8x13xf32>
    %c21_76 = arith.constant 21 : index
    %520 = memref.load %arg3[%c21_76] : memref<48xf32, #tpu.memory_space<smem>>
    %521 = vector.extract_strided_slice %411 {offsets = [0, 0], sizes = [8, 13], strides = [1, 1]} : vector<8x15xf32> to vector<8x13xf32>
    %522 = vector.broadcast %520 : f32 to vector<8x13xf32>
    %523 = arith.mulf %522, %521 : vector<8x13xf32>
    %524 = arith.addf %519, %523 : vector<8x13xf32>
    %c22_77 = arith.constant 22 : index
    %525 = memref.load %arg3[%c22_77] : memref<48xf32, #tpu.memory_space<smem>>
    %526 = vector.extract_strided_slice %411 {offsets = [0, 1], sizes = [8, 13], strides = [1, 1]} : vector<8x15xf32> to vector<8x13xf32>
    %527 = vector.broadcast %525 : f32 to vector<8x13xf32>
    %528 = arith.mulf %527, %526 : vector<8x13xf32>
    %529 = arith.addf %524, %528 : vector<8x13xf32>
    %c23_78 = arith.constant 23 : index
    %530 = memref.load %arg3[%c23_78] : memref<48xf32, #tpu.memory_space<smem>>
    %531 = vector.extract_strided_slice %411 {offsets = [0, 2], sizes = [8, 13], strides = [1, 1]} : vector<8x15xf32> to vector<8x13xf32>
    %532 = vector.broadcast %530 : f32 to vector<8x13xf32>
    %533 = arith.mulf %532, %531 : vector<8x13xf32>
    %534 = arith.addf %529, %533 : vector<8x13xf32>
    %c1_79 = arith.constant 1 : index
    %535 = memref.load %arg4[%c1_79] : memref<4xf32, #tpu.memory_space<smem>>
    %536 = vector.broadcast %535 : f32 to vector<8x13xf32>
    %537 = arith.addf %534, %536 : vector<8x13xf32>
    %cst_80 = arith.constant 0.000000e+00 : f32
    %538 = vector.broadcast %cst_80 : f32 to vector<8x13xf32>
    %539 = arith.maximumf %537, %538 : vector<8x13xf32>
    %c24_81 = arith.constant 24 : index
    %540 = memref.load %arg3[%c24_81] : memref<48xf32, #tpu.memory_space<smem>>
    %541 = vector.extract_strided_slice %354 {offsets = [0, 0], sizes = [8, 13], strides = [1, 1]} : vector<8x15xf32> to vector<8x13xf32>
    %542 = vector.broadcast %540 : f32 to vector<8x13xf32>
    %543 = arith.mulf %542, %541 : vector<8x13xf32>
    %c25_82 = arith.constant 25 : index
    %544 = memref.load %arg3[%c25_82] : memref<48xf32, #tpu.memory_space<smem>>
    %545 = vector.extract_strided_slice %354 {offsets = [0, 1], sizes = [8, 13], strides = [1, 1]} : vector<8x15xf32> to vector<8x13xf32>
    %546 = vector.broadcast %544 : f32 to vector<8x13xf32>
    %547 = arith.mulf %546, %545 : vector<8x13xf32>
    %548 = arith.addf %543, %547 : vector<8x13xf32>
    %c26_83 = arith.constant 26 : index
    %549 = memref.load %arg3[%c26_83] : memref<48xf32, #tpu.memory_space<smem>>
    %550 = vector.extract_strided_slice %354 {offsets = [0, 2], sizes = [8, 13], strides = [1, 1]} : vector<8x15xf32> to vector<8x13xf32>
    %551 = vector.broadcast %549 : f32 to vector<8x13xf32>
    %552 = arith.mulf %551, %550 : vector<8x13xf32>
    %553 = arith.addf %548, %552 : vector<8x13xf32>
    %c27_84 = arith.constant 27 : index
    %554 = memref.load %arg3[%c27_84] : memref<48xf32, #tpu.memory_space<smem>>
    %555 = vector.extract_strided_slice %373 {offsets = [0, 0], sizes = [8, 13], strides = [1, 1]} : vector<8x15xf32> to vector<8x13xf32>
    %556 = vector.broadcast %554 : f32 to vector<8x13xf32>
    %557 = arith.mulf %556, %555 : vector<8x13xf32>
    %558 = arith.addf %553, %557 : vector<8x13xf32>
    %c28_85 = arith.constant 28 : index
    %559 = memref.load %arg3[%c28_85] : memref<48xf32, #tpu.memory_space<smem>>
    %560 = vector.extract_strided_slice %373 {offsets = [0, 1], sizes = [8, 13], strides = [1, 1]} : vector<8x15xf32> to vector<8x13xf32>
    %561 = vector.broadcast %559 : f32 to vector<8x13xf32>
    %562 = arith.mulf %561, %560 : vector<8x13xf32>
    %563 = arith.addf %558, %562 : vector<8x13xf32>
    %c29_86 = arith.constant 29 : index
    %564 = memref.load %arg3[%c29_86] : memref<48xf32, #tpu.memory_space<smem>>
    %565 = vector.extract_strided_slice %373 {offsets = [0, 2], sizes = [8, 13], strides = [1, 1]} : vector<8x15xf32> to vector<8x13xf32>
    %566 = vector.broadcast %564 : f32 to vector<8x13xf32>
    %567 = arith.mulf %566, %565 : vector<8x13xf32>
    %568 = arith.addf %563, %567 : vector<8x13xf32>
    %c30_87 = arith.constant 30 : index
    %569 = memref.load %arg3[%c30_87] : memref<48xf32, #tpu.memory_space<smem>>
    %570 = vector.extract_strided_slice %392 {offsets = [0, 0], sizes = [8, 13], strides = [1, 1]} : vector<8x15xf32> to vector<8x13xf32>
    %571 = vector.broadcast %569 : f32 to vector<8x13xf32>
    %572 = arith.mulf %571, %570 : vector<8x13xf32>
    %573 = arith.addf %568, %572 : vector<8x13xf32>
    %c31_88 = arith.constant 31 : index
    %574 = memref.load %arg3[%c31_88] : memref<48xf32, #tpu.memory_space<smem>>
    %575 = vector.extract_strided_slice %392 {offsets = [0, 1], sizes = [8, 13], strides = [1, 1]} : vector<8x15xf32> to vector<8x13xf32>
    %576 = vector.broadcast %574 : f32 to vector<8x13xf32>
    %577 = arith.mulf %576, %575 : vector<8x13xf32>
    %578 = arith.addf %573, %577 : vector<8x13xf32>
    %c32_89 = arith.constant 32 : index
    %579 = memref.load %arg3[%c32_89] : memref<48xf32, #tpu.memory_space<smem>>
    %580 = vector.extract_strided_slice %392 {offsets = [0, 2], sizes = [8, 13], strides = [1, 1]} : vector<8x15xf32> to vector<8x13xf32>
    %581 = vector.broadcast %579 : f32 to vector<8x13xf32>
    %582 = arith.mulf %581, %580 : vector<8x13xf32>
    %583 = arith.addf %578, %582 : vector<8x13xf32>
    %c33_90 = arith.constant 33 : index
    %584 = memref.load %arg3[%c33_90] : memref<48xf32, #tpu.memory_space<smem>>
    %585 = vector.extract_strided_slice %411 {offsets = [0, 0], sizes = [8, 13], strides = [1, 1]} : vector<8x15xf32> to vector<8x13xf32>
    %586 = vector.broadcast %584 : f32 to vector<8x13xf32>
    %587 = arith.mulf %586, %585 : vector<8x13xf32>
    %588 = arith.addf %583, %587 : vector<8x13xf32>
    %c34_91 = arith.constant 34 : index
    %589 = memref.load %arg3[%c34_91] : memref<48xf32, #tpu.memory_space<smem>>
    %590 = vector.extract_strided_slice %411 {offsets = [0, 1], sizes = [8, 13], strides = [1, 1]} : vector<8x15xf32> to vector<8x13xf32>
    %591 = vector.broadcast %589 : f32 to vector<8x13xf32>
    %592 = arith.mulf %591, %590 : vector<8x13xf32>
    %593 = arith.addf %588, %592 : vector<8x13xf32>
    %c35_92 = arith.constant 35 : index
    %594 = memref.load %arg3[%c35_92] : memref<48xf32, #tpu.memory_space<smem>>
    %595 = vector.extract_strided_slice %411 {offsets = [0, 2], sizes = [8, 13], strides = [1, 1]} : vector<8x15xf32> to vector<8x13xf32>
    %596 = vector.broadcast %594 : f32 to vector<8x13xf32>
    %597 = arith.mulf %596, %595 : vector<8x13xf32>
    %598 = arith.addf %593, %597 : vector<8x13xf32>
    %c2_93 = arith.constant 2 : index
    %599 = memref.load %arg4[%c2_93] : memref<4xf32, #tpu.memory_space<smem>>
    %600 = vector.broadcast %599 : f32 to vector<8x13xf32>
    %601 = arith.addf %598, %600 : vector<8x13xf32>
    %cst_94 = arith.constant 0.000000e+00 : f32
    %602 = vector.broadcast %cst_94 : f32 to vector<8x13xf32>
    %603 = arith.maximumf %601, %602 : vector<8x13xf32>
    %c36_95 = arith.constant 36 : index
    %604 = memref.load %arg3[%c36_95] : memref<48xf32, #tpu.memory_space<smem>>
    %605 = vector.extract_strided_slice %354 {offsets = [0, 0], sizes = [8, 13], strides = [1, 1]} : vector<8x15xf32> to vector<8x13xf32>
    %606 = vector.broadcast %604 : f32 to vector<8x13xf32>
    %607 = arith.mulf %606, %605 : vector<8x13xf32>
    %c37_96 = arith.constant 37 : index
    %608 = memref.load %arg3[%c37_96] : memref<48xf32, #tpu.memory_space<smem>>
    %609 = vector.extract_strided_slice %354 {offsets = [0, 1], sizes = [8, 13], strides = [1, 1]} : vector<8x15xf32> to vector<8x13xf32>
    %610 = vector.broadcast %608 : f32 to vector<8x13xf32>
    %611 = arith.mulf %610, %609 : vector<8x13xf32>
    %612 = arith.addf %607, %611 : vector<8x13xf32>
    %c38_97 = arith.constant 38 : index
    %613 = memref.load %arg3[%c38_97] : memref<48xf32, #tpu.memory_space<smem>>
    %614 = vector.extract_strided_slice %354 {offsets = [0, 2], sizes = [8, 13], strides = [1, 1]} : vector<8x15xf32> to vector<8x13xf32>
    %615 = vector.broadcast %613 : f32 to vector<8x13xf32>
    %616 = arith.mulf %615, %614 : vector<8x13xf32>
    %617 = arith.addf %612, %616 : vector<8x13xf32>
    %c39_98 = arith.constant 39 : index
    %618 = memref.load %arg3[%c39_98] : memref<48xf32, #tpu.memory_space<smem>>
    %619 = vector.extract_strided_slice %373 {offsets = [0, 0], sizes = [8, 13], strides = [1, 1]} : vector<8x15xf32> to vector<8x13xf32>
    %620 = vector.broadcast %618 : f32 to vector<8x13xf32>
    %621 = arith.mulf %620, %619 : vector<8x13xf32>
    %622 = arith.addf %617, %621 : vector<8x13xf32>
    %c40_99 = arith.constant 40 : index
    %623 = memref.load %arg3[%c40_99] : memref<48xf32, #tpu.memory_space<smem>>
    %624 = vector.extract_strided_slice %373 {offsets = [0, 1], sizes = [8, 13], strides = [1, 1]} : vector<8x15xf32> to vector<8x13xf32>
    %625 = vector.broadcast %623 : f32 to vector<8x13xf32>
    %626 = arith.mulf %625, %624 : vector<8x13xf32>
    %627 = arith.addf %622, %626 : vector<8x13xf32>
    %c41_100 = arith.constant 41 : index
    %628 = memref.load %arg3[%c41_100] : memref<48xf32, #tpu.memory_space<smem>>
    %629 = vector.extract_strided_slice %373 {offsets = [0, 2], sizes = [8, 13], strides = [1, 1]} : vector<8x15xf32> to vector<8x13xf32>
    %630 = vector.broadcast %628 : f32 to vector<8x13xf32>
    %631 = arith.mulf %630, %629 : vector<8x13xf32>
    %632 = arith.addf %627, %631 : vector<8x13xf32>
    %c42_101 = arith.constant 42 : index
    %633 = memref.load %arg3[%c42_101] : memref<48xf32, #tpu.memory_space<smem>>
    %634 = vector.extract_strided_slice %392 {offsets = [0, 0], sizes = [8, 13], strides = [1, 1]} : vector<8x15xf32> to vector<8x13xf32>
    %635 = vector.broadcast %633 : f32 to vector<8x13xf32>
    %636 = arith.mulf %635, %634 : vector<8x13xf32>
    %637 = arith.addf %632, %636 : vector<8x13xf32>
    %c43_102 = arith.constant 43 : index
    %638 = memref.load %arg3[%c43_102] : memref<48xf32, #tpu.memory_space<smem>>
    %639 = vector.extract_strided_slice %392 {offsets = [0, 1], sizes = [8, 13], strides = [1, 1]} : vector<8x15xf32> to vector<8x13xf32>
    %640 = vector.broadcast %638 : f32 to vector<8x13xf32>
    %641 = arith.mulf %640, %639 : vector<8x13xf32>
    %642 = arith.addf %637, %641 : vector<8x13xf32>
    %c44_103 = arith.constant 44 : index
    %643 = memref.load %arg3[%c44_103] : memref<48xf32, #tpu.memory_space<smem>>
    %644 = vector.extract_strided_slice %392 {offsets = [0, 2], sizes = [8, 13], strides = [1, 1]} : vector<8x15xf32> to vector<8x13xf32>
    %645 = vector.broadcast %643 : f32 to vector<8x13xf32>
    %646 = arith.mulf %645, %644 : vector<8x13xf32>
    %647 = arith.addf %642, %646 : vector<8x13xf32>
    %c45_104 = arith.constant 45 : index
    %648 = memref.load %arg3[%c45_104] : memref<48xf32, #tpu.memory_space<smem>>
    %649 = vector.extract_strided_slice %411 {offsets = [0, 0], sizes = [8, 13], strides = [1, 1]} : vector<8x15xf32> to vector<8x13xf32>
    %650 = vector.broadcast %648 : f32 to vector<8x13xf32>
    %651 = arith.mulf %650, %649 : vector<8x13xf32>
    %652 = arith.addf %647, %651 : vector<8x13xf32>
    %c46_105 = arith.constant 46 : index
    %653 = memref.load %arg3[%c46_105] : memref<48xf32, #tpu.memory_space<smem>>
    %654 = vector.extract_strided_slice %411 {offsets = [0, 1], sizes = [8, 13], strides = [1, 1]} : vector<8x15xf32> to vector<8x13xf32>
    %655 = vector.broadcast %653 : f32 to vector<8x13xf32>
    %656 = arith.mulf %655, %654 : vector<8x13xf32>
    %657 = arith.addf %652, %656 : vector<8x13xf32>
    %c47_106 = arith.constant 47 : index
    %658 = memref.load %arg3[%c47_106] : memref<48xf32, #tpu.memory_space<smem>>
    %659 = vector.extract_strided_slice %411 {offsets = [0, 2], sizes = [8, 13], strides = [1, 1]} : vector<8x15xf32> to vector<8x13xf32>
    %660 = vector.broadcast %658 : f32 to vector<8x13xf32>
    %661 = arith.mulf %660, %659 : vector<8x13xf32>
    %662 = arith.addf %657, %661 : vector<8x13xf32>
    %c3_107 = arith.constant 3 : index
    %663 = memref.load %arg4[%c3_107] : memref<4xf32, #tpu.memory_space<smem>>
    %664 = vector.broadcast %663 : f32 to vector<8x13xf32>
    %665 = arith.addf %662, %664 : vector<8x13xf32>
    %cst_108 = arith.constant 0.000000e+00 : f32
    %666 = vector.broadcast %cst_108 : f32 to vector<8x13xf32>
    %667 = arith.maximumf %665, %666 : vector<8x13xf32>
    %668 = tpu.concatenate %141, %205, %269, %333, %475, %539, %603, %667 in 1 : vector<8x13xf32>, vector<8x13xf32>, vector<8x13xf32>, vector<8x13xf32>, vector<8x13xf32>, vector<8x13xf32>, vector<8x13xf32>, vector<8x13xf32> -> vector<8x104xf32>
    %cst_109 = arith.constant 0.000000e+00 : f32
    %669 = vector.broadcast %cst_109 : f32 to vector<8x24xf32>
    %670 = tpu.concatenate %668, %669 in 1 : vector<8x104xf32>, vector<8x24xf32> -> vector<8x128xf32>
    %c0_110 = arith.constant 0 : index
    %c0_111 = arith.constant 0 : index
    %671 = vector.load %arg6[%c0_110, %c0_111] : memref<8x128xf32, #tpu.memory_space<vmem>>, vector<8x128xf32>
    tpu.vector_store %arg6[%c0_110, %c0_111], %670 {strides = array<i32>} : memref<8x128xf32, #tpu.memory_space<vmem>>, vector<8x128xf32>,
    return
  }
  func.func @transform_0(%arg0: i32) -> i32 {
    %c0_i32 = arith.constant 0 : i32
    %c0_i32_0 = arith.constant 0 : i32
    return %c0_i32 : i32
  }
  func.func @transform_1(%arg0: i32) -> i32 {
    %c0_i32 = arith.constant 0 : i32
    %c0_i32_0 = arith.constant 0 : i32
    return %c0_i32 : i32
  }
  func.func @transform_2(%arg0: i32) -> i32 {
    %c0_i32 = arith.constant 0 : i32
    %c0_i32_0 = arith.constant 0 : i32
    return %c0_i32 : i32
  }
  func.func @transform_3(%arg0: i32) -> i32 {
    %c0_i32 = arith.constant 0 : i32
    %c0_i32_0 = arith.constant 0 : i32
    return %c0_i32 : i32
  }
  func.func @transform_4(%arg0: i32) -> (i32, i32, i32) {
    %c0_i32 = arith.constant 0 : i32
    %c0_i32_0 = arith.constant 0 : i32
    %c0_i32_1 = arith.constant 0 : i32
    return %c0_i32, %arg0, %c0_i32_0 : i32, i32, i32
  }
  func.func @transform_5(%arg0: i32) -> (i32, i32) {
    %c0_i32 = arith.constant 0 : i32
    %c0_i32_0 = arith.constant 0 : i32
    return %arg0, %c0_i32 : i32, i32
  }
}

module attributes {stable_mosaic.version = 11 : i64} {
  func.func @matmul_bias_kernel(%arg0: i32, %arg1: i32, %arg2: i32, %arg3: memref<16x32xf32, #tpu.memory_space<vmem>>, %arg4: memref<32x128xbf16, #tpu.memory_space<vmem>>, %arg5: memref<1x128xf32, #tpu.memory_space<vmem>>, %arg6: memref<16x128xf32, #tpu.memory_space<vmem>>, %arg7: memref<16x128xf32, #tpu.memory_space<vmem>>) attributes {dimension_semantics = [#tpu.dimension_semantics<parallel>, #tpu.dimension_semantics<parallel>, #tpu.dimension_semantics<arbitrary>], iteration_bounds = array<i64: 1, 1, 1>, scalar_prefetch = 0 : i64, scratch_operands = 1 : i64, tpu.core_type = #tpu.core_type<tc>, window_params = [{transform_indices = @transform_0, window_bounds = array<i64: 16, 32>}, {transform_indices = @transform_1, window_bounds = array<i64: 32, 128>}, {transform_indices = @transform_2, window_bounds = array<i64: 1, 128>}, {transform_indices = @transform_3, window_bounds = array<i64: 16, 128>}]} {
    %c0_i32 = arith.constant 0 : i32
    %0 = arith.cmpi eq, %arg2, %c0_i32 : i32
    %1 = arith.extui %0 : i1 to i32
    %c0_i32_0 = arith.constant 0 : i32
    %2 = arith.cmpi ne, %1, %c0_i32_0 : i32
    scf.if %2 {
      %c0_10 = arith.constant 0 : index
      %c0_11 = arith.constant 0 : index
      %13 = vector.load %arg5[%c0_10, %c0_11] : memref<1x128xf32, #tpu.memory_space<vmem>>, vector<1x128xf32>
      %14 = vector.shape_cast %13 : vector<1x128xf32> to vector<1x128xf32>
      %15 = vector.broadcast %14 : vector<1x128xf32> to vector<16x128xf32>
      %c0_12 = arith.constant 0 : index
      %c0_13 = arith.constant 0 : index
      %16 = vector.load %arg7[%c0_12, %c0_13] : memref<16x128xf32, #tpu.memory_space<vmem>>, vector<16x128xf32>
      tpu.vector_store %arg7[%c0_12, %c0_13], %15 {strides = array<i32>} : memref<16x128xf32, #tpu.memory_space<vmem>>, vector<16x128xf32>,
    } else {
    }
    %c0 = arith.constant 0 : index
    %c0_1 = arith.constant 0 : index
    %3 = vector.load %arg7[%c0, %c0_1] : memref<16x128xf32, #tpu.memory_space<vmem>>, vector<16x128xf32>
    %c0_2 = arith.constant 0 : index
    %c0_3 = arith.constant 0 : index
    %4 = vector.load %arg3[%c0_2, %c0_3] : memref<16x32xf32, #tpu.memory_space<vmem>>, vector<16x32xf32>
    %5 = arith.truncf %4 : vector<16x32xf32> to vector<16x32xbf16>
    %c0_4 = arith.constant 0 : index
    %c0_5 = arith.constant 0 : index
    %6 = vector.load %arg4[%c0_4, %c0_5] : memref<32x128xbf16, #tpu.memory_space<vmem>>, vector<32x128xbf16>
    %cst = arith.constant dense<0.000000e+00> : vector<16x128xf32>
    %7 = tpu.matmul %5, %6, %cst {dimension_numbers = #tpu.dot_dimension_numbers<[1], [0], [0], [1], [0, 0, 1, 1], [], []>} : vector<16x32xbf16>, vector<32x128xbf16>, vector<16x128xf32> -> vector<16x128xf32>
    %8 = arith.addf %3, %7 : vector<16x128xf32>
    %c0_6 = arith.constant 0 : index
    %c0_7 = arith.constant 0 : index
    %9 = vector.load %arg7[%c0_6, %c0_7] : memref<16x128xf32, #tpu.memory_space<vmem>>, vector<16x128xf32>
    tpu.vector_store %arg7[%c0_6, %c0_7], %8 {strides = array<i32>} : memref<16x128xf32, #tpu.memory_space<vmem>>, vector<16x128xf32>,
    %c0_i32_8 = arith.constant 0 : i32
    %10 = arith.cmpi eq, %arg2, %c0_i32_8 : i32
    %11 = arith.extui %10 : i1 to i32
    %c0_i32_9 = arith.constant 0 : i32
    %12 = arith.cmpi ne, %11, %c0_i32_9 : i32
    scf.if %12 {
      %c0_10 = arith.constant 0 : index
      %c0_11 = arith.constant 0 : index
      %13 = vector.load %arg7[%c0_10, %c0_11] : memref<16x128xf32, #tpu.memory_space<vmem>>, vector<16x128xf32>
      %c0_12 = arith.constant 0 : index
      %c0_13 = arith.constant 0 : index
      %14 = vector.load %arg6[%c0_12, %c0_13] : memref<16x128xf32, #tpu.memory_space<vmem>>, vector<16x128xf32>
      tpu.vector_store %arg6[%c0_12, %c0_13], %13 {strides = array<i32>} : memref<16x128xf32, #tpu.memory_space<vmem>>, vector<16x128xf32>,
    } else {
    }
    return
  }
  func.func @transform_0(%arg0: i32, %arg1: i32, %arg2: i32) -> (i32, i32) {
    %c0_i32 = arith.constant 0 : i32
    return %arg0, %arg2 : i32, i32
  }
  func.func @transform_1(%arg0: i32, %arg1: i32, %arg2: i32) -> (i32, i32) {
    %c0_i32 = arith.constant 0 : i32
    return %arg2, %arg1 : i32, i32
  }
  func.func @transform_2(%arg0: i32, %arg1: i32, %arg2: i32) -> (i32, i32) {
    %c0_i32 = arith.constant 0 : i32
    %c0_i32_0 = arith.constant 0 : i32
    return %c0_i32, %arg1 : i32, i32
  }
  func.func @transform_3(%arg0: i32, %arg1: i32, %arg2: i32) -> (i32, i32) {
    %c0_i32 = arith.constant 0 : i32
    return %arg0, %arg1 : i32, i32
  }
}

module attributes {stable_mosaic.version = 11 : i64} {
  func.func @final_mask_kernel(%arg0: memref<14x32xf32, #tpu.memory_space<vmem>>, %arg1: memref<32x128xbf16, #tpu.memory_space<vmem>>, %arg2: memref<1x128xf32, #tpu.memory_space<vmem>>, %arg3: memref<2x14x128xf32, #tpu.memory_space<vmem>>, %arg4: memref<2x14x128xf32, #tpu.memory_space<vmem>>) attributes {dimension_semantics = [], scalar_prefetch = 0 : i64, scratch_operands = 0 : i64, tpu.core_type = #tpu.core_type<tc>} {
    %c0 = arith.constant 0 : index
    %c0_0 = arith.constant 0 : index
    %0 = vector.load %arg0[%c0, %c0_0] : memref<14x32xf32, #tpu.memory_space<vmem>>, vector<14x32xf32>
    %1 = arith.truncf %0 : vector<14x32xf32> to vector<14x32xbf16>
    %c0_1 = arith.constant 0 : index
    %c0_2 = arith.constant 0 : index
    %2 = vector.load %arg1[%c0_1, %c0_2] : memref<32x128xbf16, #tpu.memory_space<vmem>>, vector<32x128xbf16>
    %cst = arith.constant dense<0.000000e+00> : vector<14x128xf32>
    %3 = tpu.matmul %1, %2, %cst {dimension_numbers = #tpu.dot_dimension_numbers<[1], [0], [0], [1], [0, 0, 1, 1], [], []>} : vector<14x32xbf16>, vector<32x128xbf16>, vector<14x128xf32> -> vector<14x128xf32>
    %c0_3 = arith.constant 0 : index
    %c0_4 = arith.constant 0 : index
    %4 = vector.load %arg2[%c0_3, %c0_4] : memref<1x128xf32, #tpu.memory_space<vmem>>, vector<1x128xf32>
    %5 = vector.broadcast %4 : vector<1x128xf32> to vector<14x128xf32>
    %6 = arith.addf %3, %5 : vector<14x128xf32>
    %c0_5 = arith.constant 0 : index
    %c0_6 = arith.constant 0 : index
    %c0_7 = arith.constant 0 : index
    %7 = vector.load %arg3[%c0_5, %c0_6, %c0_7] : memref<2x14x128xf32, #tpu.memory_space<vmem>>, vector<2x14x128xf32>
    %8 = vector.shape_cast %6 : vector<14x128xf32> to vector<1x14x128xf32>
    %9 = vector.broadcast %8 : vector<1x14x128xf32> to vector<2x14x128xf32>
    %10 = arith.mulf %7, %9 : vector<2x14x128xf32>
    %c0_8 = arith.constant 0 : index
    %c0_9 = arith.constant 0 : index
    %c0_10 = arith.constant 0 : index
    %11 = vector.load %arg4[%c0_8, %c0_9, %c0_10] : memref<2x14x128xf32, #tpu.memory_space<vmem>>, vector<2x14x128xf32>
    tpu.vector_store %arg4[%c0_8, %c0_9, %c0_10], %10 {strides = array<i32>} : memref<2x14x128xf32, #tpu.memory_space<vmem>>, vector<2x14x128xf32>,
    return
  }
}

</mosaic_0001>

<bundles_post_ra>
// kernel: conformer_forward.9
= control target key start
LH: loop header
LB: loop body
LE: loop exit
PB: predicated region body
PF: predicated region fallthrough
CT: control target
= control target key end

     0   :  { %v128_v0 = vmov 0.0   ;;  %vm129_vm0 = vmmov 0   ;;  %vm49_vm1 = vcmask 261120   ;;  %s171_s1 = inlined_call_operand.vmem [shape: bf16[32,128], index: 1, kind: input, shape index: {}]   ;;  %s172_s0 = inlined_call_operand.vmem [shape: f32[16,32], index: 0, kind: input, shape index: {}]   ;;  %s173_s2 = inlined_call_operand.vmem [shape: f32[1,128], index: 2, kind: input, shape index: {}]   ;;  %s174_s3 = inlined_call_operand.vmem [shape: f32[16,128], index: 3, kind: output, shape index: {}]  }
   0x1   :  { %116 = vmatprep.subr.bf16.mxu0 %v128_v0  ;;  %v126_v1 = vld [vmem:[%s171_s1 + $0x8] sm:$0xff]   ;;  %120 = vmatprep.mubr.msk.bf16.mxu0 %vm129_vm0, %v128_v0  ;;  %v127_v2 = vld [vmem:[%s171_s1] sm:$0xff]  }
   0x2   :  { %117 = vmatpush3.bf16.msra.mxu0 %v126_v1  ;;  %v30_v3 = vld [vmem:[%s172_s0] sm:$0xff]  ;;  %v31_v4 = vld [vmem:[%s172_s0 + $0x8] sm:$0xff] }
   0x3   :  { %118 = vmatprep.subr.bf16.mxu0 %v128_v0  ;;  %v32_v5 = vpack.c.bf16 %v31_v4, %v30_v3  ;;  %v109_v6 = vld [vmem:[%s173_s2] ss:$0 sm:$0xff] }
   0x6   :  { %119 = vmatpush3.bf16.msra.mxu0 %v127_v2 }
   0x9   :  { %121 = vmatmul.mubr.msk.bf16.vlgmr.msra.gmra.mxu0 %vm49_vm1, %v32_v5 }
  0xc9   :  { %v87_v7 = vpop.f32.mrf.mxu0 }
  0xca   :  { %v94_v8 = vadd.f32 %v109_v6, %v87_v7 }
  0xcb   :  { %v122_v9 = vpop.f32.mrf.mxu0 }
  0xcc   :  { %103 = vst [vmem:[%s174_s3] sm:$0xff] %v94_v8 }
  0xcd   :  { %v90_v10 = vpop.f32.mrf.mxu0 }
  0xce   :  { %v95_v11 = vadd.f32 %v109_v6, %v90_v10 }
  0xcf   :  { %v123_v12 = vpop.f32.mrf.mxu0 }
  0xd0   :  { %104 = vst [vmem:[%s174_s3 + $0x8] sm:$0xff] %v95_v11 }

// kernel: conformer_forward.7
= control target key start
LH: loop header
LB: loop body
LE: loop exit
PB: predicated region body
PF: predicated region fallthrough
CT: control target
= control target key end

     0   :  { %v201_v0 = vmov 0.0   ;;  %vm202_vm0 = vmmov 0   ;;  %s262_s1 = inlined_call_operand.vmem [shape: bf16[128,128], index: 1, kind: input, shape index: {}]   ;;  %s263_s0 = inlined_call_operand.vmem [shape: f32[16,128], index: 0, kind: input, shape index: {}]   ;;  %s264_s2 = inlined_call_operand.vmem [shape: f32[1,128], index: 2, kind: input, shape index: {}]   ;;  %s265_s3 = inlined_call_operand.vmem [shape: f32[16,128], index: 3, kind: output, shape index: {}]  }
   0x1   :  { %171 = vmatprep.subr.bf16.mxu0 %v201_v0  ;;  %v193_v1 = vld [vmem:[%s262_s1 + $0x38] sm:$0xff]   ;;  %187 = vmatprep.mubr.msk.bf16.mxu0 %vm202_vm0, %v201_v0  ;;  %v194_v2 = vld [vmem:[%s262_s1 + $0x30] sm:$0xff]   ;;  %v195_v3 = vld [vmem:[%s262_s1 + $0x28] sm:$0xff]  }
   0x2   :  { %172 = vmatpush3.bf16.msra.mxu0 %v193_v1  ;;  %v196_v4 = vld [vmem:[%s262_s1 + $0x20] sm:$0xff]   ;;  %v197_v5 = vld [vmem:[%s262_s1 + $0x18] sm:$0xff]   ;;  %v198_v6 = vld [vmem:[%s262_s1 + $0x10] sm:$0xff]  }
   0x3   :  { %173 = vmatprep.subr.bf16.mxu0 %v201_v0  ;;  %v199_v7 = vld [vmem:[%s262_s1 + $0x8] sm:$0xff]   ;;  %v200_v8 = vld [vmem:[%s262_s1] sm:$0xff]  }
   0x4   :  { %v30_v9 = vld [vmem:[%s263_s0] sm:$0xff]  ;;  %v31_v10 = vld [vmem:[%s263_s0 + $0x8] sm:$0xff] }
   0x5   :  { %v32_v11 = vpack.c.bf16 %v31_v10, %v30_v9  ;;  %v153_v12 = vld [vmem:[%s264_s2] ss:$0 sm:$0xff] }
   0x6   :  { %174 = vmatpush3.bf16.msra.mxu0 %v194_v2 }
   0x7   :  { %175 = vmatprep.subr.bf16.mxu0 %v201_v0 }
   0xa   :  { %176 = vmatpush3.bf16.msra.mxu0 %v195_v3 }
   0xb   :  { %177 = vmatprep.subr.bf16.mxu0 %v201_v0 }
   0xe   :  { %178 = vmatpush3.bf16.msra.mxu0 %v196_v4 }
   0xf   :  { %179 = vmatprep.subr.bf16.mxu0 %v201_v0 }
  0x12   :  { %180 = vmatpush3.bf16.msra.mxu0 %v197_v5 }
  0x13   :  { %181 = vmatprep.subr.bf16.mxu0 %v201_v0 }
  0x16   :  { %182 = vmatpush3.bf16.msra.mxu0 %v198_v6 }
  0x17   :  { %183 = vmatprep.subr.bf16.mxu0 %v201_v0 }
  0x1a   :  { %184 = vmatpush3.bf16.msra.mxu0 %v199_v7 }
  0x1b   :  { %185 = vmatprep.subr.bf16.mxu0 %v201_v0 }
  0x1e   :  { %186 = vmatpush3.bf16.msra.mxu0 %v200_v8 }
  0x21   :  { %188 = vmatmul.mubr.bf16.vlgmr.msra.gmra.mxu0 %v32_v11 }
  0xe1   :  { %v131_v13 = vpop.f32.mrf.mxu0 }
  0xe2   :  { %v138_v14 = vadd.f32 %v153_v12, %v131_v13 }
  0xe3   :  { %v189_v15 = vpop.f32.mrf.mxu0 }
  0xe4   :  { %147 = vst [vmem:[%s265_s3] sm:$0xff] %v138_v14 }
  0xe5   :  { %v134_v16 = vpop.f32.mrf.mxu0 }
  0xe6   :  { %v139_v17 = vadd.f32 %v153_v12, %v134_v16 }
  0xe7   :  { %v190_v18 = vpop.f32.mrf.mxu0 }
  0xe8   :  { %148 = vst [vmem:[%s265_s3 + $0x8] sm:$0xff] %v139_v17 }

// kernel: reverse.0
= control target key start
LH: loop header
LB: loop body
LE: loop exit
PB: predicated region body
PF: predicated region fallthrough
CT: control target
= control target key end

     0   :  { %v2_v0 = vlaneseq  ;;  %s119_s0 = inlined_call_operand.vmem [shape: f32[2,7,15], index: 0, kind: input, shape index: {}]   ;;  %s120_s1 = inlined_call_operand.vmem [shape: f32[2,7,15], index: 1, kind: output, shape index: {}]  }
   0x1   :  { %v35_v2 = vld [vmem:[%s119_s0] sm:$0xff]  ;;  %v37_v3 = vld [vmem:[%s119_s0 + $0x8] sm:$0xff] }
   0x2   :  { %v3_v1 = vsub.s32 14, %v2_v0 }
   0x4   :  { %4 = vset.pattern.permute.xlu0 %v3_v1 }
   0x5   :  { %43 = vperm.xlu0 %4, %v35_v2  }
   0x9   :  { %49 = vperm.xlu0 %4, %v37_v3  }
  0x80   :  { %v44_v4 = vpop.permute.xlu0 %43 }
  0x81   :  { %83 = vst [vmem:[%s120_s1] sm:$0xff] %v44_v4 }
  0x84   :  { %v50_v5 = vpop.permute.xlu0 %49 }
  0x85   :  { %85 = vst [vmem:[%s120_s1 + $0x8] sm:$0xff] %v50_v5 }

// kernel: conformer_forward.8
= control target key start
LH: loop header
LB: loop body
LE: loop exit
PB: predicated region body
PF: predicated region fallthrough
CT: control target
= control target key end

     0   :  { %v887_v0 = vmov 0.0   ;;  %vm888_vm0 = vmmov 0   ;;  %v889_v3 = vmov 0   ;;  %v12_v13 = vlaneseq  ;;  %s890_s15 = smov 64   ;;  %s891_s16 = smov 32   ;;  %s1104_s1 = inlined_call_operand.vmem [shape: bf16[32,128], index: 1, kind: input, shape index: {}]   ;;  %s1105_s0 = inlined_call_operand.vmem [shape: f32[7,2,128], index: 0, kind: input, shape index: {}]   ;;  %s1106_s2 = inlined_call_operand.vmem [shape: f32[7,2,32], index: 2, kind: output, shape index: {}]  }
   0x1   :  { %756 = vmatprep.subr.bf16.mxu0 %v887_v0  ;;  %v817_v1 = vld [vmem:[%s1104_s1 + $0x8] sm:$0xff]   ;;  %760 = vmatprep.mubr.msk.bf16.mxu0 %vm888_vm0, %v887_v0  ;;  %v818_v2 = vld [vmem:[%s1104_s1] sm:$0xff]   ;;  %vm34_vm4 = vcmask 261120   ;;  %vm108_vm5 = vcmask 254976  }
   0x2   :  { %764 = vmatprep.subr.bf16.mxu1 %v887_v0  ;;  %768 = vmatprep.mubr.msk.bf16.mxu1 %vm888_vm0, %v887_v0  ;;  %v17_v4 = vld [vmem:[%s1105_s0] sm:$0x3]  ;;  %v13_v14 = vand.u32 127, %v12_v13  ;;  %v819_v24 = vld [vmem:[%s1104_s1 + $0x8] sm:$0xff]   ;;  %v699_v31 = vld [vmem:[%s1105_s0 + $0x2] sm:$0x3] }
   0x3   :  { %757 = vmatpush3.bf16.msra.mxu0 %v817_v1  ;;  %765 = vmatpush3.bf16.msra.mxu1 %v819_v24  ;;  %v820_v25 = vld [vmem:[%s1104_s1] sm:$0xff]   ;;  %v821_v48 = vld [vmem:[%s1104_s1 + $0x8] sm:$0xff]  }
   0x4   :  { %758 = vmatprep.subr.bf16.mxu0 %v887_v0  ;;  %vm14_vm1 = vcmp.ge.s32.totalorder %v13_v14, 64  ;;  %vm15_vm2 = vcmp.lt.s32.totalorder %v13_v14, 96  ;;  %766 = vmatprep.subr.bf16.mxu1 %v887_v0  ;;  %v822_v49 = vld [vmem:[%s1104_s1] sm:$0xff]  }
   0x5   :  { %vm926_vm3 = vmand %vm14_vm1, %vm15_vm2  ;;  %v705_v55 = vld [vmem:[%s1105_s0 + $0x4] sm:$0x3] }
   0x7   :  { %759 = vmatpush3.bf16.msra.mxu0 %v818_v2  ;;  %767 = vmatpush3.bf16.msra.mxu1 %v820_v25 }
   0x8   :  { %772 = vmatprep.subr.bf16.mxu0 %v887_v0  ;;  %780 = vmatprep.subr.bf16.mxu1 %v887_v0 }
   0xa   :  { %761 = vmatmul.mubr.bf16.vlgmr.msra.gmra.mxu0 %v889_v3 }
   0xb   :  { %776 = vmatprep.mubr.msk.bf16.mxu0 %vm888_vm0, %v887_v0  ;;  %773 = vmatpush3.bf16.msra.mxu0 %v821_v48 }
   0xc   :  { %774 = vmatprep.subr.bf16.mxu0 %v887_v0 }
   0xf   :  { %775 = vmatpush3.bf16.msra.mxu0 %v822_v49 }
  0x10   :  { %788 = vmatprep.subr.bf16.mxu0 %v887_v0 }
  0xca   :  { %v72_v5 = vpop.f32.mrf.mxu0 }
  0xcb   :  { %v78_v6 = vadd.f32 %v72_v5, %v17_v4 }
  0xcc   :  { %v762_v7 = vpop.f32.mrf.mxu0 }
  0xcd   :  { %v698_v8 = vmul.f32 -1.442695, %v78_v6 }
  0xce   :  { %v75_v9 = vpop.f32.mrf.mxu0 }
  0xcf   :  { %831 = vpow2.f32 %v698_v8  ;;  %v823_v9 = vld [vmem:[%s1104_s1 + $0x8] sm:$0xff]  }
  0xd0   :  { %v763_v10 = vpop.f32.mrf.mxu0  ;;  %833 = vtanh.f32 %v78_v6 }
  0xd1   :  { %v824_v10 = vld [vmem:[%s1104_s1] sm:$0xff]  }
  0xdc   :  { %v832_v11 = vpop.eup %831 }
  0xdd   :  { %v83_v12 = vadd.f32 1.0, %v832_v11  ;;  %v834_v16 = vpop.eup %833 }
  0xdf   :  { %835 = vrcp.f32 %v83_v12 }
  0xec   :  { %v836_v17 = vpop.eup %835 }
  0xed   :  { %v86_v18 = vsel %vm926_vm3, %v834_v16, %v836_v17  ;;  %v711_v17 = vld [vmem:[%s1105_s0 + $0x6] sm:$0x3] }
  0xee   :  { %89 = vrot.lane.b32.xlu0 %v86_v18, %s890_s15  ;;  %v87_v21 = vmul.f32 0.0, %v86_v18 }
 0x160   :  { %v90_v19 = vpop.permute.xlu0 %89 }
 0x161   :  { %v92_v20 = vmul.f32 %v90_v19, %v86_v18 }
 0x163   :  { %94 = vrot.lane.b32.xlu0 %v92_v20, %s891_s16 }
 0x1d5   :  { %v95_v22 = vpop.permute.xlu0 %94 }
 0x1d6   :  { %v97_v23 = vadd.f32 %v95_v22, %v87_v21 }
 0x1d8   :  { %837 = vtanh.f32 %v97_v23 }
 0x1e5   :  { %v838_v26 = vpop.eup %837 }
 0x1e6   :  { %100 = vrot.lane.b32.xlu1 %v838_v26, %s890_s15 }
 0x258   :  { %v101_v27 = vpop.permute.xlu1 %100 }
 0x259   :  { %v943_v28 = vmul.f32 %v101_v27, %v86_v18 }
 0x25b   :  { %v112_v29 = vpack.c.bf16 %v943_v28, %v943_v28 }
 0x25d   :  { %118 = vrot.lane.b32.xlu1 %v112_v29, %s891_s16 }
 0x2cf   :  { %v119_v30 = vpop.permute.xlu1 %118 }
 0x2d0   :  { %769 = vmatmul.mubr.msk.bf16.vlgmr.msra.gmra.mxu1 %vm34_vm4, %v119_v30 }
 0x2d1   :  { %784 = vmatprep.mubr.msk.bf16.mxu1 %vm888_vm0, %v887_v0  ;;  %781 = vmatpush3.bf16.msra.mxu1 %v823_v9 }
 0x2d2   :  { %782 = vmatprep.subr.bf16.mxu1 %v887_v0 }
 0x2d5   :  { %783 = vmatpush3.bf16.msra.mxu1 %v824_v10 }
 0x2d6   :  { %796 = vmatprep.subr.bf16.mxu1 %v887_v0 }
 0x390   :  { %v169_v32 = vpop.f32.mrf.mxu1 }
 0x391   :  { %v175_v33 = vadd.f32 %v699_v31, %v169_v32 }
 0x392   :  { %v770_v34 = vpop.f32.mrf.mxu1 }
 0x393   :  { %v703_v35 = vmul.f32 -1.442695, %v175_v33 }
 0x394   :  { %v172_v36 = vpop.f32.mrf.mxu1 }
 0x395   :  { %839 = vpow2.f32 %v703_v35  ;;  %v825_v35 = vld [vmem:[%s1104_s1 + $0x8] sm:$0xff]   ;;  %v826_v36 = vld [vmem:[%s1104_s1] sm:$0xff]  }
 0x396   :  { %v771_v37 = vpop.f32.mrf.mxu1  ;;  %841 = vtanh.f32 %v175_v33 }
 0x3a2   :  { %v840_v38 = vpop.eup %839 }
 0x3a3   :  { %v180_v39 = vadd.f32 1.0, %v840_v38  ;;  %v842_v40 = vpop.eup %841 }
 0x3a5   :  { %843 = vrcp.f32 %v180_v39 }
 0x3b2   :  { %v844_v41 = vpop.eup %843 }
 0x3b3   :  { %v183_v42 = vsel %vm926_vm3, %v842_v40, %v844_v41 }
 0x3b4   :  { %186 = vrot.lane.b32.xlu0 %v183_v42, %s890_s15  ;;  %v184_v45 = vmul.f32 %v183_v42, %v97_v23 }
 0x426   :  { %v187_v43 = vpop.permute.xlu0 %186 }
 0x427   :  { %v189_v44 = vmul.f32 %v187_v43, %v183_v42 }
 0x429   :  { %191 = vrot.lane.b32.xlu1 %v189_v44, %s891_s16 }
 0x49b   :  { %v192_v46 = vpop.permute.xlu1 %191 }
 0x49c   :  { %v194_v47 = vadd.f32 %v192_v46, %v184_v45 }
 0x49e   :  { %845 = vtanh.f32 %v194_v47 }
 0x4ab   :  { %v846_v50 = vpop.eup %845 }
 0x4ac   :  { %197 = vrot.lane.b32.xlu0 %v846_v50, %s890_s15 }
 0x51e   :  { %v198_v51 = vpop.permute.xlu0 %197 }
 0x51f   :  { %v967_v52 = vmul.f32 %v198_v51, %v183_v42  ;;  %v717_v42 = vld [vmem:[%s1105_s0 + $0x8] sm:$0x3] }
 0x521   :  { %v209_v53 = vpack.c.bf16 %v967_v52, %v967_v52 }
 0x523   :  { %215 = vrot.lane.b32.xlu1 %v209_v53, %s891_s16 }
 0x595   :  { %v216_v54 = vpop.permute.xlu1 %215 }
 0x596   :  { %777 = vmatmul.mubr.msk.bf16.vlgmr.msra.gmra.mxu0 %vm34_vm4, %v216_v54 }
 0x597   :  { %792 = vmatprep.mubr.msk.bf16.mxu0 %vm888_vm0, %v887_v0  ;;  %789 = vmatpush3.bf16.msra.mxu0 %v825_v35 }
 0x598   :  { %790 = vmatprep.subr.bf16.mxu0 %v887_v0 }
 0x59b   :  { %791 = vmatpush3.bf16.msra.mxu0 %v826_v36 }
 0x59c   :  { %804 = vmatprep.subr.bf16.mxu0 %v887_v0 }
 0x656   :  { %v266_v56 = vpop.f32.mrf.mxu0 }
 0x657   :  { %v272_v57 = vadd.f32 %v705_v55, %v266_v56 }
 0x658   :  { %v778_v58 = vpop.f32.mrf.mxu0 }
 0x659   :  { %v709_v59 = vmul.f32 -1.442695, %v272_v57 }
 0x65a   :  { %v269_v60 = vpop.f32.mrf.mxu0 }
 0x65b   :  { %847 = vpow2.f32 %v709_v59  ;;  %v827_v60 = vld [vmem:[%s1104_s1 + $0x8] sm:$0xff]  }
 0x65c   :  { %v779_v61 = vpop.f32.mrf.mxu0  ;;  %849 = vtanh.f32 %v272_v57 }
 0x65d   :  { %v828_v61 = vld [vmem:[%s1104_s1] sm:$0xff]  }
 0x668   :  { %v848_v62 = vpop.eup %847 }
 0x669   :  { %v277_v63 = vadd.f32 1.0, %v848_v62  ;;  %v850_v1 = vpop.eup %849 }
 0x66b   :  { %851 = vrcp.f32 %v277_v63 }
 0x678   :  { %v852_v2 = vpop.eup %851 }
 0x679   :  { %v280_v3 = vsel %vm926_vm3, %v850_v1, %v852_v2 }
 0x67a   :  { %283 = vrot.lane.b32.xlu0 %v280_v3, %s890_s15  ;;  %v281_v6 = vmul.f32 %v280_v3, %v194_v47 }
 0x6ec   :  { %v284_v4 = vpop.permute.xlu0 %283 }
 0x6ed   :  { %v286_v5 = vmul.f32 %v284_v4, %v280_v3  ;;  %v723_v4 = vld [vmem:[%s1105_s0 + $0xa] sm:$0x3] }
 0x6ef   :  { %288 = vrot.lane.b32.xlu1 %v286_v5, %s891_s16 }
 0x761   :  { %v289_v7 = vpop.permute.xlu1 %288 }
 0x762   :  { %v291_v8 = vadd.f32 %v289_v7, %v281_v6 }
 0x764   :  { %853 = vtanh.f32 %v291_v8 }
 0x771   :  { %v854_v11 = vpop.eup %853 }
 0x772   :  { %294 = vrot.lane.b32.xlu0 %v854_v11, %s890_s15 }
 0x7e4   :  { %v295_v12 = vpop.permute.xlu0 %294 }
 0x7e5   :  { %v991_v13 = vmul.f32 %v295_v12, %v280_v3 }
 0x7e7   :  { %v306_v14 = vpack.c.bf16 %v991_v13, %v991_v13 }
 0x7e9   :  { %312 = vrot.lane.b32.xlu1 %v306_v14, %s891_s16 }
 0x85b   :  { %v313_v16 = vpop.permute.xlu1 %312 }
 0x85c   :  { %785 = vmatmul.mubr.msk.bf16.vlgmr.msra.gmra.mxu1 %vm34_vm4, %v313_v16 }
 0x85d   :  { %800 = vmatprep.mubr.msk.bf16.mxu1 %vm888_vm0, %v887_v0  ;;  %797 = vmatpush3.bf16.msra.mxu1 %v827_v60 }
 0x85e   :  { %798 = vmatprep.subr.bf16.mxu1 %v887_v0 }
 0x861   :  { %799 = vmatpush3.bf16.msra.mxu1 %v828_v61 }
 0x91c   :  { %v363_v18 = vpop.f32.mrf.mxu1 }
 0x91d   :  { %v369_v19 = vadd.f32 %v711_v17, %v363_v18 }
 0x91e   :  { %v786_v20 = vpop.f32.mrf.mxu1 }
 0x91f   :  { %v715_v21 = vmul.f32 -1.442695, %v369_v19 }
 0x920   :  { %v366_v22 = vpop.f32.mrf.mxu1 }
 0x921   :  { %855 = vpow2.f32 %v715_v21 }
 0x922   :  { %v787_v23 = vpop.f32.mrf.mxu1  ;;  %857 = vtanh.f32 %v369_v19 }
 0x923   :  { %v829_v23 = vld [vmem:[%s1104_s1 + $0x8] sm:$0xff]  }
 0x92e   :  { %v856_v24 = vpop.eup %855 }
 0x92f   :  { %v374_v25 = vadd.f32 1.0, %v856_v24  ;;  %v858_v26 = vpop.eup %857  ;;  %v830_v24 = vld [vmem:[%s1104_s1] sm:$0xff]  }
 0x931   :  { %859 = vrcp.f32 %v374_v25 }
 0x93e   :  { %v860_v27 = vpop.eup %859 }
 0x93f   :  { %v377_v29 = vsel %vm926_vm3, %v858_v26, %v860_v27 }
 0x940   :  { %380 = vrot.lane.b32.xlu0 %v377_v29, %s890_s15  ;;  %v378_v32 = vmul.f32 %v377_v29, %v291_v8 }
 0x9b2   :  { %v381_v30 = vpop.permute.xlu0 %380 }
 0x9b3   :  { %v383_v31 = vmul.f32 %v381_v30, %v377_v29 }
 0x9b5   :  { %385 = vrot.lane.b32.xlu1 %v383_v31, %s891_s16  ;;  %v729_v31 = vld [vmem:[%s1105_s0 + $0xc] sm:$0x3] }
 0xa27   :  { %v386_v33 = vpop.permute.xlu1 %385 }
 0xa28   :  { %v388_v34 = vadd.f32 %v386_v33, %v378_v32 }
 0xa2a   :  { %861 = vtanh.f32 %v388_v34 }
 0xa37   :  { %v862_v37 = vpop.eup %861 }
 0xa38   :  { %391 = vrot.lane.b32.xlu0 %v862_v37, %s890_s15 }
 0xaaa   :  { %v392_v38 = vpop.permute.xlu0 %391 }
 0xaab   :  { %v1015_v39 = vmul.f32 %v392_v38, %v377_v29 }
 0xaad   :  { %v403_v40 = vpack.c.bf16 %v1015_v39, %v1015_v39 }
 0xaaf   :  { %409 = vrot.lane.b32.xlu1 %v403_v40, %s891_s16 }
 0xb21   :  { %v410_v41 = vpop.permute.xlu1 %409 }
 0xb22   :  { %793 = vmatmul.mubr.msk.bf16.vlgmr.msra.gmra.mxu0 %vm34_vm4, %v410_v41 }
 0xb23   :  { %808 = vmatprep.mubr.msk.bf16.mxu0 %vm888_vm0, %v887_v0  ;;  %805 = vmatpush3.bf16.msra.mxu0 %v829_v23 }
 0xb24   :  { %806 = vmatprep.subr.bf16.mxu0 %v887_v0 }
 0xb27   :  { %807 = vmatpush3.bf16.msra.mxu0 %v830_v24 }
 0xbe2   :  { %v460_v43 = vpop.f32.mrf.mxu0 }
 0xbe3   :  { %v466_v44 = vadd.f32 %v717_v42, %v460_v43 }
 0xbe4   :  { %v794_v45 = vpop.f32.mrf.mxu0 }
 0xbe5   :  { %v721_v46 = vmul.f32 -1.442695, %v466_v44 }
 0xbe6   :  { %v463_v47 = vpop.f32.mrf.mxu0 }
 0xbe7   :  { %863 = vpow2.f32 %v721_v46 }
 0xbe8   :  { %v795_v48 = vpop.f32.mrf.mxu0  ;;  %865 = vtanh.f32 %v466_v44 }
 0xbf4   :  { %v864_v49 = vpop.eup %863 }
 0xbf5   :  { %v471_v50 = vadd.f32 1.0, %v864_v49  ;;  %v866_v51 = vpop.eup %865 }
 0xbf7   :  { %867 = vrcp.f32 %v471_v50 }
 0xc04   :  { %v868_v53 = vpop.eup %867 }
 0xc05   :  { %v474_v54 = vsel %vm926_vm3, %v866_v51, %v868_v53 }
 0xc06   :  { %477 = vrot.lane.b32.xlu0 %v474_v54, %s890_s15  ;;  %v475_v57 = vmul.f32 %v474_v54, %v388_v34 }
 0xc78   :  { %v478_v55 = vpop.permute.xlu0 %477 }
 0xc79   :  { %v480_v56 = vmul.f32 %v478_v55, %v474_v54 }
 0xc7b   :  { %482 = vrot.lane.b32.xlu1 %v480_v56, %s891_s16 }
 0xced   :  { %v483_v58 = vpop.permute.xlu1 %482 }
 0xcee   :  { %v485_v59 = vadd.f32 %v483_v58, %v475_v57 }
 0xcf0   :  { %869 = vtanh.f32 %v485_v59 }
 0xcfd   :  { %v870_v62 = vpop.eup %869 }
 0xcfe   :  { %488 = vrot.lane.b32.xlu0 %v870_v62, %s890_s15 }
 0xd70   :  { %v489_v63 = vpop.permute.xlu0 %488 }
 0xd71   :  { %v491_v1 = vmul.f32 %v489_v63, %v474_v54 }
 0xd73   :  { %v500_v2 = vpack.c.bf16 %v491_v1, %v491_v1 }
 0xd75   :  { %506 = vrot.lane.b32.xlu1 %v500_v2, %s891_s16 }
 0xde7   :  { %v507_v3 = vpop.permute.xlu1 %506 }
 0xde8   :  { %801 = vmatmul.mubr.msk.bf16.vlgmr.msra.gmra.mxu1 %vm34_vm4, %v507_v3 }
 0xea8   :  { %v557_v5 = vpop.f32.mrf.mxu1 }
 0xea9   :  { %v563_v6 = vadd.f32 %v723_v4, %v557_v5 }
 0xeaa   :  { %v802_v7 = vpop.f32.mrf.mxu1 }
 0xeab   :  { %v727_v8 = vmul.f32 -1.442695, %v563_v6 }
 0xeac   :  { %v560_v9 = vpop.f32.mrf.mxu1 }
 0xead   :  { %871 = vpow2.f32 %v727_v8 }
 0xeae   :  { %v803_v10 = vpop.f32.mrf.mxu1  ;;  %873 = vtanh.f32 %v563_v6 }
 0xeba   :  { %v872_v11 = vpop.eup %871 }
 0xebb   :  { %v568_v12 = vadd.f32 1.0, %v872_v11  ;;  %v874_v14 = vpop.eup %873 }
 0xebd   :  { %875 = vrcp.f32 %v568_v12 }
 0xeca   :  { %v876_v16 = vpop.eup %875 }
 0xecb   :  { %v571_v17 = vsel %vm926_vm3, %v874_v14, %v876_v16 }
 0xecc   :  { %574 = vrot.lane.b32.xlu0 %v571_v17, %s890_s15  ;;  %v572_v20 = vmul.f32 %v571_v17, %v485_v59 }
 0xf3e   :  { %v575_v18 = vpop.permute.xlu0 %574 }
 0xf3f   :  { %v577_v19 = vmul.f32 %v575_v18, %v571_v17 }
 0xf41   :  { %579 = vrot.lane.b32.xlu1 %v577_v19, %s891_s16 }
 0xfb3   :  { %v580_v21 = vpop.permute.xlu1 %579 }
 0xfb4   :  { %v582_v22 = vadd.f32 %v580_v21, %v572_v20 }
 0xfb6   :  { %877 = vtanh.f32 %v582_v22 }
 0xfc3   :  { %v878_v25 = vpop.eup %877 }
 0xfc4   :  { %585 = vrot.lane.b32.xlu0 %v878_v25, %s890_s15 }
0x1036   :  { %v586_v26 = vpop.permute.xlu0 %585 }
0x1037   :  { %v588_v27 = vmul.f32 %v586_v26, %v571_v17 }
0x1039   :  { %v597_v29 = vpack.c.bf16 %v588_v27, %v588_v27 }
0x103b   :  { %603 = vrot.lane.b32.xlu1 %v597_v29, %s891_s16 }
0x10ad   :  { %v604_v30 = vpop.permute.xlu1 %603 }
0x10ae   :  { %809 = vmatmul.mubr.msk.bf16.vlgmr.msra.gmra.mxu0 %vm34_vm4, %v604_v30 }
0x116e   :  { %v654_v32 = vpop.f32.mrf.mxu0 }
0x116f   :  { %v660_v33 = vadd.f32 %v729_v31, %v654_v32 }
0x1170   :  { %v810_v34 = vpop.f32.mrf.mxu0 }
0x1171   :  { %v733_v0 = vmul.f32 -1.442695, %v660_v33 }
0x1172   :  { %v657_v35 = vpop.f32.mrf.mxu0 }
0x1173   :  { %879 = vpow2.f32 %v733_v0 }
0x1174   :  { %v811_v36 = vpop.f32.mrf.mxu0  ;;  %881 = vtanh.f32 %v660_v33 }
0x1180   :  { %v880_v37 = vpop.eup %879 }
0x1181   :  { %v665_v38 = vadd.f32 1.0, %v880_v37  ;;  %v882_v40 = vpop.eup %881 }
0x1183   :  { %883 = vrcp.f32 %v665_v38 }
0x1190   :  { %v884_v41 = vpop.eup %883 }
0x1191   :  { %v668_v42 = vsel %vm926_vm3, %v882_v40, %v884_v41 }
0x1192   :  { %671 = vrot.lane.b32.xlu0 %v668_v42, %s890_s15  ;;  %v669_v45 = vmul.f32 %v668_v42, %v582_v22 }
0x1204   :  { %v672_v43 = vpop.permute.xlu0 %671 }
0x1205   :  { %v674_v44 = vmul.f32 %v672_v43, %v668_v42 }
0x1207   :  { %676 = vrot.lane.b32.xlu1 %v674_v44, %s891_s16 }
0x120b   :  { %105 = vrot.lane.b32.xlu1 %v943_v28, %s891_s16 }
0x120f   :  { %299 = vrot.lane.b32.xlu1 %v991_v13, %s891_s16 }
0x1213   :  { %493 = vrot.lane.b32.xlu1 %v491_v1, %s891_s16 }
0x1279   :  { %v677_v46 = vpop.permute.xlu1 %676 }
0x127a   :  { %v679_v47 = vadd.f32 %v677_v46, %v669_v45 }
0x127c   :  { %885 = vtanh.f32 %v679_v47 }
0x127d   :  { %v106_v15 = vpop.permute.xlu1 %105 }
0x127e   :  { %109 = vst.msk [vmem:[%s1106_s2] sm:$0x3] %vm108_vm5, %v106_v15 }
0x1281   :  { %v300_v48 = vpop.permute.xlu1 %299 }
0x1282   :  { %710 = vst.msk [vmem:[%s1106_s2 + $0x4] sm:$0x3] %vm108_vm5, %v300_v48 }
0x1285   :  { %v494_v28 = vpop.permute.xlu1 %493 }
0x1286   :  { %722 = vst.msk [vmem:[%s1106_s2 + $0x8] sm:$0x3] %vm108_vm5, %v494_v28 }
0x1289   :  { %v886_v13 = vpop.eup %885 }
0x128a   :  { %682 = vrot.lane.b32.xlu0 %v886_v13, %s890_s15 }
0x128e   :  { %202 = vrot.lane.b32.xlu0 %v967_v52, %s891_s16 }
0x1292   :  { %396 = vrot.lane.b32.xlu0 %v1015_v39, %s891_s16 }
0x1296   :  { %590 = vrot.lane.b32.xlu0 %v588_v27, %s891_s16 }
0x12fc   :  { %v683_v49 = vpop.permute.xlu0 %682 }
0x12fd   :  { %v685_v50 = vmul.f32 %v683_v49, %v668_v42 }
0x12ff   :  { %687 = vrot.lane.b32.xlu1 %v685_v50, %s891_s16 }
0x1300   :  { %v203_v51 = vpop.permute.xlu0 %202 }
0x1301   :  { %704 = vst.msk [vmem:[%s1106_s2 + $0x2] sm:$0x3] %vm108_vm5, %v203_v51 }
0x1304   :  { %v397_v53 = vpop.permute.xlu0 %396 }
0x1305   :  { %716 = vst.msk [vmem:[%s1106_s2 + $0x6] sm:$0x3] %vm108_vm5, %v397_v53 }
0x1308   :  { %v591_v52 = vpop.permute.xlu0 %590 }
0x1309   :  { %728 = vst.msk [vmem:[%s1106_s2 + $0xa] sm:$0x3] %vm108_vm5, %v591_v52 }
0x1371   :  { %v688_v39 = vpop.permute.xlu1 %687 }
0x1372   :  { %734 = vst.msk [vmem:[%s1106_s2 + $0xc] sm:$0x3] %vm108_vm5, %v688_v39 }

// kernel: conformer_forward.6
= control target key start
LH: loop header
LB: loop body
LE: loop exit
PB: predicated region body
PF: predicated region fallthrough
CT: control target
= control target key end

     0   :  { %10 = vsyncpa [#allocation3], 0  ;;  %s2107_s0 = inlined_call_operand.vmem [shape: f32[12], index: 0, kind: input, shape index: {}]   ;;  %s2108_s1 = inlined_call_operand.vmem [shape: f32[4], index: 1, kind: input, shape index: {}]   ;;  %s2109_s2 = inlined_call_operand.vmem [shape: f32[48], index: 2, kind: input, shape index: {}]   ;;  %s2110_s3 = inlined_call_operand.vmem [shape: f32[4], index: 3, kind: input, shape index: {}]   ;;  %s2111_s4 = inlined_call_operand.vmem [shape: f32[2,16,17], index: 4, kind: input, shape index: {}]   ;;  %s2112_s5 = inlined_call_operand.vmem [shape: f32[16,128], index: 5, kind: output, shape index: {}]  }
   0x1   :  { %11 = vsyncpa [#allocation5], 0 }
   0x2   :  { %12 = vsyncpa [#allocation8], 0  ;;  %s1471_s18 = smov 0   ;;  %s1473_s19 = smov 0  }
   0x3   :  { %s1475_s20 = smov 0  }
   0x4 LB: > { %s1487_s21 = sadd.s32 4294967295, %s1426_s20   ;;  %s1490_s22 = sadd.s32 1, %s1426_s20   ;;  %s1426_s20 = sphi %s1475_s20, %s2128_s20   ;;  %s1422_s19 = sphi %s1473_s19, %s2127_s19   ;;  %s1418_s18 = sphi %s1471_s18, %s2126_s18  }
   0x5   : > { %s106_s23 = ssub.s32 %s1426_s20, %s1490_s22  ;;  %s109_s24 = sadd.s32 1, %s1422_s19 }
   0x6   : > { %p107_p0 = scmp.eq.s32.totalorder %s106_s23, 0  ;;  %p116_p1 = scmp.ne.s32.totalorder %s1422_s19, %s1418_s18 }
   0x7   : > { %p117_p2 = scmp.eq.s32.totalorder %s1426_s20, 0  ;;  %p1176_p3 = scmp.ge.s32.totalorder %s1426_s20, 1 }
   0x8   : > { %s1500_s25 = scalar_select %p107_p0, %s1422_s19, %s109_s24  }
   0x9   : > { %p1502_p4 = por %p117_p2, %p116_p1  ;;  %p159_p5 = scmp.lt.s32.totalorder %s1426_s20, 3 }
   0xa   : > { %p2113_p6 = scmp.eq.s32.totalorder %s1487_s21, 0  ;;  %s183_s30 = sshll.u32 %s2108_s1, 4  ;;  %s184_s30 = int_to_ptr.vmem [resolvable:$true] %s183_s30 }
   0xb   : > { %s2115_s26 = scalar_select %p1502_p4, 1, 0 }
   0xc   : > { %p1508_p7 = pnand %p1176_p3, %p159_p5  ;;  %s172_s8 = sshll.u32 %s2107_s0, 4  ;;  %s173_s8 = int_to_ptr.vmem [resolvable:$true] %s172_s8 }
   0xd   : > { %s194_s12 = sshll.u32 %s2109_s2, 4  ;;  %s205_s15 = sshll.u32 %s2110_s3, 4  ;;  %s1529_s12 = int_to_ptr.vmem [resolvable:$true] %s194_s12  ;;  %s206_s15 = int_to_ptr.vmem [resolvable:$true] %s205_s15 }
   0xe   : > { %s2116_s27 = scalar_select %p1508_p7, 1, 0 }
   0xf   : > { %p1274_p8 = pneg %p1508_p7  ;;  %s1332_s16 = scalar_lea.vmem %s184_s30, 16 }
  0x10   : > { %p1333_p10 = scmp.ne.s32.totalorder %s184_s30, %s1332_s16  ;;  %p1340_p0 = scmp.lt.s32.totalorder %s184_s30, %s184_s30 }
  0x11   : > { %p1522_p9 = pnand %p2113_p6, %p1274_p8  ;;  %p1341_p1 = scmp.lt.s32.totalorder %s1332_s16, %s1332_s16 }
  0x13   : > { %p1334_p11 = pneg %p1522_p9  ;;  %p1342_p2 = por %p1341_p1, %p1340_p0 }
  0x15   : > { %p1335_p12 = pnand %p1334_p11, %p1333_p10 }
  0x17   : > { %p1336_p13 = pneg %p1335_p12 }
  0x19   : > { %p1343_p3 = pnand %p1342_p2, %p1336_p13 }
  0x1b   : > { %1346 = shalt.err (!%p1343_p3)
}
  0x1c   : > { %s1428_s17 = smov [#allocation4]   ;;  %s1347_s23 = scalar_lea.vmem %s173_s8, 16 }
  0x1d   : > { %1280 = dma.vmem_to_smem (!%p1522_p9), %s184_s30, 16, %s1428_s17, [#allocation5]  }
  0x1e   : > { %p1348_p5 = scmp.ne.s32.totalorder %s173_s8, %s1347_s23  ;;  %p1355_p7 = scmp.lt.s32.totalorder %s173_s8, %s173_s8 }
  0x1f   : > { %p1356_p4 = scmp.lt.s32.totalorder %s1347_s23, %s1347_s23 }
  0x20   : > { %p1350_p8 = pnand %p1348_p5, %p1334_p11 }
  0x21   : > { %p1357_p10 = por %p1356_p4, %p1355_p7 }
  0x22   : > { %p1351_p6 = pneg %p1350_p8 }
  0x24   : > { %p1358_p12 = pnand %p1357_p10, %p1351_p6 }
  0x26   : > { %1361 = shalt.err (!%p1358_p12)
}
  0x27   : > { %s1429_s24 = smov [#allocation2]   ;;  %s1362_s28 = scalar_lea.vmem %s1529_s12, 16 }
  0x28   : > { %1277 = dma.vmem_to_smem (!%p1522_p9), %s173_s8, 16, %s1429_s24, [#allocation3]  }
  0x29   : > { %p1363_p13 = scmp.ne.s32.totalorder %s1529_s12, %s1362_s28  ;;  %p1370_p2 = scmp.lt.s32.totalorder %s1529_s12, %s1529_s12 }
  0x2a   : > { %p1371_p3 = scmp.lt.s32.totalorder %s1362_s28, %s1362_s28 }
  0x2b   : > { %p1365_p0 = pnand %p1363_p13, %p1334_p11 }
  0x2c   : > { %p1372_p4 = por %p1371_p3, %p1370_p2 }
  0x2d   : > { %p1366_p1 = pneg %p1365_p0 }
  0x2f   : > { %p1373_p6 = pnand %p1372_p4, %p1366_p1 }
  0x31   : > { %1376 = shalt.err (!%p1373_p6)
}
  0x32   : > { %s1430_s29 = smov [#allocation6]   ;;  %s1377_s7 = scalar_lea.vmem %s206_s15, 16 }
  0x33   : > { %1283 = dma.vmem_to_smem (!%p1522_p9), %s1529_s12, 16, %s1430_s29, [#allocation5]  }
  0x34   : > { %p1378_p7 = scmp.ne.s32.totalorder %s206_s15, %s1377_s7  ;;  %p1385_p10 = scmp.lt.s32.totalorder %s206_s15, %s206_s15 }
  0x35   : > { %p1386_p12 = scmp.lt.s32.totalorder %s1377_s7, %s1377_s7 }
  0x36   : > { %p1380_p5 = pnand %p1378_p7, %p1334_p11 }
  0x37   : > { %p1387_p13 = por %p1386_p12, %p1385_p10 }
  0x38   : > { %p1381_p8 = pneg %p1380_p5 }
  0x3a   : > { %p1388_p0 = pnand %p1387_p13, %p1381_p8 }
  0x3c   : > { %1391 = shalt.err (!%p1388_p0)
}
  0x3d   : > { %s1431_s8 = smov [#allocation7]   ;;  %p1181_p1 = scmp.ge.s32.totalorder %s1426_s20, 2 }
  0x3e   : > { %1286 = dma.vmem_to_smem (!%p1522_p9), %s206_s15, 16, %s1431_s8, [#allocation8]  }
  0x3f   : > { %212 = sbr.rel (%p1181_p1) target bundleno = 73 (0x49), region = 32  ;;  %p2118_p2 = scmp.ne.s32.totalorder (!%p1181_p1), %s2115_s26, 0 }
  0x44   : > { %215 = sbr.rel (!%p2118_p2) target bundleno = 73 (0x49), region = 36  ;;  %s217_s10 = sand.u32 (%p2118_p2), 1, %s1422_s19  }
  0x45   : > { %s1183_s11 = sshll.u32 (%p2118_p2), %s1426_s20, 3  ;;  %s1182_s12 = sshll.u32 (%p2118_p2), %s217_s10, 4 }
  0x46   : > { %s221_s16 = scalar_lea.vmem (%p2118_p2), %s2111_s4, %s1183_s11  ;;  %s219_s17 = scalar_lea.vmem (%p2118_p2), [#allocation9], %s1182_s12 }
  0x47   : > { %v252_v0 = vld [vmem:[%s221_s16] sm:$0xff] (%p2118_p2)  ;;  %v254_v1 = vld [vmem:[%s221_s16 + $0x10] sm:$0xff] (%p2118_p2) }
  0x48   : > { %253 = vst [vmem:[%s219_s17] sm:$0xff] (%p2118_p2), %v252_v0  ;;  %255 = vst [vmem:[%s219_s17 + $0x8] sm:$0xff] (%p2118_p2), %v254_v1 }
  0x49 PF: > { %p2119_p9 = scmp.ne.s32.totalorder %s2116_s27, 0 }
  0x4a   : > { %p2120_p11 = scmp.eq.s32.totalorder (!%p2119_p9), %s1487_s21, 0 }
  0x4b   : > { %264 = sbr.rel (%p2119_p9) target bundleno = 576 (0x240), region = 74 }
  0x50   : > { %1405 = dma.done.wait (%p2120_p11), [#allocation3], 16   ;;  %p2121_p3 = pmov %p2120_p11 }
  0x52   : > { %1407 = vsyncadd (%p2121_p3), [#allocation3], 4294967280  ;;  %p2122_p4 = pmov %p2121_p3 }
  0x53   : > { %p2123_p6 = pmov %p2121_p3 }
  0x54   : > { %1409 = dma.done.wait (%p2122_p4), [#allocation5], 32  }
  0x55   : > { %1411 = vsyncadd (%p2123_p6), [#allocation5], 4294967264  ;;  %p2124_p7 = pmov %p2121_p3 }
  0x56   : > { %p2125_p5 = pmov %p2121_p3 }
  0x57   : > { %1413 = dma.done.wait (%p2124_p7), [#allocation8], 16  }
  0x58   : > { %1415 = vsyncadd (%p2125_p5), [#allocation8], 4294967280  ;;  %s283_s20 = sand.u32 1, %s1418_s18  }
  0x59   : > { %s1189_s26 = sshll.u32 %s283_s20, 4 }
  0x5a   : > { %s285_s27 = scalar_lea.vmem [#allocation9], %s1189_s26 }
  0x5b   : > { %289 = sfence }
  0x5c   : > { %s1191_s9 = sld [smem:[#allocation2 + $0x1]]  ;;  %v1588_v2 = vld [vmem:[%s285_s27] sm:$0xff]  ;;  %v1590_v3 = vld [vmem:[%s285_s27 + $0x8] sm:$0xff]  ;;  %s1432_s28 = smov 127   ;;  %vm1057_vm0 = vcmask 105472   ;;  %vm1059_vm1 = vcmask 211968  }
  0x5d   : > { %s1192_s15 = sld [smem:[#allocation2 + $0x2]]  ;;  %s1433_s30 = smov 126   ;;  %vm1061_vm2 = vcmask 318464   ;;  %vm1063_vm3 = vcmask 424960   ;;  %vm1065_vm4 = vcmask 531456   ;;  %vm1067_vm5 = vcmask 637952  }
  0x5e   : > { %s1194_s23 = sld [smem:[#allocation2 + $0x4]]  ;;  %p310_p8 = scmp.lt.s32.totalorder %s1487_s21, 1  ;;  %vm1069_vm6 = vcmask 744448   ;;  %vm1071_vm7 = vcmask 850944  }
  0x5f   : > { %s1195_s24 = sld [smem:[#allocation2 + $0x5]] }
  0x60   : > { %s1198_s18 = sld [smem:[#allocation2 + $0x7]]  ;;  %s2130_s21 = smov (!%p310_p8, %s1487_s21), 1 }
  0x61   : > { %s1199_s29 = sld [smem:[#allocation2 + $0x8]] }
  0x62   : > { %v319_v4 = vstv %s1191_s9  ;;  %s1202_s6 = sld [smem:[#allocation2 + $0xa]] }
  0x63   : > { %v320_v5 = vmul.f32 %v319_v4, %v1588_v2  ;;  %v327_v6 = vstv %s1192_s15  ;;  %v742_v7 = vmul.f32 %v1590_v3, %v319_v4  ;;  %s1203_s7 = sld [smem:[#allocation2 + $0xb]] }
  0x64   : > { %v328_v8 = vmul.f32 %v327_v6, %v1588_v2  ;;  %v748_v9 = vmul.f32 %v1590_v3, %v327_v6  ;;  %v342_v10 = vstv %s1194_s23  ;;  %s315_s8 = sld [smem:[#allocation2]] }
  0x65   : > { %322 = vrot.lane.b32.xlu0 %v320_v5, %s1432_s28  ;;  %744 = vrot.lane.b32.xlu1 %v742_v7, %s1432_s28  ;;  %v350_v11 = vstv %s1195_s24  ;;  %v343_v12 = vmul.f32 %v342_v10, %v1588_v2  ;;  %v757_v14 = vmul.f32 %v1590_v3, %v342_v10  ;;  %s1624_s10 = sld [smem:[#allocation2 + $0x3]] }
  0x66   : > { %v351_v13 = vmul.f32 %v350_v11, %v1588_v2  ;;  %v763_v15 = vmul.f32 %v1590_v3, %v350_v11  ;;  %v365_v16 = vstv %s1198_s18  ;;  %s334_s11 = sld [smem:[#allocation4]] }
  0x67   : > { %v373_v17 = vstv %s1199_s29  ;;  %v366_v18 = vmul.f32 %v365_v16, %v1588_v2  ;;  %v772_v20 = vmul.f32 %v1590_v3, %v365_v16  ;;  %s1627_s12 = sld [smem:[#allocation6 + $0x19]] }
  0x68   : > { %v374_v19 = vmul.f32 %v373_v17, %v1588_v2  ;;  %v778_v21 = vmul.f32 %v1590_v3, %v373_v17  ;;  %v388_v22 = vstv %s1202_s6  ;;  %s1630_s13 = sld [smem:[#allocation6 + $0xd]] }
  0x69   : > { %330 = vrot.lane.b32.xlu0 %v328_v8, %s1433_s30  ;;  %750 = vrot.lane.b32.xlu1 %v748_v9, %s1433_s30  ;;  %v396_v23 = vstv %s1203_s7  ;;  %v389_v24 = vmul.f32 %v388_v22, %v1588_v2  ;;  %v787_v26 = vmul.f32 %v1590_v3, %v388_v22  ;;  %s1632_s14 = sld [smem:[#allocation6 + $0x25]] }
  0x6a   : > { %v397_v25 = vmul.f32 %v396_v23, %v1588_v2  ;;  %v793_v27 = vmul.f32 %v1590_v3, %v396_v23  ;;  %v316_v28 = vstv %s315_s8  ;;  %s1634_s16 = sld [smem:[#allocation6 + $0xe]] }
  0x6b   : > { %v741_v29 = vmul.f32 %v1590_v3, %v316_v28  ;;  %v317_v30 = vmul.f32 %v316_v28, %v1588_v2  ;;  %s1636_s17 = sld [smem:[#allocation6 + $0x1]]  ;;  %v339_v34 = vstv %s1624_s10 }
  0x6c   : > { %s1639_s20 = sld [smem:[#allocation4 + $0x1]]  ;;  %v335_v36 = vstv %s334_s11  ;;  %v340_v41 = vmul.f32 %v339_v34, %v1588_v2 }
  0x6d   : > { %345 = vrot.lane.b32.xlu0 %v343_v12, %s1432_s28  ;;  %353 = vrot.lane.b32.xlu1 %v351_v13, %s1433_s30  ;;  %s1641_s26 = sld [smem:[#allocation6 + $0x2]]  ;;  %v577_v43 = vstv %s1627_s12 }
  0x6e   : > { %s1646_s27 = sld [smem:[#allocation2 + $0x6]]  ;;  %v494_v44 = vstv %s1630_s13 }
  0x6f   : > { %s1648_s9 = sld [smem:[#allocation6 + $0x1a]]  ;;  %v660_v52 = vstv %s1632_s14 }
  0x70   : > { %s1652_s15 = sld [smem:[#allocation6 + $0x4]]  ;;  %v502_v54 = vstv %s1634_s16 }
  0x71   : > { %759 = vrot.lane.b32.xlu0 %v757_v14, %s1432_s28  ;;  %765 = vrot.lane.b32.xlu1 %v763_v15, %s1433_s30  ;;  %s1656_s23 = sld [smem:[#allocation6 + $0x5]]  ;;  %v411_v55 = vstv %s1636_s17 }
  0x72   : > { %v358_v53 = vstv %s1639_s20  ;;  %s1664_s24 = sld [smem:[#allocation2 + $0x9]] }
  0x73   : > { %s1668_s18 = sld [smem:[#allocation6 + $0x26]]  ;;  %v419_v57 = vstv %s1641_s26 }
  0x74   : > { %v362_v61 = vstv %s1646_s27  ;;  %s1698_s29 = sld [smem:[#allocation6 + $0x10]] }
  0x75   : > { %368 = vrot.lane.b32.xlu0 %v366_v18, %s1432_s28  ;;  %376 = vrot.lane.b32.xlu1 %v374_v19, %s1433_s30  ;;  %v585_v5 = vstv %s1648_s9  ;;  %v363_v11 = vmul.f32 %v362_v61, %v1588_v2  ;;  %s1706_s6 = sld [smem:[#allocation4 + $0x2]] }
  0x76   : > { %v431_v9 = vstv %s1652_s15  ;;  %s1733_s7 = sld [smem:[#allocation4 + $0x3]] }
  0x77   : > { %v439_v10 = vstv %s1656_s23  ;;  %s1735_s8 = sld [smem:[#allocation6 + $0x1c]] }
  0x78   : > { %v385_v14 = vstv %s1664_s24  ;;  %s1742_s11 = sld [smem:[#allocation6]] }
  0x79   : > { %774 = vrot.lane.b32.xlu0 %v772_v20, %s1432_s28  ;;  %780 = vrot.lane.b32.xlu1 %v778_v21, %s1433_s30  ;;  %v668_v15 = vstv %s1668_s18  ;;  %v386_v20 = vmul.f32 %v385_v14, %v1588_v2  ;;  %v756_v2 = vmul.f32 %v1590_v3, %v339_v34  ;;  %s1745_s13 = sld [smem:[#allocation6 + $0x3]] }
  0x7a   : > { %s1752_s10 = sld [smem:[#allocation6 + $0x6]] }
  0x7b   : > { %s1754_s17 = sld [smem:[#allocation6 + $0x11]] }
  0x7c   : > { %s1765_s12 = sld [smem:[#allocation6 + $0x9]] }
  0x7d   : > { %391 = vrot.lane.b32.xlu0 %v389_v24, %s1432_s28  ;;  %399 = vrot.lane.b32.xlu1 %v397_v25, %s1433_s30  ;;  %v514_v25 = vstv %s1698_s29  ;;  %s1768_s26 = sld [smem:[#allocation6 + $0x28]] }
  0x7e   : > { %s1784_s16 = sld [smem:[#allocation6 + $0x1d]] }
  0x7f   : > { %s1813_s14 = sld [smem:[#allocation6 + $0x29]] }
  0x80   : > { %s1834_s20 = sld [smem:[#allocation6 + $0x13]] }
  0x81   : > { %789 = vrot.lane.b32.xlu0 %v787_v26, %s1432_s28  ;;  %795 = vrot.lane.b32.xlu1 %v793_v27, %s1433_s30  ;;  %s1842_s9 = sld [smem:[#allocation6 + $0x1f]] }
  0x82   : > { %s1854_s15 = sld [smem:[#allocation6 + $0x14]] }
  0x83   : > { %s1862_s27 = sld [smem:[#allocation6 + $0x2b]] }
  0x84   : > { %s1869_s23 = sld [smem:[#allocation6 + $0x7]] }
  0x85   : > { %s1872_s18 = sld [smem:[#allocation6 + $0x20]] }
  0x86   : > { %s1881_s29 = sld [smem:[#allocation6 + $0x2c]] }
  0x87   : > { %s1926_s24 = sld [smem:[#allocation6 + $0x2e]] }
  0xd7   : > { %v323_v31 = vpop.permute.xlu0 %322  ;;  %v745_v32 = vpop.permute.xlu1 %744 }
  0xd8   : > { %v747_v33 = vadd.f32 %v745_v32, %v741_v29  ;;  %v325_v35 = vadd.f32 %v323_v31, %v317_v30  ;;  %v381_v30 = vstv %s1706_s6  ;;  %s1896_s6 = sld [smem:[#allocation6 + $0x8]] }
  0xdb   : > { %v331_v37 = vpop.permute.xlu0 %330  ;;  %v751_v38 = vpop.permute.xlu1 %750 }
  0xdc   : > { %v333_v39 = vadd.f32 %v331_v37, %v325_v35  ;;  %v753_v40 = vadd.f32 %v751_v38, %v747_v33  ;;  %v404_v37 = vstv %s1733_s7  ;;  %v597_v38 = vstv %s1735_s8  ;;  %s1898_s8 = sld [smem:[#allocation6 + $0x16]] }
  0xdd   : > { %s1959_s7 = sld [smem:[#allocation6 + $0xb]] }
  0xde   : > { %v336_v42 = vadd.f32 %v335_v36, %v333_v39  ;;  %v754_v47 = vadd.f32 %v753_v40, %v335_v36 }
  0xdf   : > { %v346_v45 = vpop.permute.xlu0 %345  ;;  %v354_v49 = vpop.permute.xlu1 %353 }
  0xe0   : > { %v1654_v46 = vmax.f32 %v336_v42, 0.0  ;;  %v348_v48 = vadd.f32 %v346_v45, %v340_v41  ;;  %v1671_v59 = vmax.f32 %v754_v47, 0.0  ;;  %v408_v42 = vstv %s1742_s11  ;;  %s2045_s11 = sld [smem:[#allocation6 + $0x2a]] }
  0xe1   : > { %v427_v45 = vstv %s1745_s13  ;;  %v447_v47 = vstv %s1752_s10  ;;  %s2055_s13 = sld [smem:[#allocation6 + $0x15]] }
  0xe2   : > { %v578_v50 = vmul.f32 %v577_v43, %v1654_v46  ;;  %v495_v51 = vmul.f32 %v494_v44, %v1654_v46  ;;  %v356_v56 = vadd.f32 %v354_v49, %v348_v48  ;;  %v661_v62 = vmul.f32 %v660_v52, %v1654_v46  ;;  %s2063_s10 = sld [smem:[#allocation6 + $0x2d]] }
  0xe3   : > { %v760_v58 = vpop.permute.xlu0 %759  ;;  %v503_v63 = vmul.f32 %v502_v54, %v1654_v46  ;;  %v766_v0 = vpop.permute.xlu1 %765  ;;  %v1685_v1 = vmul.f32 %v419_v57, %v1654_v46  ;;  %v1688_v4 = vmul.f32 %v411_v55, %v1654_v46  ;;  %v802_v8 = vmul.f32 %v1671_v59, %v411_v55 }
  0xe4   : > { %580 = vrot.lane.b32.xlu1 %v578_v50, %s1432_s28  ;;  %497 = vrot.lane.b32.xlu0 %v495_v51, %s1432_s28  ;;  %v359_v60 = vadd.f32 %v358_v53, %v356_v56  ;;  %v586_v12 = vmul.f32 %v585_v5, %v1654_v46  ;;  %v859_v21 = vmul.f32 %v1671_v59, %v494_v44  ;;  %v522_v48 = vstv %s1754_s17  ;;  %s1906_s17 = sld [smem:[#allocation6 + $0x22]] }
  0xe5   : > { %v669_v22 = vmul.f32 %v668_v15, %v1654_v46  ;;  %v916_v28 = vmul.f32 %v1671_v59, %v577_v43  ;;  %v808_v29 = vmul.f32 %v1671_v59, %v419_v57  ;;  %v762_v33 = vadd.f32 %v760_v58, %v756_v2 }
  0xe6   : > { %v1691_v6 = vmax.f32 %v359_v60, 0.0  ;;  %v865_v36 = vmul.f32 %v1671_v59, %v502_v54  ;;  %v973_v44 = vmul.f32 %v1671_v59, %v660_v52  ;;  %v1795_v51 = vmul.f32 %v408_v42, %v1654_v46 }
  0xe7   : > { %v369_v7 = vpop.permute.xlu0 %368  ;;  %v377_v13 = vpop.permute.xlu1 %376  ;;  %v768_v39 = vadd.f32 %v766_v0, %v762_v33  ;;  %v467_v56 = vstv %s1765_s12  ;;  %v680_v57 = vstv %s1768_s26  ;;  %v605_v0 = vstv %s1784_s16  ;;  %s1919_s26 = sld [smem:[#allocation6 + $0x17]] }
  0xe8   : > { %663 = vrot.lane.b32.xlu1 %v661_v62, %s1432_s28  ;;  %505 = vrot.lane.b32.xlu0 %v503_v63, %s1433_s30  ;;  %v1715_v17 = vmul.f32 %v439_v10, %v1691_v6  ;;  %v1720_v18 = vmul.f32 %v431_v9, %v1691_v6  ;;  %v371_v19 = vadd.f32 %v369_v7, %v363_v11  ;;  %s1932_s16 = sld [smem:[#allocation6 + $0xa]] }
  0xe9   : > { %v515_v32 = vmul.f32 %v514_v25, %v1691_v6  ;;  %v598_v43 = vmul.f32 %v597_v38, %v1691_v6  ;;  %v769_v49 = vadd.f32 %v768_v39, %v358_v53  ;;  %v1800_v52 = vmul.f32 %v427_v45, %v1691_v6  ;;  %s2077_s12 = sld [smem:[#allocation7 + $0x2]] }
  0xea   : > { %v379_v26 = vadd.f32 %v377_v13, %v371_v19  ;;  %v523_v55 = vmul.f32 %v522_v48, %v1691_v6  ;;  %v922_v53 = vmul.f32 %v1671_v59, %v585_v5  ;;  %v979_v62 = vmul.f32 %v1671_v59, %v668_v15 }
  0xeb   : > { %v1710_v16 = vpop.permute.xlu0 %774  ;;  %v1731_v23 = vpop.permute.xlu1 %780  ;;  %v1815_v58 = vmax.f32 %v769_v49, 0.0  ;;  %v681_v63 = vmul.f32 %v680_v57, %v1691_v6  ;;  %v606_v7 = vmul.f32 %v605_v0, %v1691_v6  ;;  %v534_v13 = vstv %s1834_s20  ;;  %s1944_s20 = sld [smem:[#allocation6 + $0x2f]] }
  0xec   : > { %804 = vrot.lane.b32.xlu1 %v802_v8, %s1432_s28  ;;  %588 = vrot.lane.b32.xlu0 %v586_v12, %s1433_s30  ;;  %v382_v34 = vadd.f32 %v381_v30, %v379_v26  ;;  %v688_v8 = vstv %s1813_s14  ;;  %v786_v39 = vmul.f32 %v1590_v3, %v385_v14  ;;  %s1935_s14 = sld [smem:[#allocation6 + $0x23]] }
  0xed   : > { %v816_v5 = vmul.f32 %v1815_v58, %v431_v9  ;;  %v873_v11 = vmul.f32 %v1815_v58, %v514_v25  ;;  %v689_v12 = vmul.f32 %v688_v8, %v1691_v6  ;;  %v771_v9 = vmul.f32 %v1590_v3, %v362_v61 }
  0xee   : > { %v1772_v40 = vmax.f32 %v382_v34, 0.0  ;;  %v930_v15 = vmul.f32 %v1815_v58, %v597_v38  ;;  %v822_v19 = vmul.f32 %v1815_v58, %v439_v10  ;;  %v879_v61 = vmul.f32 %v1815_v58, %v522_v48 }
  0xef   : > { %v392_v24 = vpop.permute.xlu0 %391  ;;  %v400_v31 = vpop.permute.xlu1 %399  ;;  %v987_v2 = vmul.f32 %v1815_v58, %v680_v57  ;;  %v936_v26 = vmul.f32 %v1815_v58, %v605_v0  ;;  %v637_v57 = vstv %s1906_s17  ;;  %s2080_s17 = sld [smem:[#allocation7 + $0x3]] }
  0xf0   : > { %861 = vrot.lane.b32.xlu1 %v859_v21, %s1432_s28  ;;  %671 = vrot.lane.b32.xlu0 %v669_v22, %s1433_s30  ;;  %v394_v27 = vadd.f32 %v392_v24, %v386_v20  ;;  %v1805_v54 = vmul.f32 %v447_v47, %v1772_v40  ;;  %v535_v20 = vmul.f32 %v534_v13, %v1772_v40  ;;  %v617_v22 = vstv %s1842_s9  ;;  %s1974_s9 = sld [smem:[#allocation6 + $0x18]] }
  0xf1   : > { %v777_v21 = vadd.f32 %v1710_v16, %v771_v9  ;;  %v618_v24 = vmul.f32 %v617_v22, %v1772_v40  ;;  %v542_v16 = vstv %s1854_s15  ;;  %s1978_s15 = sld [smem:[#allocation6 + $0xc]] }
  0xf2   : > { %v402_v35 = vadd.f32 %v400_v31, %v394_v27  ;;  %v700_v27 = vstv %s1862_s27  ;;  %s1984_s27 = sld [smem:[#allocation6 + $0x24]] }
  0xf3   : > { %v783_v10 = vadd.f32 %v1731_v23, %v777_v21  ;;  %v543_v23 = vmul.f32 %v542_v16, %v1772_v40  ;;  %v701_v31 = vmul.f32 %v700_v27, %v1772_v40  ;;  %v796_v3 = vpop.permute.xlu1 %795 }
  0xf4   : > { %918 = vrot.lane.b32.xlu1 %v916_v28, %s1432_s28  ;;  %810 = vrot.lane.b32.xlu0 %v808_v29, %s1433_s30  ;;  %v405_v41 = vadd.f32 %v404_v37, %v402_v35  ;;  %v993_v29 = vmul.f32 %v1815_v58, %v688_v8  ;;  %v708_v35 = vstv %s1881_s29  ;;  %s1996_s29 = sld [smem:[#allocation6 + $0x1b]] }
  0xf5   : > { %v784_v25 = vadd.f32 %v783_v10, %v381_v30  ;;  %v625_v30 = vstv %s1872_s18  ;;  %v709_v38 = vmul.f32 %v708_v35, %v1772_v40  ;;  %s1988_s18 = sld [smem:[#allocation6 + $0xf]] }
  0xf6   : > { %v1790_v50 = vmax.f32 %v405_v41, 0.0  ;;  %v626_v34 = vmul.f32 %v625_v30, %v1772_v40  ;;  %v459_v41 = vstv %s1896_s6  ;;  %s2073_s6 = sld [smem:[#allocation7 + $0x1]] }
  0xf7   : > { %v1883_v28 = vmax.f32 %v784_v25, 0.0 }
  0xf8   : > { %867 = vrot.lane.b32.xlu1 %v865_v36, %s1433_s30  ;;  %517 = vrot.lane.b32.xlu0 %v515_v32, %s1432_s28  ;;  %v1822_v60 = vmul.f32 %v467_v56, %v1790_v50  ;;  %v451_v32 = vstv %s1869_s23  ;;  %s2059_s23 = sld [smem:[#allocation6 + $0x21]] }
  0xf9   : > { %v830_v33 = vmul.f32 %v1883_v28, %v451_v32  ;;  %v887_v36 = vmul.f32 %v1883_v28, %v534_v13  ;;  %v944_v48 = vmul.f32 %v1883_v28, %v617_v22  ;;  %v836_v49 = vmul.f32 %v1883_v28, %v459_v41 }
  0xfa   : > { %v893_v14 = vmul.f32 %v1883_v28, %v542_v16  ;;  %v1001_v0 = vmul.f32 %v1883_v28, %v700_v27  ;;  %v1007_v13 = vmul.f32 %v1883_v28, %v708_v35 }
  0xfc   : > { %600 = vrot.lane.b32.xlu1 %v598_v43, %s1432_s28  ;;  %975 = vrot.lane.b32.xlu0 %v973_v44, %s1432_s28  ;;  %v554_v43 = vstv %s1898_s8  ;;  %v790_v44 = vpop.permute.xlu0 %789  ;;  %s2006_s8 = sld [smem:[#allocation6 + $0x27]] }
 0x100   : > { %525 = vrot.lane.b32.xlu1 %v523_v55, %s1433_s30  ;;  %924 = vrot.lane.b32.xlu0 %v922_v53, %s1433_s30  ;;  %v555_v55 = vmul.f32 %v554_v43, %v1790_v50  ;;  %v792_v53 = vadd.f32 %v790_v44, %v786_v39 }
 0x104   : > { %981 = vrot.lane.b32.xlu1 %v979_v62, %s1433_s30  ;;  %683 = vrot.lane.b32.xlu0 %v681_v63, %s1432_s28  ;;  %v798_v62 = vadd.f32 %v796_v3, %v792_v53  ;;  %v638_v63 = vmul.f32 %v637_v57, %v1790_v50 }
 0x108   : > { %818 = vrot.lane.b32.xlu1 %v816_v5, %s1432_s28  ;;  %608 = vrot.lane.b32.xlu0 %v606_v7, %s1433_s30  ;;  %v562_v5 = vstv %s1919_s26  ;;  %v799_v7 = vadd.f32 %v798_v62, %v404_v37  ;;  %v645_v37 = vstv %s1935_s14  ;;  %s1434_s26 = smov 13   ;;  %s1436_s14 = smov 39  }
 0x109   : > { %v563_v8 = vmul.f32 %v562_v5, %v1790_v50  ;;  %v646_v21 = vmul.f32 %v645_v37, %v1790_v50 }
 0x10a   : > { %v1946_v9 = vmax.f32 %v799_v7, 0.0 }
 0x10c   : > { %875 = vrot.lane.b32.xlu1 %v873_v11, %s1432_s28  ;;  %691 = vrot.lane.b32.xlu0 %v689_v12, %s1433_s30  ;;  %v950_v11 = vmul.f32 %v1883_v28, %v625_v30  ;;  %v720_v12 = vstv %s1926_s24  ;;  %v901_v22 = vmul.f32 %v1946_v9, %v554_v43  ;;  %v964_v27 = vmul.f32 %v1946_v9, %v645_v37  ;;  %s2084_s24 = sld [smem:[#allocation7]] }
 0x10d   : > { %v1015_v25 = vmul.f32 %v1946_v9, %v720_v12 }
 0x110   : > { %932 = vrot.lane.b32.xlu1 %v930_v15, %s1432_s28  ;;  %824 = vrot.lane.b32.xlu0 %v822_v19, %s1433_s30  ;;  %v721_v15 = vmul.f32 %v720_v12, %v1790_v50  ;;  %v471_v19 = vstv %s1932_s16  ;;  %s1435_s16 = smov 26  }
 0x114   : > { %881 = vrot.lane.b32.xlu1 %v879_v61, %s1433_s30  ;;  %537 = vrot.lane.b32.xlu0 %v535_v20, %s1432_s28  ;;  %v844_v20 = vmul.f32 %v1946_v9, %v471_v19  ;;  %v728_v61 = vstv %s1944_s20  ;;  %s1437_s20 = smov 52  }
 0x115   : > { %v729_v10 = vmul.f32 %v728_v61, %v1790_v50 }
 0x118   : > { %620 = vrot.lane.b32.xlu1 %v618_v24, %s1432_s28  ;;  %989 = vrot.lane.b32.xlu0 %v987_v2, %s1432_s28  ;;  %v479_v24 = vstv %s1959_s7  ;;  %v958_v2 = vmul.f32 %v1946_v9, %v637_v57  ;;  %s1438_s7 = smov 65  }
 0x119   : > { %v850_v16 = vmul.f32 %v1946_v9, %v479_v24 }
 0x11c   : > { %545 = vrot.lane.b32.xlu1 %v543_v23, %s1433_s30  ;;  %938 = vrot.lane.b32.xlu0 %v936_v26, %s1433_s30  ;;  %v907_v23 = vmul.f32 %v1946_v9, %v562_v5  ;;  %v1021_v26 = vmul.f32 %v1946_v9, %v728_v61  ;;  %v676_v5 = vstv %s2006_s8 }
 0x120   : > { %995 = vrot.lane.b32.xlu1 %v993_v29, %s1433_s30  ;;  %703 = vrot.lane.b32.xlu0 %v701_v31, %s1432_s28  ;;  %v574_v29 = vstv %s1974_s9  ;;  %v491_v31 = vstv %s1978_s15  ;;  %s1439_s9 = smov 78   ;;  %s1440_s15 = smov 91  }
 0x121   : > { %v575_v30 = vmul.f32 %v574_v29, %v1654_v46 }
 0x124   : > { %832 = vrot.lane.b32.xlu1 %v830_v33, %s1432_s28  ;;  %628 = vrot.lane.b32.xlu0 %v626_v34, %s1433_s30  ;;  %v492_v33 = vmul.f32 %v491_v31, %v1654_v46 }
 0x128   : > { %889 = vrot.lane.b32.xlu1 %v887_v36, %s1432_s28  ;;  %711 = vrot.lane.b32.xlu0 %v709_v38, %s1433_s30  ;;  %v657_v36 = vstv %s1984_s27  ;;  %s1190_s27 = sshll.u32 %s2130_s21, 3 }
 0x129   : > { %s313_s8 = scalar_lea.vmem %s2112_s5, %s1190_s27 }
 0x12c   : > { %946 = vrot.lane.b32.xlu1 %v944_v48, %s1432_s28  ;;  %838 = vrot.lane.b32.xlu0 %v836_v49, %s1433_s30  ;;  %v460_v48 = vmul.f32 %v459_v41, %v1772_v40  ;;  %v452_v49 = vmul.f32 %v451_v32, %v1772_v40  ;;  %v480_v41 = vmul.f32 %v479_v24, %v1790_v50 }
 0x12d   : > { %v472_v32 = vmul.f32 %v471_v19, %v1790_v50  ;;  %v915_v19 = vmul.f32 %v1671_v59, %v574_v29 }
 0x130   : > { %895 = vrot.lane.b32.xlu1 %v893_v14, %s1433_s30  ;;  %557 = vrot.lane.b32.xlu0 %v555_v55, %s1432_s28 }
 0x134   : > { %640 = vrot.lane.b32.xlu1 %v638_v63, %s1432_s28  ;;  %1003 = vrot.lane.b32.xlu0 %v1001_v0, %s1432_s28 }
 0x138   : > { %565 = vrot.lane.b32.xlu1 %v563_v8, %s1433_s30  ;;  %952 = vrot.lane.b32.xlu0 %v950_v11, %s1433_s30 }
 0x13c   : > { %1009 = vrot.lane.b32.xlu1 %v1007_v13, %s1433_s30  ;;  %723 = vrot.lane.b32.xlu0 %v721_v15, %s1432_s28  ;;  %v677_v15 = vmul.f32 %v676_v5, %v1691_v6 }
 0x140   : > { %846 = vrot.lane.b32.xlu1 %v844_v20, %s1432_s28  ;;  %648 = vrot.lane.b32.xlu0 %v646_v21, %s1433_s30 }
 0x144   : > { %903 = vrot.lane.b32.xlu1 %v901_v22, %s1432_s28  ;;  %731 = vrot.lane.b32.xlu0 %v729_v10, %s1433_s30  ;;  %v814_v10 = vmul.f32 %v1815_v58, %v427_v45 }
 0x148   : > { %960 = vrot.lane.b32.xlu1 %v958_v2, %s1432_s28  ;;  %852 = vrot.lane.b32.xlu0 %v850_v16, %s1433_s30 }
 0x14c   : > { %1017 = vrot.lane.b32.xlu1 %v1015_v25, %s1432_s28  ;;  %909 = vrot.lane.b32.xlu0 %v907_v23, %s1433_s30 }
 0x150   : > { %1023 = vrot.lane.b32.xlu1 %v1021_v26, %s1433_s30  ;;  %966 = vrot.lane.b32.xlu0 %v964_v27, %s1433_s30 }
 0x154   : > { %422 = vrot.lane.b32.xlu1 %v1685_v1, %s1433_s30  ;;  %414 = vrot.lane.b32.xlu0 %v1688_v4, %s1432_s28  ;;  %v510_v1 = vstv %s1988_s18  ;;  %v658_v4 = vmul.f32 %v657_v36, %v1654_v46  ;;  %v801_v46 = vmul.f32 %v1671_v59, %v408_v42  ;;  %v858_v42 = vmul.f32 %v1671_v59, %v491_v31 }
 0x155   : > { %v871_v23 = vmul.f32 %v1815_v58, %v510_v1 }
 0x156   : > { %v581_v34 = vpop.permute.xlu1 %580  ;;  %v498_v35 = vpop.permute.xlu0 %497 }
 0x157   : > { %v583_v38 = vadd.f32 %v581_v34, %v575_v30  ;;  %v500_v39 = vadd.f32 %v498_v35, %v492_v33 }
 0x158   : > { %442 = vrot.lane.b32.xlu1 %v1715_v17, %s1433_s30  ;;  %434 = vrot.lane.b32.xlu0 %v1720_v18, %s1432_s28  ;;  %v511_v17 = vmul.f32 %v510_v1, %v1691_v6  ;;  %v593_v18 = vstv %s1996_s29 }
 0x159   : > { %v594_v0 = vmul.f32 %v593_v18, %v1691_v6  ;;  %v972_v6 = vmul.f32 %v1671_v59, %v657_v36 }
 0x15a   : > { %v664_v43 = vpop.permute.xlu1 %663  ;;  %v506_v44 = vpop.permute.xlu0 %505 }
 0x15b   : > { %v666_v55 = vadd.f32 %v664_v43, %v658_v4  ;;  %v508_v53 = vadd.f32 %v506_v44, %v500_v39  ;;  %v928_v39 = vmul.f32 %v1815_v58, %v593_v18 }
 0x15c   : > { %462 = vrot.lane.b32.xlu1 %v460_v48, %s1433_s30  ;;  %454 = vrot.lane.b32.xlu0 %v452_v49, %s1432_s28  ;;  %v985_v48 = vmul.f32 %v1815_v58, %v676_v5 }
 0x15d   : > { %v512_v3 = vadd.f32 %v511_v17, %v508_v53 }
 0x15e   : > { %v805_v14 = vpop.permute.xlu1 %804  ;;  %v589_v57 = vpop.permute.xlu0 %588 }
 0x15f   : > { %v807_v62 = vadd.f32 %v805_v14, %v801_v46  ;;  %v591_v63 = vadd.f32 %v589_v57, %v583_v38  ;;  %v696_v14 = vstv %s2045_s11 }
 0x160   : > { %482 = vrot.lane.b32.xlu1 %v480_v41, %s1433_s30  ;;  %474 = vrot.lane.b32.xlu0 %v472_v32, %s1432_s28  ;;  %s2036_s28 = sld [smem:[#allocation6 + $0x12]] }
 0x161   : > { %v595_v7 = vadd.f32 %v594_v0, %v591_v63  ;;  %s2041_s30 = sld [smem:[#allocation6 + $0x1e]]  ;;  %v697_v0 = vmul.f32 %v696_v14, %v1772_v40 }
 0x162   : > { %v862_v8 = vpop.permute.xlu1 %861  ;;  %v672_v11 = vpop.permute.xlu0 %671 }
 0x163   : > { %v864_v12 = vadd.f32 %v862_v8, %v858_v42  ;;  %v674_v13 = vadd.f32 %v672_v11, %v666_v55  ;;  %v828_v11 = vmul.f32 %v1883_v28, %v447_v47 }
 0x165   : > { %v678_v37 = vadd.f32 %v677_v15, %v674_v13 }
 0x166   : > { %v919_v20 = vpop.permute.xlu1 %918  ;;  %v811_v21 = vpop.permute.xlu0 %810  ;;  %v530_v30 = vstv %s2036_s28 }
 0x167   : > { %v921_v61 = vadd.f32 %v919_v20, %v915_v19  ;;  %v813_v22 = vadd.f32 %v811_v21, %v807_v62  ;;  %v531_v4 = vmul.f32 %v530_v30, %v1772_v40  ;;  %v613_v49 = vstv %s2041_s30 }
 0x168   : > { %v614_v18 = vmul.f32 %v613_v49, %v1772_v40  ;;  %v885_v20 = vmul.f32 %v1883_v28, %v530_v30 }
 0x169   : > { %v815_v24 = vadd.f32 %v814_v10, %v813_v22  ;;  %v550_v22 = vstv %s2055_s13 }
 0x16a   : > { %v868_v2 = vpop.permute.xlu1 %867  ;;  %v518_v16 = vpop.permute.xlu0 %517 }
 0x16b   : > { %v870_v25 = vadd.f32 %v868_v2, %v864_v12  ;;  %v520_v45 = vadd.f32 %v518_v16, %v512_v3 }
 0x16d   : > { %v872_v26 = vadd.f32 %v871_v23, %v870_v25  ;;  %v942_v23 = vmul.f32 %v1883_v28, %v613_v49 }
 0x16e   : > { %v601_v27 = vpop.permute.xlu1 %600  ;;  %v976_v29 = vpop.permute.xlu0 %975 }
 0x16f   : > { %v978_v31 = vadd.f32 %v976_v29, %v972_v6  ;;  %v603_v55 = vadd.f32 %v601_v27, %v595_v7  ;;  %v551_v6 = vmul.f32 %v550_v22, %v1790_v50 }
 0x172   : > { %v526_v33 = vpop.permute.xlu1 %525  ;;  %v925_v34 = vpop.permute.xlu0 %924 }
 0x173   : > { %v528_v35 = vadd.f32 %v526_v33, %v520_v45  ;;  %v927_v38 = vadd.f32 %v925_v34, %v921_v61  ;;  %v999_v33 = vmul.f32 %v1883_v28, %v696_v14  ;;  %v633_v34 = vstv %s2059_s23 }
 0x174   : > { %v842_v14 = vmul.f32 %v1946_v9, %v467_v56 }
 0x175   : > { %v929_v59 = vadd.f32 %v928_v39, %v927_v38  ;;  %v532_v36 = vadd.f32 %v531_v4, %v528_v35 }
 0x176   : > { %v982_v1 = vpop.permute.xlu1 %981  ;;  %v684_v43 = vpop.permute.xlu0 %683 }
 0x177   : > { %v984_v44 = vadd.f32 %v982_v1, %v978_v31  ;;  %v686_v57 = vadd.f32 %v684_v43, %v678_v37  ;;  %v716_v1 = vstv %s2063_s10 }
 0x179   : > { %v986_v53 = vadd.f32 %v985_v48, %v984_v44 }
 0x17a   : > { %v819_v17 = vpop.permute.xlu1 %818  ;;  %v609_v46 = vpop.permute.xlu0 %608 }
 0x17b   : > { %v611_v3 = vadd.f32 %v609_v46, %v603_v55  ;;  %v821_v42 = vadd.f32 %v819_v17, %v815_v24 }
 0x17d   : > { %v615_v41 = vadd.f32 %v614_v18, %v611_v3 }
 0x17e   : > { %v876_v32 = vpop.permute.xlu1 %875  ;;  %v692_v62 = vpop.permute.xlu0 %691 }
 0x17f   : > { %v694_v63 = vadd.f32 %v692_v62, %v686_v57  ;;  %v878_v12 = vadd.f32 %v876_v32, %v872_v26 }
 0x181   : > { %v698_v8 = vadd.f32 %v697_v0, %v694_v63  ;;  %v899_v0 = vmul.f32 %v1946_v9, %v550_v22 }
 0x182   : > { %v933_v58 = vpop.permute.xlu1 %932  ;;  %v825_v5 = vpop.permute.xlu0 %824 }
 0x183   : > { %v827_v7 = vadd.f32 %v825_v5, %v821_v42  ;;  %v935_v10 = vadd.f32 %v933_v58, %v929_v59 }
 0x185   : > { %v829_v13 = vadd.f32 %v828_v11, %v827_v7  ;;  %v570_v7 = vstv %s2073_s6 }
 0x186   : > { %v882_v15 = vpop.permute.xlu1 %881  ;;  %v538_v19 = vpop.permute.xlu0 %537 }
 0x187   : > { %v884_v37 = vadd.f32 %v882_v15, %v878_v12  ;;  %v540_v24 = vadd.f32 %v538_v19, %v532_v36  ;;  %v634_v36 = vmul.f32 %v633_v34, %v1790_v50  ;;  %v956_v15 = vmul.f32 %v1946_v9, %v633_v34 }
 0x189   : > { %v886_v21 = vadd.f32 %v885_v20, %v884_v37 }
 0x18a   : > { %v621_v40 = vpop.permute.xlu1 %620  ;;  %v990_v61 = vpop.permute.xlu0 %989 }
 0x18b   : > { %v992_v26 = vadd.f32 %v990_v61, %v986_v53  ;;  %v623_v35 = vadd.f32 %v621_v40, %v615_v41  ;;  %v717_v53 = vmul.f32 %v716_v1, %v1790_v50 }
 0x18e   : > { %v546_v47 = vpop.permute.xlu1 %545  ;;  %v939_v2 = vpop.permute.xlu0 %938 }
 0x18f   : > { %v548_v16 = vadd.f32 %v546_v47, %v540_v24  ;;  %v941_v25 = vadd.f32 %v939_v2, %v935_v10  ;;  %v1013_v10 = vmul.f32 %v1946_v9, %v716_v1 }
 0x191   : > { %v943_v27 = vadd.f32 %v942_v23, %v941_v25  ;;  %v552_v29 = vadd.f32 %v551_v6, %v548_v16  ;;  %v653_v16 = vstv %s2077_s12 }
 0x192   : > { %v996_v31 = vpop.permute.xlu1 %995  ;;  %v704_v30 = vpop.permute.xlu0 %703 }
 0x193   : > { %v998_v45 = vadd.f32 %v996_v31, %v992_v26  ;;  %v706_v43 = vadd.f32 %v704_v30, %v698_v8 }
 0x195   : > { %v1000_v38 = vadd.f32 %v999_v33, %v998_v45 }
 0x196   : > { %v833_v39 = vpop.permute.xlu1 %832  ;;  %v629_v4 = vpop.permute.xlu0 %628 }
 0x197   : > { %v631_v59 = vadd.f32 %v629_v4, %v623_v35  ;;  %v835_v17 = vadd.f32 %v833_v39, %v829_v13  ;;  %v487_v35 = vstv %s2084_s24 }
 0x199   : > { %v635_v44 = vadd.f32 %v634_v36, %v631_v59 }
 0x19a   : > { %v890_v48 = vpop.permute.xlu1 %889  ;;  %v712_v49 = vpop.permute.xlu0 %711 }
 0x19b   : > { %v714_v55 = vadd.f32 %v712_v49, %v706_v43  ;;  %v892_v57 = vadd.f32 %v890_v48, %v886_v21 }
 0x19d   : > { %v718_v46 = vadd.f32 %v717_v53, %v714_v55 }
 0x19e   : > { %v947_v28 = vpop.permute.xlu1 %946  ;;  %v839_v3 = vpop.permute.xlu0 %838 }
 0x19f   : > { %v841_v18 = vadd.f32 %v839_v3, %v835_v17  ;;  %v949_v58 = vadd.f32 %v947_v28, %v943_v27 }
 0x1a1   : > { %v843_v41 = vadd.f32 %v842_v14, %v841_v18 }
 0x1a2   : > { %v896_v32 = vpop.permute.xlu1 %895  ;;  %v558_v62 = vpop.permute.xlu0 %557 }
 0x1a3   : > { %v898_v63 = vadd.f32 %v896_v32, %v892_v57  ;;  %v560_v5 = vadd.f32 %v558_v62, %v552_v29  ;;  %v736_v29 = vstv %s2080_s17 }
 0x1a5   : > { %v900_v42 = vadd.f32 %v899_v0, %v898_v63 }
 0x1a6   : > { %v641_v50 = vpop.permute.xlu1 %640  ;;  %v1004_v8 = vpop.permute.xlu0 %1003 }
 0x1a7   : > { %v1006_v19 = vadd.f32 %v1004_v8, %v1000_v38  ;;  %v643_v24 = vadd.f32 %v641_v50, %v635_v44 }
 0x1aa   : > { %v566_v11 = vpop.permute.xlu1 %565  ;;  %v953_v12 = vpop.permute.xlu0 %952 }
 0x1ab   : > { %v568_v56 = vadd.f32 %v566_v11, %v560_v5  ;;  %v955_v13 = vadd.f32 %v953_v12, %v949_v58 }
 0x1ad   : > { %v571_v37 = vadd.f32 %v570_v7, %v568_v56  ;;  %v957_v20 = vadd.f32 %v956_v15, %v955_v13 }
 0x1ae   : > { %v1010_v21 = vpop.permute.xlu1 %1009  ;;  %v724_v40 = vpop.permute.xlu0 %723 }
 0x1af   : > { %v572_v61 = vmax.f32 %v571_v37, 0.0  ;;  %v1012_v22 = vadd.f32 %v1010_v21, %v1006_v19  ;;  %v726_v6 = vadd.f32 %v724_v40, %v718_v46 }
 0x1b1   : > { %1030 = vrot.lane.b32.xlu0 %v572_v61, %s1434_s26  ;;  %v1014_v47 = vadd.f32 %v1013_v10, %v1012_v22 }
 0x1b2   : > { %v847_v2 = vpop.permute.xlu1 %846  ;;  %v649_v25 = vpop.permute.xlu0 %648 }
 0x1b3   : > { %v651_v23 = vadd.f32 %v649_v25, %v643_v24  ;;  %v849_v33 = vadd.f32 %v847_v2, %v843_v41 }
 0x1b5   : > { %v654_v26 = vadd.f32 %v653_v16, %v651_v23 }
 0x1b6   : > { %v904_v27 = vpop.permute.xlu1 %903  ;;  %v732_v31 = vpop.permute.xlu0 %731 }
 0x1b7   : > { %v655_v30 = vmax.f32 %v654_v26, 0.0  ;;  %v734_v45 = vadd.f32 %v732_v31, %v726_v6  ;;  %v906_v59 = vadd.f32 %v904_v27, %v900_v42 }
 0x1b9   : > { %v737_v9 = vadd.f32 %v736_v29, %v734_v45  ;;  %1034 = vrot.lane.b32.xlu1 %v655_v30, %s1435_s16 }
 0x1ba   : > { %v961_v34 = vpop.permute.xlu1 %960  ;;  %v853_v38 = vpop.permute.xlu0 %852 }
 0x1bb   : > { %v738_v39 = vmax.f32 %v737_v9, 0.0  ;;  %v855_v4 = vadd.f32 %v853_v38, %v849_v33  ;;  %v963_v49 = vadd.f32 %v961_v34, %v957_v20 }
 0x1bd   : > { %v856_v36 = vadd.f32 %v855_v4, %v487_v35  ;;  %1038 = vrot.lane.b32.xlu0 %v738_v39, %s1436_s14 }
 0x1be   : > { %v1018_v1 = vpop.permute.xlu1 %1017  ;;  %v910_v43 = vpop.permute.xlu0 %909 }
 0x1bf   : > { %v857_v44 = vmax.f32 %v856_v36, 0.0  ;;  %v912_v48 = vadd.f32 %v910_v43, %v906_v59  ;;  %v1020_v55 = vadd.f32 %v1018_v1, %v1014_v47 }
 0x1c1   : > { %v913_v53 = vadd.f32 %v912_v48, %v570_v7  ;;  %1042 = vrot.lane.b32.xlu1 %v857_v44, %s1437_s20 }
 0x1c2   : > { %v1024_v17 = vpop.permute.xlu1 %1023  ;;  %v967_v46 = vpop.permute.xlu0 %966 }
 0x1c3   : > { %v914_v28 = vmax.f32 %v913_v53, 0.0  ;;  %v1026_v3 = vadd.f32 %v1024_v17, %v1020_v55  ;;  %v969_v18 = vadd.f32 %v967_v46, %v963_v49 }
 0x1c5   : > { %v1027_v14 = vadd.f32 %v1026_v3, %v736_v29  ;;  %v970_v57 = vadd.f32 %v969_v18, %v653_v16  ;;  %1046 = vrot.lane.b32.xlu0 %v914_v28, %s1438_s7 }
 0x1c6   : > { %v415_v41 = vpop.permute.xlu0 %414  ;;  %v423_v0 = vpop.permute.xlu1 %422 }
 0x1c7   : > { %v1028_v32 = vmax.f32 %v1027_v14, 0.0  ;;  %v971_v62 = vmax.f32 %v970_v57, 0.0  ;;  %v417_v63 = vadd.f32 %v415_v41, %v1795_v51 }
 0x1c9   : > { %v425_v42 = vadd.f32 %v423_v0, %v417_v63  ;;  %1050 = vrot.lane.b32.xlu1 %v971_v62, %s1439_s9  ;;  %1054 = vrot.lane.b32.xlu0 %v1028_v32, %s1440_s15 }
 0x1ca   : > { %v435_v8 = vpop.permute.xlu0 %434  ;;  %v443_v5 = vpop.permute.xlu1 %442 }
 0x1cb   : > { %v429_v50 = vadd.f32 %v1800_v52, %v425_v42 }
 0x1cd   : > { %v437_v58 = vadd.f32 %v435_v8, %v429_v50 }
 0x1ce   : > { %v455_v12 = vpop.permute.xlu0 %454  ;;  %v463_v13 = vpop.permute.xlu1 %462 }
 0x1cf   : > { %v445_v7 = vadd.f32 %v443_v5, %v437_v58 }
 0x1d1   : > { %v449_v11 = vadd.f32 %v1805_v54, %v445_v7 }
 0x1d2   : > { %v475_v19 = vpop.permute.xlu0 %474  ;;  %v483_v20 = vpop.permute.xlu1 %482 }
 0x1d3   : > { %v457_v56 = vadd.f32 %v455_v12, %v449_v11 }
 0x1d5   : > { %v465_v51 = vadd.f32 %v463_v13, %v457_v56 }
 0x1d7   : > { %v469_v15 = vadd.f32 %v1822_v60, %v465_v51 }
 0x1d9   : > { %v477_v37 = vadd.f32 %v475_v19, %v469_v15 }
 0x1db   : > { %v485_v21 = vadd.f32 %v483_v20, %v477_v37 }
 0x1dd   : > { %v488_v40 = vadd.f32 %v487_v35, %v485_v21 }
 0x1df   : > { %v489_v10 = vmax.f32 %v488_v40, 0.0 }
 0x223   : > { %v1031_v52 = vpop.permute.xlu0 %1030 }
 0x224   : > { %v1058_v54 = vsel %vm1057_vm0, %v489_v10, %v1031_v52 }
 0x22b   : > { %v1035_v61 = vpop.permute.xlu1 %1034 }
 0x22c   : > { %v1060_v2 = vsel %vm1059_vm1, %v1058_v54, %v1035_v61 }
 0x22f   : > { %v1039_v22 = vpop.permute.xlu0 %1038 }
 0x230   : > { %v1062_v60 = vsel %vm1061_vm2, %v1060_v2, %v1039_v22 }
 0x233   : > { %v1043_v24 = vpop.permute.xlu1 %1042 }
 0x234   : > { %v1064_v16 = vsel %vm1063_vm3, %v1062_v60, %v1043_v24 }
 0x237   : > { %v1047_v47 = vpop.permute.xlu0 %1046 }
 0x238   : > { %v1066_v25 = vsel %vm1065_vm4, %v1064_v16, %v1047_v47 }
 0x23b   : > { %v1051_v23 = vpop.permute.xlu1 %1050  ;;  %v1055_v6 = vpop.permute.xlu0 %1054 }
 0x23c   : > { %v1068_v26 = vsel %vm1067_vm5, %v1066_v25, %v1051_v23 }
 0x23d   : > { %v1070_v27 = vsel %vm1069_vm6, %v1068_v26, %v1055_v6 }
 0x23e   : > { %v1072_v29 = vsel %vm1071_vm7, %v1070_v27, 0.0 }
 0x23f   : > { %1073 = vst [vmem:[%s313_s8] sm:$0xff] %v1072_v29 }
 0x240 PF: > { %p15_p10 = scmp.ge.s32.totalorder %s1490_s22, 4   ;;  %s2126_s18 = smov %s1422_s19 }
 0x241   : > { %s2127_s19 = smov %s1500_s25  ;;  %s2128_s20 = smov %s1490_s22 }
 0x242   :  { %17 = sbr.rel (!%p15_p10) target bundleno = 4 (0x4), region = 131 }
 0x247   :  { %1093 = vsyncpa [#allocation3], 1 }
 0x248   :  { %1095 = vsyncpa [#allocation3 + $0x1], 1 }
 0x249   :  { %1096 = vsyncpa [#allocation5], 1 }
 0x24a   :  { %1097 = vsyncpa [#allocation8], 1 }

// kernel: conformer_forward.11
= control target key start
LH: loop header
LB: loop body
LE: loop exit
PB: predicated region body
PF: predicated region fallthrough
CT: control target
= control target key end

     0   :  { %v124_v0 = vmov 0.0   ;;  %vm125_vm0 = vmmov 0   ;;  %vm44_vm1 = vcmask 261120   ;;  %s190_s1 = inlined_call_operand.vmem [shape: bf16[32,128], index: 1, kind: input, shape index: {}]   ;;  %s191_s0 = inlined_call_operand.vmem [shape: f32[14,32], index: 0, kind: input, shape index: {}]   ;;  %s192_s2 = inlined_call_operand.vmem [shape: f32[1,128], index: 2, kind: input, shape index: {}]   ;;  %s193_s3 = inlined_call_operand.vmem [shape: f32[2,14,128], index: 3, kind: input, shape index: {}]   ;;  %s194_s4 = inlined_call_operand.vmem [shape: f32[2,14,128], index: 4, kind: output, shape index: {}]  }
   0x1   :  { %112 = vmatprep.subr.bf16.mxu0 %v124_v0  ;;  %v122_v1 = vld [vmem:[%s190_s1 + $0x8] sm:$0xff]   ;;  %116 = vmatprep.mubr.msk.bf16.mxu0 %vm125_vm0, %v124_v0  ;;  %v123_v2 = vld [vmem:[%s190_s1] sm:$0xff]   ;;  %v91_v9 = vld [vmem:[%s193_s3 + $0x10] sm:$0xff] }
   0x2   :  { %113 = vmatpush3.bf16.msra.mxu0 %v122_v1  ;;  %v18_v3 = vld [vmem:[%s191_s0] sm:$0xff]  ;;  %v19_v4 = vld [vmem:[%s191_s0 + $0x8] sm:$0x3f]  ;;  %v92_v16 = vld [vmem:[%s193_s3 + $0x18] sm:$0x3f] }
   0x3   :  { %114 = vmatprep.subr.bf16.mxu0 %v124_v0  ;;  %v20_v5 = vpack.c.bf16 %v19_v4, %v18_v3  ;;  %v105_v6 = vld [vmem:[%s192_s2] ss:$0 sm:$0xff]  ;;  %v90_v15 = vld [vmem:[%s193_s3 + $0x8] sm:$0x3f] }
   0x4   :  { %v89_v8 = vld [vmem:[%s193_s3] sm:$0xff] }
   0x6   :  { %115 = vmatpush3.bf16.msra.mxu0 %v123_v2 }
   0x9   :  { %117 = vmatmul.mubr.msk.bf16.vlgmr.msra.gmra.mxu0 %vm44_vm1, %v20_v5 }
  0xc9   :  { %v82_v7 = vpop.f32.mrf.mxu0 }
  0xca   :  { %v83_v10 = vadd.f32 %v105_v6, %v82_v7 }
  0xcb   :  { %v118_v11 = vpop.f32.mrf.mxu0 }
  0xcc   :  { %v93_v12 = vmul.f32 %v89_v8, %v83_v10  ;;  %v95_v13 = vmul.f32 %v91_v9, %v83_v10 }
  0xcd   :  { %v85_v14 = vpop.f32.mrf.mxu0 }
  0xce   :  { %97 = vst [vmem:[%s194_s4] sm:$0xff] %v93_v12  ;;  %99 = vst [vmem:[%s194_s4 + $0x10] sm:$0xff] %v95_v13  ;;  %v86_v17 = vadd.f32 %v105_v6, %v85_v14 }
  0xcf   :  { %v119_v18 = vpop.f32.mrf.mxu0 }
  0xd0   :  { %v94_v19 = vmul.f32 %v90_v15, %v86_v17  ;;  %v96_v20 = vmul.f32 %v92_v16, %v86_v17 }
  0xd2   :  { %98 = vst [vmem:[%s194_s4 + $0x8] sm:$0x3f] %v94_v19  ;;  %100 = vst [vmem:[%s194_s4 + $0x18] sm:$0x3f] %v96_v20 }

</bundles_post_ra>
